<compile_context>
chip_gen: v5e
topology: v5e:2x2
jax: 0.10.0
libtpu: 0.0.40
codegen_flags: <defaults>
</compile_context>

<pallas_src>
import functools

import jax
import jax.numpy as jnp
from jax import lax
from jax.experimental import pallas as pl
from jax.experimental.pallas import tpu as pltpu


def _round_up(x, m):
    return ((x + m - 1) // m) * m


# ------------------------------ fused kernel -------------------------------

def _fused_kernel(*refs, stride, TH, RH, H, W, OW, Wr, half, hidden,
                  has_expand, use_res, mxu_dtype):
    """One grid step = one batch image x one strip of TH output rows.

    refs (inputs, outputs, scratch):
      x_ref      : (1, Hp, Wr, inp)   padded input image (stride=2: even/odd
                                      column de-interleaved), resident per batch
      [w_exp_ref : (inp, hidden)      1x1 expand weights, BN scale folded
       b_exp_ref : (1, hidden)]       (only if expand_ratio != 1)
      w_dw_ref   : (9, hidden)        depthwise taps, BN scale folded
      b_dw_ref   : (1, hidden)
      w_proj_ref : (hidden, oup)      1x1 project weights, BN scale folded
      b_proj_ref : (1, oup)
      o_ref      : (1, TH, OW, oup)   output strip
      hid_ref    : (RH, Wr, hidden)   VMEM scratch: padded hidden strip
      y_ref      : (TH*OW, hidden)    VMEM scratch: post-depthwise rows
    """
    if has_expand:
        (x_ref, w_exp_ref, b_exp_ref, w_dw_ref, b_dw_ref,
         w_proj_ref, b_proj_ref, o_ref, hid_ref, y_ref) = refs
    else:
        (x_ref, w_dw_ref, b_dw_ref,
         w_proj_ref, b_proj_ref, o_ref, hid_ref, y_ref) = refs
        w_exp_ref = b_exp_ref = None

    st = stride
    # First padded-hidden row needed by this strip of output rows.
    P0 = pl.program_id(1) * (TH * st)

    # Validity mask of the hidden strip: the depthwise conv's zero padding is
    # never materialized in HBM, it is recreated here.  For stride=2 the
    # columns are stored de-interleaved: storage col c < half holds padded
    # col 2c, storage col c >= half holds padded col 2(c-half)+1.
    prow = lax.broadcasted_iota(jnp.int32, (RH, Wr), 0) + P0
    pcol = lax.broadcasted_iota(jnp.int32, (RH, Wr), 1)
    if st != 1:
        pcol = jnp.where(pcol < half, 2 * pcol, 2 * (pcol - half) + 1)
    valid = (prow >= 1) & (prow <= H) & (pcol >= 1) & (pcol <= W)
    mask = valid.astype(jnp.float32)[:, :, None]              # (RH, Wr, 1)

    # ---- Stage 1: expand 1x1 + BN + ReLU6, one MXU matmul per strip --------
    xs = x_ref[0, pl.ds(P0, RH)]                              # (RH, Wr, inp)
    if has_expand:
        xm = xs.reshape(RH * Wr, xs.shape[-1]).astype(mxu_dtype)
        h = jnp.dot(xm, w_exp_ref[...],
                    preferred_element_type=jnp.float32)       # (RH*Wr, hidden)
        h = jnp.clip(h + b_exp_ref[...], 0.0, 6.0)
        h = h.reshape(RH, Wr, hidden)
    else:
        h = xs.astype(jnp.float32)
    hid_ref[...] = h * mask

    # ---- Stage 2: depthwise 3x3 + BN + ReLU6 into the y scratch ------------
    wdw = w_dw_ref[...]                                       # (9, hidden)
    wtaps = [wdw[k:k + 1, :] for k in range(9)]               # hoisted
    bdw = b_dw_ref[...]                                       # (1, hidden)
    # Column start of tap kw inside a (de-interleaved) hidden row.
    col0 = (0, 1, 2) if st == 1 else (0, half, 1)
    for ro in range(TH):                                      # output rows
        acc = jnp.zeros((OW, hidden), jnp.float32)
        for kh in range(3):
            hrow = hid_ref[ro * st + kh]                      # one load / row
            for kw in range(3):
                c0 = col0[kw]
                acc = acc + hrow[c0:c0 + OW, :] * wtaps[kh * 3 + kw]
        y = jnp.clip(acc + bdw, 0.0, 6.0)
        y_ref[ro * OW:(ro + 1) * OW, :] = y.astype(y_ref.dtype)

    # ---- Stage 3: project 1x1 + BN (+ residual), one MXU matmul per strip --
    out = jnp.dot(y_ref[...], w_proj_ref[...],
                  preferred_element_type=jnp.float32)         # (TH*OW, oup)
    out = out + b_proj_ref[...]
    if use_res:
        # stride == 1 and inp == oup: residual from the (padded) input.
        res = x_ref[0, pl.ds(P0 + 1, TH), pl.ds(1, OW), :]    # (TH, OW, oup)
        out = out + res.reshape(TH * OW, res.shape[-1]).astype(jnp.float32)
    o_ref[0] = out.reshape(TH, OW, out.shape[-1]).astype(o_ref.dtype)


# ------------------------------ wrapper ------------------------------------

def _pick_strip(oh, target=16):
    """Output-row strip height TH and the (possibly padded) output height."""
    if oh <= target:
        return oh, oh
    for t in range(target, 3, -1):       # largest divisor of oh in [4, target]
        if oh % t == 0:
            return t, oh
    # Awkward (e.g. prime) oh: pad output rows up to a multiple of `target`
    # instead of degenerating to TH=1; extra rows are sliced off afterwards.
    return target, _round_up(oh, target)


def inverted_residual_forward(x_nchw, params, *, inp, oup, stride,
                              expand_ratio, mxu_dtype=jnp.bfloat16):
    """Equivalent of InvertedResidual.forward (BatchNorm in eval mode)."""
    N, C, H, W = x_nchw.shape
    assert C == inp and stride in (1, 2)
    hidden = int(round(inp * expand_ratio))
    has_expand = expand_ratio != 1
    use_res = (stride == 1) and (inp == oup)

    OH = (H - 1) // stride + 1
    OW = (W - 1) // stride + 1
    TH, OH_pad = _pick_strip(OH)
    S = OH_pad // TH
    RH = (TH - 1) * stride + 3           # padded hidden rows per strip
    Hp = (OH_pad - 1) * stride + 3       # padded input rows the kernel touches

    x = jnp.transpose(x_nchw, (0, 2, 3, 1))                   # NCHW -> NHWC
    # Zero-pad the *small* input only (1-px conv halo + alignment); the padding
    # of the hidden activation needed by the depthwise conv is recreated by
    # masking inside the kernel and never touches HBM.
    xp = jnp.pad(x, ((0, 0), (1, Hp - H - 1), (1, 1), (0, 0)))
    if stride == 1:
        Wr = _round_up(W + 2, 8)
        half = 0
        xr = jnp.pad(xp, ((0, 0), (0, 0), (0, Wr - (W + 2)), (0, 0)))
    else:
        # De-interleave even/odd padded columns so stride-2 depthwise taps are
        # contiguous slices inside the kernel (no strided reads).
        even = xp[:, :, 0::2, :]
        odd = xp[:, :, 1::2, :]
        half = _round_up(max(even.shape[2], odd.shape[2]), 8)
        even = jnp.pad(even, ((0, 0), (0, 0), (0, half - even.shape[2]), (0, 0)))
        odd = jnp.pad(odd, ((0, 0), (0, 0), (0, half - odd.shape[2]), (0, 0)))
        xr = jnp.concatenate([even, odd], axis=2)
        Wr = 2 * half

    kern = functools.partial(
        _fused_kernel, stride=stride, TH=TH, RH=RH, H=H, W=W, OW=OW, Wr=Wr,
        half=half, hidden=hidden, has_expand=has_expand, use_res=use_res,
        mxu_dtype=mxu_dtype)

    # TODO(synk): for very high-res layers on v7x (64 MiB VMEM), DMA only an
    # RH-row halo of x per step (memory_space=pl.ANY + make_async_copy) and
    # single-buffer the constant weight inputs instead of keeping the whole
    # padded image resident per batch.
    in_specs = [pl.BlockSpec((1, Hp, Wr, inp), lambda n, s: (n, 0, 0, 0))]
    args = [xr]
    if has_expand:
        in_specs += [pl.BlockSpec((inp, hidden), lambda n, s: (0, 0)),
                     pl.BlockSpec((1, hidden), lambda n, s: (0, 0))]
        args += [params["w_exp"].astype(mxu_dtype),
                 params["b_exp"].reshape(1, hidden)]
    in_specs += [pl.BlockSpec((9, hidden), lambda n, s: (0, 0)),
                 pl.BlockSpec((1, hidden), lambda n, s: (0, 0)),
                 pl.BlockSpec((hidden, oup), lambda n, s: (0, 0)),
                 pl.BlockSpec((1, oup), lambda n, s: (0, 0))]
    args += [params["w_dw9"], params["b_dw"].reshape(1, hidden),
             params["w_proj"].astype(mxu_dtype),
             params["b_proj"].reshape(1, oup)]

    out = pl.pallas_call(
        kern,
        out_shape=jax.ShapeDtypeStruct((N, OH_pad, OW, oup), x.dtype),
        grid=(N, S),
        in_specs=in_specs,
        out_specs=pl.BlockSpec((1, TH, OW, oup), lambda n, s: (n, s, 0, 0)),
        scratch_shapes=[pltpu.VMEM((RH, Wr, hidden), jnp.float32),
                        pltpu.VMEM((TH * OW, hidden), mxu_dtype)],
        compiler_params=pltpu.CompilerParams(
            # Strips are independent (scratch fully rewritten each step, output
            # blocks disjoint), so both axes are parallel -> v7x megacore.
            dimension_semantics=("parallel", "parallel")),
    )(*args)

    if OH_pad != OH:
        out = out[:, :OH]
    # TODO(synk): for oup < 128 a lane-dense (OW*oup) output layout would make
    # the writeback unmasked; kept (OH, OW, oup) to avoid an in-kernel relayout.
    return jnp.transpose(out, (0, 3, 1, 2))                   # NHWC -> NCHW


# ------------------------- parameter initialization ------------------------

def make_params(key, inp, oup, expand_ratio, eps=1e-5):
    hidden = int(round(inp * expand_ratio))
    ks = jax.random.split(key, 12)

    def bn(kg, kb, km, kv, c):
        gamma = 1.0 + 0.1 * jax.random.normal(kg, (c,), jnp.float32)
        beta = 0.1 * jax.random.normal(kb, (c,), jnp.float32)
        mean = 0.1 * jax.random.normal(km, (c,), jnp.float32)
        var = 0.5 + jax.random.uniform(kv, (c,), jnp.float32)
        scale = gamma / jnp.sqrt(var + eps)
        bias = beta - mean * scale
        return (gamma, beta, mean, var), scale, bias

    # Raw (PyTorch-layout) weights for the reference check.
    w_exp_oihw = 0.1 * jax.random.normal(ks[0], (hidden, inp, 1, 1), jnp.float32)
    w_dw_oihw = 0.1 * jax.random.normal(ks[1], (hidden, 1, 3, 3), jnp.float32)
    w_proj_oihw = 0.1 * jax.random.normal(ks[2], (oup, hidden, 1, 1), jnp.float32)

    bn1_raw, s_exp, b_exp = bn(ks[3], ks[4], ks[5], ks[6], hidden)
    bn2_raw, s_dw, b_dw = bn(ks[7], ks[8], ks[9], ks[10], hidden)
    bn3_raw, s_proj, b_proj = bn(*jax.random.split(ks[11], 4), oup)

    # Kernel-layout weights with the BN scale pre-folded on the out-channel
    # axis; the kernel only adds the bias.
    w_exp = jnp.transpose(w_exp_oihw[:, :, 0, 0], (1, 0)) * s_exp[None, :]
    w_dw9 = (jnp.transpose(w_dw_oihw[:, 0], (1, 2, 0)).reshape(9, hidden)
             * s_dw[None, :])
    w_proj = jnp.transpose(w_proj_oihw[:, :, 0, 0], (1, 0)) * s_proj[None, :]

    params = {
        "w_exp": w_exp, "b_exp": b_exp,
        "w_dw9": w_dw9, "b_dw": b_dw,
        "w_proj": w_proj, "b_proj": b_proj,
    }
    raw = {
        "w_exp": w_exp_oihw, "w_dw": w_dw_oihw, "w_proj": w_proj_oihw,
        "bn1": bn1_raw, "bn2": bn2_raw, "bn3": bn3_raw, "eps": eps,
    }
    return params, raw


# --------------------------- plain-JAX reference ----------------------------

def reference_forward(x, raw, *, inp, oup, stride, expand_ratio):
    eps = raw["eps"]
    hidden = int(round(inp * expand_ratio))
    use_res = (stride == 1) and (inp == oup)

    def bn_apply(y, bn_params):
        gamma, beta, mean, var = bn_params
        r = lambda a: a.reshape(1, -1, 1, 1)
        return (y - r(mean)) / jnp.sqrt(r(var) + eps) * r(gamma) + r(beta)

    hi = lax.Precision.HIGHEST
    h = x
    if expand_ratio != 1:
        h = lax.conv_general_dilated(h, raw["w_exp"], (1, 1), "VALID",
                                     dimension_numbers=("NCHW", "OIHW", "NCHW"),
                                     precision=hi)
        h = jnp.clip(bn_apply(h, raw["bn1"]), 0.0, 6.0)
    h = lax.conv_general_dilated(h, raw["w_dw"], (stride, stride),
                                 ((1, 1), (1, 1)),
                                 dimension_numbers=("NCHW", "OIHW", "NCHW"),
                                 feature_group_count=hidden, precision=hi)
    h = jnp.clip(bn_apply(h, raw["bn2"]), 0.0, 6.0)
    h = lax.conv_general_dilated(h, raw["w_proj"], (1, 1), "VALID",
                                 dimension_numbers=("NCHW", "OIHW", "NCHW"),
                                 precision=hi)
    h = bn_apply(h, raw["bn3"])
    return x + h if use_res else h


# ----------------------------------- main -----------------------------------

if __name__ == "__main__":
    # Exercise the structural paths: residual (stride=1, inp==oup), stride=2
    # downsampling, expand_ratio=1 (no expansion conv), multi-strip grids and
    # non-8-aligned / odd spatial sizes.
    configs = [
        # (inp, oup, stride, expand_ratio, H, W)
        (8, 8, 1, 4, 16, 16),     # residual path
        (8, 16, 2, 4, 16, 16),    # stride-2 downsample
        (8, 16, 1, 1, 16, 16),    # expand_ratio == 1
        (8, 8, 1, 4, 32, 12),     # multi-strip grid + non-aligned width
        (8, 16, 2, 4, 15, 13),    # stride-2, odd spatial dims
    ]
    N = 2
    key = jax.random.PRNGKey(0)

    for idx, (inp, oup, stride, er, H, W) in enumerate(configs):
        kx, kp, key = jax.random.split(key, 3)
        x = jax.random.normal(kx, (N, inp, H, W), jnp.float32)
        params, raw = make_params(kp, inp, oup, er)

        ref = reference_forward(x, raw, inp=inp, oup=oup, stride=stride,
                                expand_ratio=er)
        ref = jax.block_until_ready(ref)
        scale = float(jnp.max(jnp.abs(ref))) + 1e-6

        # f32 MXU path: tight structural check (BN folding changes rounding).
        out = inverted_residual_forward(x, params, inp=inp, oup=oup,
                                        stride=stride, expand_ratio=er,
                                        mxu_dtype=jnp.float32)
        out = jax.block_until_ready(out)
        assert out.shape == ref.shape, (idx, out.shape, ref.shape)
        err = float(jnp.max(jnp.abs(out - ref)))
        assert err <= 5e-3 * scale + 1e-4, (idx, "f32", err, scale)

        # bf16 MXU path (default on v6e/v7x): looser numerical tolerance.
        if idx in (0, 4):
            outb = inverted_residual_forward(x, params, inp=inp, oup=oup,
                                             stride=stride, expand_ratio=er,
                                             mxu_dtype=jnp.bfloat16)
            outb = jax.block_until_ready(outb)
            errb = float(jnp.max(jnp.abs(outb - ref)))
            assert errb <= 3e-2 * scale + 1e-3, (idx, "bf16", errb, scale)

    print("KERNEL_OK")
</pallas_src>

<mosaic_0001>
module attributes {stable_mosaic.version = 11 : i64} {
  func.func @_fused_kernel(%arg0: i32, %arg1: i32, %arg2: memref<1x18x24x8xf32, #tpu.memory_space<vmem>>, %arg3: memref<8x32xf32, #tpu.memory_space<vmem>>, %arg4: memref<1x32xf32, #tpu.memory_space<vmem>>, %arg5: memref<9x32xf32, #tpu.memory_space<vmem>>, %arg6: memref<1x32xf32, #tpu.memory_space<vmem>>, %arg7: memref<32x8xf32, #tpu.memory_space<vmem>>, %arg8: memref<1x8xf32, #tpu.memory_space<vmem>>, %arg9: memref<1x16x16x8xf32, #tpu.memory_space<vmem>>, %arg10: memref<18x24x32xf32, #tpu.memory_space<vmem>>, %arg11: memref<256x32xf32, #tpu.memory_space<vmem>>) attributes {dimension_semantics = [#tpu.dimension_semantics<parallel>, #tpu.dimension_semantics<parallel>], iteration_bounds = array<i64: 2, 1>, scalar_prefetch = 0 : i64, scratch_operands = 2 : i64, tpu.core_type = #tpu.core_type<tc>, window_params = [{transform_indices = @transform_0, window_bounds = array<i64: 1, 18, 24, 8>}, {pipeline_mode = #tpu.pipeline_mode<synchronous>, transform_indices = @transform_1, window_bounds = array<i64: 8, 32>}, {pipeline_mode = #tpu.pipeline_mode<synchronous>, transform_indices = @transform_2, window_bounds = array<i64: 1, 32>}, {pipeline_mode = #tpu.pipeline_mode<synchronous>, transform_indices = @transform_3, window_bounds = array<i64: 9, 32>}, {pipeline_mode = #tpu.pipeline_mode<synchronous>, transform_indices = @transform_4, window_bounds = array<i64: 1, 32>}, {pipeline_mode = #tpu.pipeline_mode<synchronous>, transform_indices = @transform_5, window_bounds = array<i64: 32, 8>}, {pipeline_mode = #tpu.pipeline_mode<synchronous>, transform_indices = @transform_6, window_bounds = array<i64: 1, 8>}, {transform_indices = @transform_7, window_bounds = array<i64: 1, 16, 16, 8>}]} {
    %c16_i32 = arith.constant 16 : i32
    %0 = arith.muli %arg1, %c16_i32 : i32
    %1 = tpu.iota {dimensions = array<i32: 0>} : vector<18x24xi32>
    %2 = vector.broadcast %0 : i32 to vector<18x24xi32>
    %3 = arith.addi %1, %2 : vector<18x24xi32>
    %4 = tpu.iota {dimensions = array<i32: 1>} : vector<18x24xi32>
    %c1_i32 = arith.constant 1 : i32
    %5 = vector.broadcast %c1_i32 : i32 to vector<18x24xi32>
    %6 = arith.cmpi sge, %3, %5 : vector<18x24xi32>
    %c16_i32_0 = arith.constant 16 : i32
    %7 = vector.broadcast %c16_i32_0 : i32 to vector<18x24xi32>
    %8 = arith.cmpi sle, %3, %7 : vector<18x24xi32>
    %9 = arith.andi %6, %8 : vector<18x24xi1>
    %c1_i32_1 = arith.constant 1 : i32
    %10 = vector.broadcast %c1_i32_1 : i32 to vector<18x24xi32>
    %11 = arith.cmpi sge, %4, %10 : vector<18x24xi32>
    %12 = arith.andi %9, %11 : vector<18x24xi1>
    %c16_i32_2 = arith.constant 16 : i32
    %13 = vector.broadcast %c16_i32_2 : i32 to vector<18x24xi32>
    %14 = arith.cmpi sle, %4, %13 : vector<18x24xi32>
    %15 = arith.andi %12, %14 : vector<18x24xi1>
    %16 = arith.extui %15 : vector<18x24xi1> to vector<18x24xi32>
    %17 = arith.sitofp %16 : vector<18x24xi32> to vector<18x24xf32>
    %18 = vector.shape_cast %17 : vector<18x24xf32> to vector<18x24x1xf32>
    %c0 = arith.constant 0 : index
    %19 = arith.index_cast %0 : i32 to index
    %c0_3 = arith.constant 0 : index
    %c0_4 = arith.constant 0 : index
    %20 = vector.load %arg2[%c0, %19, %c0_3, %c0_4] : memref<1x18x24x8xf32, #tpu.memory_space<vmem>>, vector<1x18x24x8xf32>
    %21 = vector.shape_cast %20 : vector<1x18x24x8xf32> to vector<18x24x8xf32>
    %22 = vector.shape_cast %21 : vector<18x24x8xf32> to vector<432x8xf32>
    %c0_5 = arith.constant 0 : index
    %c0_6 = arith.constant 0 : index
    %23 = vector.load %arg3[%c0_5, %c0_6] : memref<8x32xf32, #tpu.memory_space<vmem>>, vector<8x32xf32>
    %cst = arith.constant dense<0.000000e+00> : vector<432x32xf32>
    %24 = tpu.matmul %22, %23, %cst {dimension_numbers = #tpu.dot_dimension_numbers<[1], [0], [0], [1], [0, 0, 1, 1], [], []>} : vector<432x8xf32>, vector<8x32xf32>, vector<432x32xf32> -> vector<432x32xf32>
    %c0_7 = arith.constant 0 : index
    %c0_8 = arith.constant 0 : index
    %25 = vector.load %arg4[%c0_7, %c0_8] : memref<1x32xf32, #tpu.memory_space<vmem>>, vector<1x32xf32>
    %26 = vector.broadcast %25 : vector<1x32xf32> to vector<432x32xf32>
    %27 = arith.addf %24, %26 : vector<432x32xf32>
    %cst_9 = arith.constant 0.000000e+00 : f32
    %cst_10 = arith.constant 6.000000e+00 : f32
    %28 = vector.broadcast %cst_9 : f32 to vector<432x32xf32>
    %29 = arith.maximumf %28, %27 : vector<432x32xf32>
    %30 = vector.broadcast %cst_10 : f32 to vector<432x32xf32>
    %31 = arith.minimumf %30, %29 : vector<432x32xf32>
    %32 = vector.shape_cast %31 : vector<432x32xf32> to vector<18x24x32xf32>
    %33 = vector.broadcast %18 : vector<18x24x1xf32> to vector<18x24x32xf32>
    %34 = arith.mulf %32, %33 : vector<18x24x32xf32>
    %c0_11 = arith.constant 0 : index
    %c0_12 = arith.constant 0 : index
    %c0_13 = arith.constant 0 : index
    %35 = vector.load %arg10[%c0_11, %c0_12, %c0_13] : memref<18x24x32xf32, #tpu.memory_space<vmem>>, vector<18x24x32xf32>
    tpu.vector_store %arg10[%c0_11, %c0_12, %c0_13], %34 {strides = array<i32>} : memref<18x24x32xf32, #tpu.memory_space<vmem>>, vector<18x24x32xf32>,
    %c0_14 = arith.constant 0 : index
    %c0_15 = arith.constant 0 : index
    %36 = vector.load %arg5[%c0_14, %c0_15] : memref<9x32xf32, #tpu.memory_space<vmem>>, vector<9x32xf32>
    %37 = vector.extract_strided_slice %36 {offsets = [0, 0], sizes = [1, 32], strides = [1, 1]} : vector<9x32xf32> to vector<1x32xf32>
    %38 = vector.extract_strided_slice %36 {offsets = [1, 0], sizes = [1, 32], strides = [1, 1]} : vector<9x32xf32> to vector<1x32xf32>
    %39 = vector.extract_strided_slice %36 {offsets = [2, 0], sizes = [1, 32], strides = [1, 1]} : vector<9x32xf32> to vector<1x32xf32>
    %40 = vector.extract_strided_slice %36 {offsets = [3, 0], sizes = [1, 32], strides = [1, 1]} : vector<9x32xf32> to vector<1x32xf32>
    %41 = vector.extract_strided_slice %36 {offsets = [4, 0], sizes = [1, 32], strides = [1, 1]} : vector<9x32xf32> to vector<1x32xf32>
    %42 = vector.extract_strided_slice %36 {offsets = [5, 0], sizes = [1, 32], strides = [1, 1]} : vector<9x32xf32> to vector<1x32xf32>
    %43 = vector.extract_strided_slice %36 {offsets = [6, 0], sizes = [1, 32], strides = [1, 1]} : vector<9x32xf32> to vector<1x32xf32>
    %44 = vector.extract_strided_slice %36 {offsets = [7, 0], sizes = [1, 32], strides = [1, 1]} : vector<9x32xf32> to vector<1x32xf32>
    %45 = vector.extract_strided_slice %36 {offsets = [8, 0], sizes = [1, 32], strides = [1, 1]} : vector<9x32xf32> to vector<1x32xf32>
    %c0_16 = arith.constant 0 : index
    %c0_17 = arith.constant 0 : index
    %46 = vector.load %arg6[%c0_16, %c0_17] : memref<1x32xf32, #tpu.memory_space<vmem>>, vector<1x32xf32>
    %cst_18 = arith.constant 0.000000e+00 : f32
    %47 = vector.broadcast %cst_18 : f32 to vector<16x32xf32>
    %c0_19 = arith.constant 0 : index
    %c0_20 = arith.constant 0 : index
    %c0_21 = arith.constant 0 : index
    %48 = vector.load %arg10[%c0_19, %c0_20, %c0_21] : memref<18x24x32xf32, #tpu.memory_space<vmem>>, vector<1x24x32xf32>
    %49 = vector.shape_cast %48 : vector<1x24x32xf32> to vector<24x32xf32>
    %50 = vector.extract_strided_slice %49 {offsets = [0, 0], sizes = [16, 32], strides = [1, 1]} : vector<24x32xf32> to vector<16x32xf32>
    %51 = vector.broadcast %37 : vector<1x32xf32> to vector<16x32xf32>
    %52 = arith.mulf %50, %51 : vector<16x32xf32>
    %53 = arith.addf %47, %52 : vector<16x32xf32>
    %54 = vector.extract_strided_slice %49 {offsets = [1, 0], sizes = [16, 32], strides = [1, 1]} : vector<24x32xf32> to vector<16x32xf32>
    %55 = vector.broadcast %38 : vector<1x32xf32> to vector<16x32xf32>
    %56 = arith.mulf %54, %55 : vector<16x32xf32>
    %57 = arith.addf %53, %56 : vector<16x32xf32>
    %58 = vector.extract_strided_slice %49 {offsets = [2, 0], sizes = [16, 32], strides = [1, 1]} : vector<24x32xf32> to vector<16x32xf32>
    %59 = vector.broadcast %39 : vector<1x32xf32> to vector<16x32xf32>
    %60 = arith.mulf %58, %59 : vector<16x32xf32>
    %61 = arith.addf %57, %60 : vector<16x32xf32>
    %c1 = arith.constant 1 : index
    %c0_22 = arith.constant 0 : index
    %c0_23 = arith.constant 0 : index
    %62 = vector.load %arg10[%c1, %c0_22, %c0_23] : memref<18x24x32xf32, #tpu.memory_space<vmem>>, vector<1x24x32xf32>
    %63 = vector.shape_cast %62 : vector<1x24x32xf32> to vector<24x32xf32>
    %64 = vector.extract_strided_slice %63 {offsets = [0, 0], sizes = [16, 32], strides = [1, 1]} : vector<24x32xf32> to vector<16x32xf32>
    %65 = vector.broadcast %40 : vector<1x32xf32> to vector<16x32xf32>
    %66 = arith.mulf %64, %65 : vector<16x32xf32>
    %67 = arith.addf %61, %66 : vector<16x32xf32>
    %68 = vector.extract_strided_slice %63 {offsets = [1, 0], sizes = [16, 32], strides = [1, 1]} : vector<24x32xf32> to vector<16x32xf32>
    %69 = vector.broadcast %41 : vector<1x32xf32> to vector<16x32xf32>
    %70 = arith.mulf %68, %69 : vector<16x32xf32>
    %71 = arith.addf %67, %70 : vector<16x32xf32>
    %72 = vector.extract_strided_slice %63 {offsets = [2, 0], sizes = [16, 32], strides = [1, 1]} : vector<24x32xf32> to vector<16x32xf32>
    %73 = vector.broadcast %42 : vector<1x32xf32> to vector<16x32xf32>
    %74 = arith.mulf %72, %73 : vector<16x32xf32>
    %75 = arith.addf %71, %74 : vector<16x32xf32>
    %c2 = arith.constant 2 : index
    %c0_24 = arith.constant 0 : index
    %c0_25 = arith.constant 0 : index
    %76 = vector.load %arg10[%c2, %c0_24, %c0_25] : memref<18x24x32xf32, #tpu.memory_space<vmem>>, vector<1x24x32xf32>
    %77 = vector.shape_cast %76 : vector<1x24x32xf32> to vector<24x32xf32>
    %78 = vector.extract_strided_slice %77 {offsets = [0, 0], sizes = [16, 32], strides = [1, 1]} : vector<24x32xf32> to vector<16x32xf32>
    %79 = vector.broadcast %43 : vector<1x32xf32> to vector<16x32xf32>
    %80 = arith.mulf %78, %79 : vector<16x32xf32>
    %81 = arith.addf %75, %80 : vector<16x32xf32>
    %82 = vector.extract_strided_slice %77 {offsets = [1, 0], sizes = [16, 32], strides = [1, 1]} : vector<24x32xf32> to vector<16x32xf32>
    %83 = vector.broadcast %44 : vector<1x32xf32> to vector<16x32xf32>
    %84 = arith.mulf %82, %83 : vector<16x32xf32>
    %85 = arith.addf %81, %84 : vector<16x32xf32>
    %86 = vector.extract_strided_slice %77 {offsets = [2, 0], sizes = [16, 32], strides = [1, 1]} : vector<24x32xf32> to vector<16x32xf32>
    %87 = vector.broadcast %45 : vector<1x32xf32> to vector<16x32xf32>
    %88 = arith.mulf %86, %87 : vector<16x32xf32>
    %89 = arith.addf %85, %88 : vector<16x32xf32>
    %90 = vector.broadcast %46 : vector<1x32xf32> to vector<16x32xf32>
    %91 = arith.addf %89, %90 : vector<16x32xf32>
    %cst_26 = arith.constant 0.000000e+00 : f32
    %cst_27 = arith.constant 6.000000e+00 : f32
    %92 = vector.broadcast %cst_26 : f32 to vector<16x32xf32>
    %93 = arith.maximumf %92, %91 : vector<16x32xf32>
    %94 = vector.broadcast %cst_27 : f32 to vector<16x32xf32>
    %95 = arith.minimumf %94, %93 : vector<16x32xf32>
    %c0_28 = arith.constant 0 : index
    %c0_29 = arith.constant 0 : index
    %96 = vector.load %arg11[%c0_28, %c0_29] : memref<256x32xf32, #tpu.memory_space<vmem>>, vector<16x32xf32>
    tpu.vector_store %arg11[%c0_28, %c0_29], %95 {strides = array<i32>} : memref<256x32xf32, #tpu.memory_space<vmem>>, vector<16x32xf32>,
    %cst_30 = arith.constant 0.000000e+00 : f32
    %97 = vector.broadcast %cst_30 : f32 to vector<16x32xf32>
    %c1_31 = arith.constant 1 : index
    %c0_32 = arith.constant 0 : index
    %c0_33 = arith.constant 0 : index
    %98 = vector.load %arg10[%c1_31, %c0_32, %c0_33] : memref<18x24x32xf32, #tpu.memory_space<vmem>>, vector<1x24x32xf32>
    %99 = vector.shape_cast %98 : vector<1x24x32xf32> to vector<24x32xf32>
    %100 = vector.extract_strided_slice %99 {offsets = [0, 0], sizes = [16, 32], strides = [1, 1]} : vector<24x32xf32> to vector<16x32xf32>
    %101 = vector.broadcast %37 : vector<1x32xf32> to vector<16x32xf32>
    %102 = arith.mulf %100, %101 : vector<16x32xf32>
    %103 = arith.addf %97, %102 : vector<16x32xf32>
    %104 = vector.extract_strided_slice %99 {offsets = [1, 0], sizes = [16, 32], strides = [1, 1]} : vector<24x32xf32> to vector<16x32xf32>
    %105 = vector.broadcast %38 : vector<1x32xf32> to vector<16x32xf32>
    %106 = arith.mulf %104, %105 : vector<16x32xf32>
    %107 = arith.addf %103, %106 : vector<16x32xf32>
    %108 = vector.extract_strided_slice %99 {offsets = [2, 0], sizes = [16, 32], strides = [1, 1]} : vector<24x32xf32> to vector<16x32xf32>
    %109 = vector.broadcast %39 : vector<1x32xf32> to vector<16x32xf32>
    %110 = arith.mulf %108, %109 : vector<16x32xf32>
    %111 = arith.addf %107, %110 : vector<16x32xf32>
    %c2_34 = arith.constant 2 : index
    %c0_35 = arith.constant 0 : index
    %c0_36 = arith.constant 0 : index
    %112 = vector.load %arg10[%c2_34, %c0_35, %c0_36] : memref<18x24x32xf32, #tpu.memory_space<vmem>>, vector<1x24x32xf32>
    %113 = vector.shape_cast %112 : vector<1x24x32xf32> to vector<24x32xf32>
    %114 = vector.extract_strided_slice %113 {offsets = [0, 0], sizes = [16, 32], strides = [1, 1]} : vector<24x32xf32> to vector<16x32xf32>
    %115 = vector.broadcast %40 : vector<1x32xf32> to vector<16x32xf32>
    %116 = arith.mulf %114, %115 : vector<16x32xf32>
    %117 = arith.addf %111, %116 : vector<16x32xf32>
    %118 = vector.extract_strided_slice %113 {offsets = [1, 0], sizes = [16, 32], strides = [1, 1]} : vector<24x32xf32> to vector<16x32xf32>
    %119 = vector.broadcast %41 : vector<1x32xf32> to vector<16x32xf32>
    %120 = arith.mulf %118, %119 : vector<16x32xf32>
    %121 = arith.addf %117, %120 : vector<16x32xf32>
    %122 = vector.extract_strided_slice %113 {offsets = [2, 0], sizes = [16, 32], strides = [1, 1]} : vector<24x32xf32> to vector<16x32xf32>
    %123 = vector.broadcast %42 : vector<1x32xf32> to vector<16x32xf32>
    %124 = arith.mulf %122, %123 : vector<16x32xf32>
    %125 = arith.addf %121, %124 : vector<16x32xf32>
    %c3 = arith.constant 3 : index
    %c0_37 = arith.constant 0 : index
    %c0_38 = arith.constant 0 : index
    %126 = vector.load %arg10[%c3, %c0_37, %c0_38] : memref<18x24x32xf32, #tpu.memory_space<vmem>>, vector<1x24x32xf32>
    %127 = vector.shape_cast %126 : vector<1x24x32xf32> to vector<24x32xf32>
    %128 = vector.extract_strided_slice %127 {offsets = [0, 0], sizes = [16, 32], strides = [1, 1]} : vector<24x32xf32> to vector<16x32xf32>
    %129 = vector.broadcast %43 : vector<1x32xf32> to vector<16x32xf32>
    %130 = arith.mulf %128, %129 : vector<16x32xf32>
    %131 = arith.addf %125, %130 : vector<16x32xf32>
    %132 = vector.extract_strided_slice %127 {offsets = [1, 0], sizes = [16, 32], strides = [1, 1]} : vector<24x32xf32> to vector<16x32xf32>
    %133 = vector.broadcast %44 : vector<1x32xf32> to vector<16x32xf32>
    %134 = arith.mulf %132, %133 : vector<16x32xf32>
    %135 = arith.addf %131, %134 : vector<16x32xf32>
    %136 = vector.extract_strided_slice %127 {offsets = [2, 0], sizes = [16, 32], strides = [1, 1]} : vector<24x32xf32> to vector<16x32xf32>
    %137 = vector.broadcast %45 : vector<1x32xf32> to vector<16x32xf32>
    %138 = arith.mulf %136, %137 : vector<16x32xf32>
    %139 = arith.addf %135, %138 : vector<16x32xf32>
    %140 = vector.broadcast %46 : vector<1x32xf32> to vector<16x32xf32>
    %141 = arith.addf %139, %140 : vector<16x32xf32>
    %cst_39 = arith.constant 0.000000e+00 : f32
    %cst_40 = arith.constant 6.000000e+00 : f32
    %142 = vector.broadcast %cst_39 : f32 to vector<16x32xf32>
    %143 = arith.maximumf %142, %141 : vector<16x32xf32>
    %144 = vector.broadcast %cst_40 : f32 to vector<16x32xf32>
    %145 = arith.minimumf %144, %143 : vector<16x32xf32>
    %c16 = arith.constant 16 : index
    %c0_41 = arith.constant 0 : index
    %146 = vector.load %arg11[%c16, %c0_41] : memref<256x32xf32, #tpu.memory_space<vmem>>, vector<16x32xf32>
    tpu.vector_store %arg11[%c16, %c0_41], %145 {strides = array<i32>} : memref<256x32xf32, #tpu.memory_space<vmem>>, vector<16x32xf32>,
    %cst_42 = arith.constant 0.000000e+00 : f32
    %147 = vector.broadcast %cst_42 : f32 to vector<16x32xf32>
    %c2_43 = arith.constant 2 : index
    %c0_44 = arith.constant 0 : index
    %c0_45 = arith.constant 0 : index
    %148 = vector.load %arg10[%c2_43, %c0_44, %c0_45] : memref<18x24x32xf32, #tpu.memory_space<vmem>>, vector<1x24x32xf32>
    %149 = vector.shape_cast %148 : vector<1x24x32xf32> to vector<24x32xf32>
    %150 = vector.extract_strided_slice %149 {offsets = [0, 0], sizes = [16, 32], strides = [1, 1]} : vector<24x32xf32> to vector<16x32xf32>
    %151 = vector.broadcast %37 : vector<1x32xf32> to vector<16x32xf32>
    %152 = arith.mulf %150, %151 : vector<16x32xf32>
    %153 = arith.addf %147, %152 : vector<16x32xf32>
    %154 = vector.extract_strided_slice %149 {offsets = [1, 0], sizes = [16, 32], strides = [1, 1]} : vector<24x32xf32> to vector<16x32xf32>
    %155 = vector.broadcast %38 : vector<1x32xf32> to vector<16x32xf32>
    %156 = arith.mulf %154, %155 : vector<16x32xf32>
    %157 = arith.addf %153, %156 : vector<16x32xf32>
    %158 = vector.extract_strided_slice %149 {offsets = [2, 0], sizes = [16, 32], strides = [1, 1]} : vector<24x32xf32> to vector<16x32xf32>
    %159 = vector.broadcast %39 : vector<1x32xf32> to vector<16x32xf32>
    %160 = arith.mulf %158, %159 : vector<16x32xf32>
    %161 = arith.addf %157, %160 : vector<16x32xf32>
    %c3_46 = arith.constant 3 : index
    %c0_47 = arith.constant 0 : index
    %c0_48 = arith.constant 0 : index
    %162 = vector.load %arg10[%c3_46, %c0_47, %c0_48] : memref<18x24x32xf32, #tpu.memory_space<vmem>>, vector<1x24x32xf32>
    %163 = vector.shape_cast %162 : vector<1x24x32xf32> to vector<24x32xf32>
    %164 = vector.extract_strided_slice %163 {offsets = [0, 0], sizes = [16, 32], strides = [1, 1]} : vector<24x32xf32> to vector<16x32xf32>
    %165 = vector.broadcast %40 : vector<1x32xf32> to vector<16x32xf32>
    %166 = arith.mulf %164, %165 : vector<16x32xf32>
    %167 = arith.addf %161, %166 : vector<16x32xf32>
    %168 = vector.extract_strided_slice %163 {offsets = [1, 0], sizes = [16, 32], strides = [1, 1]} : vector<24x32xf32> to vector<16x32xf32>
    %169 = vector.broadcast %41 : vector<1x32xf32> to vector<16x32xf32>
    %170 = arith.mulf %168, %169 : vector<16x32xf32>
    %171 = arith.addf %167, %170 : vector<16x32xf32>
    %172 = vector.extract_strided_slice %163 {offsets = [2, 0], sizes = [16, 32], strides = [1, 1]} : vector<24x32xf32> to vector<16x32xf32>
    %173 = vector.broadcast %42 : vector<1x32xf32> to vector<16x32xf32>
    %174 = arith.mulf %172, %173 : vector<16x32xf32>
    %175 = arith.addf %171, %174 : vector<16x32xf32>
    %c4 = arith.constant 4 : index
    %c0_49 = arith.constant 0 : index
    %c0_50 = arith.constant 0 : index
    %176 = vector.load %arg10[%c4, %c0_49, %c0_50] : memref<18x24x32xf32, #tpu.memory_space<vmem>>, vector<1x24x32xf32>
    %177 = vector.shape_cast %176 : vector<1x24x32xf32> to vector<24x32xf32>
    %178 = vector.extract_strided_slice %177 {offsets = [0, 0], sizes = [16, 32], strides = [1, 1]} : vector<24x32xf32> to vector<16x32xf32>
    %179 = vector.broadcast %43 : vector<1x32xf32> to vector<16x32xf32>
    %180 = arith.mulf %178, %179 : vector<16x32xf32>
    %181 = arith.addf %175, %180 : vector<16x32xf32>
    %182 = vector.extract_strided_slice %177 {offsets = [1, 0], sizes = [16, 32], strides = [1, 1]} : vector<24x32xf32> to vector<16x32xf32>
    %183 = vector.broadcast %44 : vector<1x32xf32> to vector<16x32xf32>
    %184 = arith.mulf %182, %183 : vector<16x32xf32>
    %185 = arith.addf %181, %184 : vector<16x32xf32>
    %186 = vector.extract_strided_slice %177 {offsets = [2, 0], sizes = [16, 32], strides = [1, 1]} : vector<24x32xf32> to vector<16x32xf32>
    %187 = vector.broadcast %45 : vector<1x32xf32> to vector<16x32xf32>
    %188 = arith.mulf %186, %187 : vector<16x32xf32>
    %189 = arith.addf %185, %188 : vector<16x32xf32>
    %190 = vector.broadcast %46 : vector<1x32xf32> to vector<16x32xf32>
    %191 = arith.addf %189, %190 : vector<16x32xf32>
    %cst_51 = arith.constant 0.000000e+00 : f32
    %cst_52 = arith.constant 6.000000e+00 : f32
    %192 = vector.broadcast %cst_51 : f32 to vector<16x32xf32>
    %193 = arith.maximumf %192, %191 : vector<16x32xf32>
    %194 = vector.broadcast %cst_52 : f32 to vector<16x32xf32>
    %195 = arith.minimumf %194, %193 : vector<16x32xf32>
    %c32 = arith.constant 32 : index
    %c0_53 = arith.constant 0 : index
    %196 = vector.load %arg11[%c32, %c0_53] : memref<256x32xf32, #tpu.memory_space<vmem>>, vector<16x32xf32>
    tpu.vector_store %arg11[%c32, %c0_53], %195 {strides = array<i32>} : memref<256x32xf32, #tpu.memory_space<vmem>>, vector<16x32xf32>,
    %cst_54 = arith.constant 0.000000e+00 : f32
    %197 = vector.broadcast %cst_54 : f32 to vector<16x32xf32>
    %c3_55 = arith.constant 3 : index
    %c0_56 = arith.constant 0 : index
    %c0_57 = arith.constant 0 : index
    %198 = vector.load %arg10[%c3_55, %c0_56, %c0_57] : memref<18x24x32xf32, #tpu.memory_space<vmem>>, vector<1x24x32xf32>
    %199 = vector.shape_cast %198 : vector<1x24x32xf32> to vector<24x32xf32>
    %200 = vector.extract_strided_slice %199 {offsets = [0, 0], sizes = [16, 32], strides = [1, 1]} : vector<24x32xf32> to vector<16x32xf32>
    %201 = vector.broadcast %37 : vector<1x32xf32> to vector<16x32xf32>
    %202 = arith.mulf %200, %201 : vector<16x32xf32>
    %203 = arith.addf %197, %202 : vector<16x32xf32>
    %204 = vector.extract_strided_slice %199 {offsets = [1, 0], sizes = [16, 32], strides = [1, 1]} : vector<24x32xf32> to vector<16x32xf32>
    %205 = vector.broadcast %38 : vector<1x32xf32> to vector<16x32xf32>
    %206 = arith.mulf %204, %205 : vector<16x32xf32>
    %207 = arith.addf %203, %206 : vector<16x32xf32>
    %208 = vector.extract_strided_slice %199 {offsets = [2, 0], sizes = [16, 32], strides = [1, 1]} : vector<24x32xf32> to vector<16x32xf32>
    %209 = vector.broadcast %39 : vector<1x32xf32> to vector<16x32xf32>
    %210 = arith.mulf %208, %209 : vector<16x32xf32>
    %211 = arith.addf %207, %210 : vector<16x32xf32>
    %c4_58 = arith.constant 4 : index
    %c0_59 = arith.constant 0 : index
    %c0_60 = arith.constant 0 : index
    %212 = vector.load %arg10[%c4_58, %c0_59, %c0_60] : memref<18x24x32xf32, #tpu.memory_space<vmem>>, vector<1x24x32xf32>
    %213 = vector.shape_cast %212 : vector<1x24x32xf32> to vector<24x32xf32>
    %214 = vector.extract_strided_slice %213 {offsets = [0, 0], sizes = [16, 32], strides = [1, 1]} : vector<24x32xf32> to vector<16x32xf32>
    %215 = vector.broadcast %40 : vector<1x32xf32> to vector<16x32xf32>
    %216 = arith.mulf %214, %215 : vector<16x32xf32>
    %217 = arith.addf %211, %216 : vector<16x32xf32>
    %218 = vector.extract_strided_slice %213 {offsets = [1, 0], sizes = [16, 32], strides = [1, 1]} : vector<24x32xf32> to vector<16x32xf32>
    %219 = vector.broadcast %41 : vector<1x32xf32> to vector<16x32xf32>
    %220 = arith.mulf %218, %219 : vector<16x32xf32>
    %221 = arith.addf %217, %220 : vector<16x32xf32>
    %222 = vector.extract_strided_slice %213 {offsets = [2, 0], sizes = [16, 32], strides = [1, 1]} : vector<24x32xf32> to vector<16x32xf32>
    %223 = vector.broadcast %42 : vector<1x32xf32> to vector<16x32xf32>
    %224 = arith.mulf %222, %223 : vector<16x32xf32>
    %225 = arith.addf %221, %224 : vector<16x32xf32>
    %c5 = arith.constant 5 : index
    %c0_61 = arith.constant 0 : index
    %c0_62 = arith.constant 0 : index
    %226 = vector.load %arg10[%c5, %c0_61, %c0_62] : memref<18x24x32xf32, #tpu.memory_space<vmem>>, vector<1x24x32xf32>
    %227 = vector.shape_cast %226 : vector<1x24x32xf32> to vector<24x32xf32>
    %228 = vector.extract_strided_slice %227 {offsets = [0, 0], sizes = [16, 32], strides = [1, 1]} : vector<24x32xf32> to vector<16x32xf32>
    %229 = vector.broadcast %43 : vector<1x32xf32> to vector<16x32xf32>
    %230 = arith.mulf %228, %229 : vector<16x32xf32>
    %231 = arith.addf %225, %230 : vector<16x32xf32>
    %232 = vector.extract_strided_slice %227 {offsets = [1, 0], sizes = [16, 32], strides = [1, 1]} : vector<24x32xf32> to vector<16x32xf32>
    %233 = vector.broadcast %44 : vector<1x32xf32> to vector<16x32xf32>
    %234 = arith.mulf %232, %233 : vector<16x32xf32>
    %235 = arith.addf %231, %234 : vector<16x32xf32>
    %236 = vector.extract_strided_slice %227 {offsets = [2, 0], sizes = [16, 32], strides = [1, 1]} : vector<24x32xf32> to vector<16x32xf32>
    %237 = vector.broadcast %45 : vector<1x32xf32> to vector<16x32xf32>
    %238 = arith.mulf %236, %237 : vector<16x32xf32>
    %239 = arith.addf %235, %238 : vector<16x32xf32>
    %240 = vector.broadcast %46 : vector<1x32xf32> to vector<16x32xf32>
    %241 = arith.addf %239, %240 : vector<16x32xf32>
    %cst_63 = arith.constant 0.000000e+00 : f32
    %cst_64 = arith.constant 6.000000e+00 : f32
    %242 = vector.broadcast %cst_63 : f32 to vector<16x32xf32>
    %243 = arith.maximumf %242, %241 : vector<16x32xf32>
    %244 = vector.broadcast %cst_64 : f32 to vector<16x32xf32>
    %245 = arith.minimumf %244, %243 : vector<16x32xf32>
    %c48 = arith.constant 48 : index
    %c0_65 = arith.constant 0 : index
    %246 = vector.load %arg11[%c48, %c0_65] : memref<256x32xf32, #tpu.memory_space<vmem>>, vector<16x32xf32>
    tpu.vector_store %arg11[%c48, %c0_65], %245 {strides = array<i32>} : memref<256x32xf32, #tpu.memory_space<vmem>>, vector<16x32xf32>,
    %cst_66 = arith.constant 0.000000e+00 : f32
    %247 = vector.broadcast %cst_66 : f32 to vector<16x32xf32>
    %c4_67 = arith.constant 4 : index
    %c0_68 = arith.constant 0 : index
    %c0_69 = arith.constant 0 : index
    %248 = vector.load %arg10[%c4_67, %c0_68, %c0_69] : memref<18x24x32xf32, #tpu.memory_space<vmem>>, vector<1x24x32xf32>
    %249 = vector.shape_cast %248 : vector<1x24x32xf32> to vector<24x32xf32>
    %250 = vector.extract_strided_slice %249 {offsets = [0, 0], sizes = [16, 32], strides = [1, 1]} : vector<24x32xf32> to vector<16x32xf32>
    %251 = vector.broadcast %37 : vector<1x32xf32> to vector<16x32xf32>
    %252 = arith.mulf %250, %251 : vector<16x32xf32>
    %253 = arith.addf %247, %252 : vector<16x32xf32>
    %254 = vector.extract_strided_slice %249 {offsets = [1, 0], sizes = [16, 32], strides = [1, 1]} : vector<24x32xf32> to vector<16x32xf32>
    %255 = vector.broadcast %38 : vector<1x32xf32> to vector<16x32xf32>
    %256 = arith.mulf %254, %255 : vector<16x32xf32>
    %257 = arith.addf %253, %256 : vector<16x32xf32>
    %258 = vector.extract_strided_slice %249 {offsets = [2, 0], sizes = [16, 32], strides = [1, 1]} : vector<24x32xf32> to vector<16x32xf32>
    %259 = vector.broadcast %39 : vector<1x32xf32> to vector<16x32xf32>
    %260 = arith.mulf %258, %259 : vector<16x32xf32>
    %261 = arith.addf %257, %260 : vector<16x32xf32>
    %c5_70 = arith.constant 5 : index
    %c0_71 = arith.constant 0 : index
    %c0_72 = arith.constant 0 : index
    %262 = vector.load %arg10[%c5_70, %c0_71, %c0_72] : memref<18x24x32xf32, #tpu.memory_space<vmem>>, vector<1x24x32xf32>
    %263 = vector.shape_cast %262 : vector<1x24x32xf32> to vector<24x32xf32>
    %264 = vector.extract_strided_slice %263 {offsets = [0, 0], sizes = [16, 32], strides = [1, 1]} : vector<24x32xf32> to vector<16x32xf32>
    %265 = vector.broadcast %40 : vector<1x32xf32> to vector<16x32xf32>
    %266 = arith.mulf %264, %265 : vector<16x32xf32>
    %267 = arith.addf %261, %266 : vector<16x32xf32>
    %268 = vector.extract_strided_slice %263 {offsets = [1, 0], sizes = [16, 32], strides = [1, 1]} : vector<24x32xf32> to vector<16x32xf32>
    %269 = vector.broadcast %41 : vector<1x32xf32> to vector<16x32xf32>
    %270 = arith.mulf %268, %269 : vector<16x32xf32>
    %271 = arith.addf %267, %270 : vector<16x32xf32>
    %272 = vector.extract_strided_slice %263 {offsets = [2, 0], sizes = [16, 32], strides = [1, 1]} : vector<24x32xf32> to vector<16x32xf32>
    %273 = vector.broadcast %42 : vector<1x32xf32> to vector<16x32xf32>
    %274 = arith.mulf %272, %273 : vector<16x32xf32>
    %275 = arith.addf %271, %274 : vector<16x32xf32>
    %c6 = arith.constant 6 : index
    %c0_73 = arith.constant 0 : index
    %c0_74 = arith.constant 0 : index
    %276 = vector.load %arg10[%c6, %c0_73, %c0_74] : memref<18x24x32xf32, #tpu.memory_space<vmem>>, vector<1x24x32xf32>
    %277 = vector.shape_cast %276 : vector<1x24x32xf32> to vector<24x32xf32>
    %278 = vector.extract_strided_slice %277 {offsets = [0, 0], sizes = [16, 32], strides = [1, 1]} : vector<24x32xf32> to vector<16x32xf32>
    %279 = vector.broadcast %43 : vector<1x32xf32> to vector<16x32xf32>
    %280 = arith.mulf %278, %279 : vector<16x32xf32>
    %281 = arith.addf %275, %280 : vector<16x32xf32>
    %282 = vector.extract_strided_slice %277 {offsets = [1, 0], sizes = [16, 32], strides = [1, 1]} : vector<24x32xf32> to vector<16x32xf32>
    %283 = vector.broadcast %44 : vector<1x32xf32> to vector<16x32xf32>
    %284 = arith.mulf %282, %283 : vector<16x32xf32>
    %285 = arith.addf %281, %284 : vector<16x32xf32>
    %286 = vector.extract_strided_slice %277 {offsets = [2, 0], sizes = [16, 32], strides = [1, 1]} : vector<24x32xf32> to vector<16x32xf32>
    %287 = vector.broadcast %45 : vector<1x32xf32> to vector<16x32xf32>
    %288 = arith.mulf %286, %287 : vector<16x32xf32>
    %289 = arith.addf %285, %288 : vector<16x32xf32>
    %290 = vector.broadcast %46 : vector<1x32xf32> to vector<16x32xf32>
    %291 = arith.addf %289, %290 : vector<16x32xf32>
    %cst_75 = arith.constant 0.000000e+00 : f32
    %cst_76 = arith.constant 6.000000e+00 : f32
    %292 = vector.broadcast %cst_75 : f32 to vector<16x32xf32>
    %293 = arith.maximumf %292, %291 : vector<16x32xf32>
    %294 = vector.broadcast %cst_76 : f32 to vector<16x32xf32>
    %295 = arith.minimumf %294, %293 : vector<16x32xf32>
    %c64 = arith.constant 64 : index
    %c0_77 = arith.constant 0 : index
    %296 = vector.load %arg11[%c64, %c0_77] : memref<256x32xf32, #tpu.memory_space<vmem>>, vector<16x32xf32>
    tpu.vector_store %arg11[%c64, %c0_77], %295 {strides = array<i32>} : memref<256x32xf32, #tpu.memory_space<vmem>>, vector<16x32xf32>,
    %cst_78 = arith.constant 0.000000e+00 : f32
    %297 = vector.broadcast %cst_78 : f32 to vector<16x32xf32>
    %c5_79 = arith.constant 5 : index
    %c0_80 = arith.constant 0 : index
    %c0_81 = arith.constant 0 : index
    %298 = vector.load %arg10[%c5_79, %c0_80, %c0_81] : memref<18x24x32xf32, #tpu.memory_space<vmem>>, vector<1x24x32xf32>
    %299 = vector.shape_cast %298 : vector<1x24x32xf32> to vector<24x32xf32>
    %300 = vector.extract_strided_slice %299 {offsets = [0, 0], sizes = [16, 32], strides = [1, 1]} : vector<24x32xf32> to vector<16x32xf32>
    %301 = vector.broadcast %37 : vector<1x32xf32> to vector<16x32xf32>
    %302 = arith.mulf %300, %301 : vector<16x32xf32>
    %303 = arith.addf %297, %302 : vector<16x32xf32>
    %304 = vector.extract_strided_slice %299 {offsets = [1, 0], sizes = [16, 32], strides = [1, 1]} : vector<24x32xf32> to vector<16x32xf32>
    %305 = vector.broadcast %38 : vector<1x32xf32> to vector<16x32xf32>
    %306 = arith.mulf %304, %305 : vector<16x32xf32>
    %307 = arith.addf %303, %306 : vector<16x32xf32>
    %308 = vector.extract_strided_slice %299 {offsets = [2, 0], sizes = [16, 32], strides = [1, 1]} : vector<24x32xf32> to vector<16x32xf32>
    %309 = vector.broadcast %39 : vector<1x32xf32> to vector<16x32xf32>
    %310 = arith.mulf %308, %309 : vector<16x32xf32>
    %311 = arith.addf %307, %310 : vector<16x32xf32>
    %c6_82 = arith.constant 6 : index
    %c0_83 = arith.constant 0 : index
    %c0_84 = arith.constant 0 : index
    %312 = vector.load %arg10[%c6_82, %c0_83, %c0_84] : memref<18x24x32xf32, #tpu.memory_space<vmem>>, vector<1x24x32xf32>
    %313 = vector.shape_cast %312 : vector<1x24x32xf32> to vector<24x32xf32>
    %314 = vector.extract_strided_slice %313 {offsets = [0, 0], sizes = [16, 32], strides = [1, 1]} : vector<24x32xf32> to vector<16x32xf32>
    %315 = vector.broadcast %40 : vector<1x32xf32> to vector<16x32xf32>
    %316 = arith.mulf %314, %315 : vector<16x32xf32>
    %317 = arith.addf %311, %316 : vector<16x32xf32>
    %318 = vector.extract_strided_slice %313 {offsets = [1, 0], sizes = [16, 32], strides = [1, 1]} : vector<24x32xf32> to vector<16x32xf32>
    %319 = vector.broadcast %41 : vector<1x32xf32> to vector<16x32xf32>
    %320 = arith.mulf %318, %319 : vector<16x32xf32>
    %321 = arith.addf %317, %320 : vector<16x32xf32>
    %322 = vector.extract_strided_slice %313 {offsets = [2, 0], sizes = [16, 32], strides = [1, 1]} : vector<24x32xf32> to vector<16x32xf32>
    %323 = vector.broadcast %42 : vector<1x32xf32> to vector<16x32xf32>
    %324 = arith.mulf %322, %323 : vector<16x32xf32>
    %325 = arith.addf %321, %324 : vector<16x32xf32>
    %c7 = arith.constant 7 : index
    %c0_85 = arith.constant 0 : index
    %c0_86 = arith.constant 0 : index
    %326 = vector.load %arg10[%c7, %c0_85, %c0_86] : memref<18x24x32xf32, #tpu.memory_space<vmem>>, vector<1x24x32xf32>
    %327 = vector.shape_cast %326 : vector<1x24x32xf32> to vector<24x32xf32>
    %328 = vector.extract_strided_slice %327 {offsets = [0, 0], sizes = [16, 32], strides = [1, 1]} : vector<24x32xf32> to vector<16x32xf32>
    %329 = vector.broadcast %43 : vector<1x32xf32> to vector<16x32xf32>
    %330 = arith.mulf %328, %329 : vector<16x32xf32>
    %331 = arith.addf %325, %330 : vector<16x32xf32>
    %332 = vector.extract_strided_slice %327 {offsets = [1, 0], sizes = [16, 32], strides = [1, 1]} : vector<24x32xf32> to vector<16x32xf32>
    %333 = vector.broadcast %44 : vector<1x32xf32> to vector<16x32xf32>
    %334 = arith.mulf %332, %333 : vector<16x32xf32>
    %335 = arith.addf %331, %334 : vector<16x32xf32>
    %336 = vector.extract_strided_slice %327 {offsets = [2, 0], sizes = [16, 32], strides = [1, 1]} : vector<24x32xf32> to vector<16x32xf32>
    %337 = vector.broadcast %45 : vector<1x32xf32> to vector<16x32xf32>
    %338 = arith.mulf %336, %337 : vector<16x32xf32>
    %339 = arith.addf %335, %338 : vector<16x32xf32>
    %340 = vector.broadcast %46 : vector<1x32xf32> to vector<16x32xf32>
    %341 = arith.addf %339, %340 : vector<16x32xf32>
    %cst_87 = arith.constant 0.000000e+00 : f32
    %cst_88 = arith.constant 6.000000e+00 : f32
    %342 = vector.broadcast %cst_87 : f32 to vector<16x32xf32>
    %343 = arith.maximumf %342, %341 : vector<16x32xf32>
    %344 = vector.broadcast %cst_88 : f32 to vector<16x32xf32>
    %345 = arith.minimumf %344, %343 : vector<16x32xf32>
    %c80 = arith.constant 80 : index
    %c0_89 = arith.constant 0 : index
    %346 = vector.load %arg11[%c80, %c0_89] : memref<256x32xf32, #tpu.memory_space<vmem>>, vector<16x32xf32>
    tpu.vector_store %arg11[%c80, %c0_89], %345 {strides = array<i32>} : memref<256x32xf32, #tpu.memory_space<vmem>>, vector<16x32xf32>,
    %cst_90 = arith.constant 0.000000e+00 : f32
    %347 = vector.broadcast %cst_90 : f32 to vector<16x32xf32>
    %c6_91 = arith.constant 6 : index
    %c0_92 = arith.constant 0 : index
    %c0_93 = arith.constant 0 : index
    %348 = vector.load %arg10[%c6_91, %c0_92, %c0_93] : memref<18x24x32xf32, #tpu.memory_space<vmem>>, vector<1x24x32xf32>
    %349 = vector.shape_cast %348 : vector<1x24x32xf32> to vector<24x32xf32>
    %350 = vector.extract_strided_slice %349 {offsets = [0, 0], sizes = [16, 32], strides = [1, 1]} : vector<24x32xf32> to vector<16x32xf32>
    %351 = vector.broadcast %37 : vector<1x32xf32> to vector<16x32xf32>
    %352 = arith.mulf %350, %351 : vector<16x32xf32>
    %353 = arith.addf %347, %352 : vector<16x32xf32>
    %354 = vector.extract_strided_slice %349 {offsets = [1, 0], sizes = [16, 32], strides = [1, 1]} : vector<24x32xf32> to vector<16x32xf32>
    %355 = vector.broadcast %38 : vector<1x32xf32> to vector<16x32xf32>
    %356 = arith.mulf %354, %355 : vector<16x32xf32>
    %357 = arith.addf %353, %356 : vector<16x32xf32>
    %358 = vector.extract_strided_slice %349 {offsets = [2, 0], sizes = [16, 32], strides = [1, 1]} : vector<24x32xf32> to vector<16x32xf32>
    %359 = vector.broadcast %39 : vector<1x32xf32> to vector<16x32xf32>
    %360 = arith.mulf %358, %359 : vector<16x32xf32>
    %361 = arith.addf %357, %360 : vector<16x32xf32>
    %c7_94 = arith.constant 7 : index
    %c0_95 = arith.constant 0 : index
    %c0_96 = arith.constant 0 : index
    %362 = vector.load %arg10[%c7_94, %c0_95, %c0_96] : memref<18x24x32xf32, #tpu.memory_space<vmem>>, vector<1x24x32xf32>
    %363 = vector.shape_cast %362 : vector<1x24x32xf32> to vector<24x32xf32>
    %364 = vector.extract_strided_slice %363 {offsets = [0, 0], sizes = [16, 32], strides = [1, 1]} : vector<24x32xf32> to vector<16x32xf32>
    %365 = vector.broadcast %40 : vector<1x32xf32> to vector<16x32xf32>
    %366 = arith.mulf %364, %365 : vector<16x32xf32>
    %367 = arith.addf %361, %366 : vector<16x32xf32>
    %368 = vector.extract_strided_slice %363 {offsets = [1, 0], sizes = [16, 32], strides = [1, 1]} : vector<24x32xf32> to vector<16x32xf32>
    %369 = vector.broadcast %41 : vector<1x32xf32> to vector<16x32xf32>
    %370 = arith.mulf %368, %369 : vector<16x32xf32>
    %371 = arith.addf %367, %370 : vector<16x32xf32>
    %372 = vector.extract_strided_slice %363 {offsets = [2, 0], sizes = [16, 32], strides = [1, 1]} : vector<24x32xf32> to vector<16x32xf32>
    %373 = vector.broadcast %42 : vector<1x32xf32> to vector<16x32xf32>
    %374 = arith.mulf %372, %373 : vector<16x32xf32>
    %375 = arith.addf %371, %374 : vector<16x32xf32>
    %c8 = arith.constant 8 : index
    %c0_97 = arith.constant 0 : index
    %c0_98 = arith.constant 0 : index
    %376 = vector.load %arg10[%c8, %c0_97, %c0_98] : memref<18x24x32xf32, #tpu.memory_space<vmem>>, vector<1x24x32xf32>
    %377 = vector.shape_cast %376 : vector<1x24x32xf32> to vector<24x32xf32>
    %378 = vector.extract_strided_slice %377 {offsets = [0, 0], sizes = [16, 32], strides = [1, 1]} : vector<24x32xf32> to vector<16x32xf32>
    %379 = vector.broadcast %43 : vector<1x32xf32> to vector<16x32xf32>
    %380 = arith.mulf %378, %379 : vector<16x32xf32>
    %381 = arith.addf %375, %380 : vector<16x32xf32>
    %382 = vector.extract_strided_slice %377 {offsets = [1, 0], sizes = [16, 32], strides = [1, 1]} : vector<24x32xf32> to vector<16x32xf32>
    %383 = vector.broadcast %44 : vector<1x32xf32> to vector<16x32xf32>
    %384 = arith.mulf %382, %383 : vector<16x32xf32>
    %385 = arith.addf %381, %384 : vector<16x32xf32>
    %386 = vector.extract_strided_slice %377 {offsets = [2, 0], sizes = [16, 32], strides = [1, 1]} : vector<24x32xf32> to vector<16x32xf32>
    %387 = vector.broadcast %45 : vector<1x32xf32> to vector<16x32xf32>
    %388 = arith.mulf %386, %387 : vector<16x32xf32>
    %389 = arith.addf %385, %388 : vector<16x32xf32>
    %390 = vector.broadcast %46 : vector<1x32xf32> to vector<16x32xf32>
    %391 = arith.addf %389, %390 : vector<16x32xf32>
    %cst_99 = arith.constant 0.000000e+00 : f32
    %cst_100 = arith.constant 6.000000e+00 : f32
    %392 = vector.broadcast %cst_99 : f32 to vector<16x32xf32>
    %393 = arith.maximumf %392, %391 : vector<16x32xf32>
    %394 = vector.broadcast %cst_100 : f32 to vector<16x32xf32>
    %395 = arith.minimumf %394, %393 : vector<16x32xf32>
    %c96 = arith.constant 96 : index
    %c0_101 = arith.constant 0 : index
    %396 = vector.load %arg11[%c96, %c0_101] : memref<256x32xf32, #tpu.memory_space<vmem>>, vector<16x32xf32>
    tpu.vector_store %arg11[%c96, %c0_101], %395 {strides = array<i32>} : memref<256x32xf32, #tpu.memory_space<vmem>>, vector<16x32xf32>,
    %cst_102 = arith.constant 0.000000e+00 : f32
    %397 = vector.broadcast %cst_102 : f32 to vector<16x32xf32>
    %c7_103 = arith.constant 7 : index
    %c0_104 = arith.constant 0 : index
    %c0_105 = arith.constant 0 : index
    %398 = vector.load %arg10[%c7_103, %c0_104, %c0_105] : memref<18x24x32xf32, #tpu.memory_space<vmem>>, vector<1x24x32xf32>
    %399 = vector.shape_cast %398 : vector<1x24x32xf32> to vector<24x32xf32>
    %400 = vector.extract_strided_slice %399 {offsets = [0, 0], sizes = [16, 32], strides = [1, 1]} : vector<24x32xf32> to vector<16x32xf32>
    %401 = vector.broadcast %37 : vector<1x32xf32> to vector<16x32xf32>
    %402 = arith.mulf %400, %401 : vector<16x32xf32>
    %403 = arith.addf %397, %402 : vector<16x32xf32>
    %404 = vector.extract_strided_slice %399 {offsets = [1, 0], sizes = [16, 32], strides = [1, 1]} : vector<24x32xf32> to vector<16x32xf32>
    %405 = vector.broadcast %38 : vector<1x32xf32> to vector<16x32xf32>
    %406 = arith.mulf %404, %405 : vector<16x32xf32>
    %407 = arith.addf %403, %406 : vector<16x32xf32>
    %408 = vector.extract_strided_slice %399 {offsets = [2, 0], sizes = [16, 32], strides = [1, 1]} : vector<24x32xf32> to vector<16x32xf32>
    %409 = vector.broadcast %39 : vector<1x32xf32> to vector<16x32xf32>
    %410 = arith.mulf %408, %409 : vector<16x32xf32>
    %411 = arith.addf %407, %410 : vector<16x32xf32>
    %c8_106 = arith.constant 8 : index
    %c0_107 = arith.constant 0 : index
    %c0_108 = arith.constant 0 : index
    %412 = vector.load %arg10[%c8_106, %c0_107, %c0_108] : memref<18x24x32xf32, #tpu.memory_space<vmem>>, vector<1x24x32xf32>
    %413 = vector.shape_cast %412 : vector<1x24x32xf32> to vector<24x32xf32>
    %414 = vector.extract_strided_slice %413 {offsets = [0, 0], sizes = [16, 32], strides = [1, 1]} : vector<24x32xf32> to vector<16x32xf32>
    %415 = vector.broadcast %40 : vector<1x32xf32> to vector<16x32xf32>
    %416 = arith.mulf %414, %415 : vector<16x32xf32>
    %417 = arith.addf %411, %416 : vector<16x32xf32>
    %418 = vector.extract_strided_slice %413 {offsets = [1, 0], sizes = [16, 32], strides = [1, 1]} : vector<24x32xf32> to vector<16x32xf32>
    %419 = vector.broadcast %41 : vector<1x32xf32> to vector<16x32xf32>
    %420 = arith.mulf %418, %419 : vector<16x32xf32>
    %421 = arith.addf %417, %420 : vector<16x32xf32>
    %422 = vector.extract_strided_slice %413 {offsets = [2, 0], sizes = [16, 32], strides = [1, 1]} : vector<24x32xf32> to vector<16x32xf32>
    %423 = vector.broadcast %42 : vector<1x32xf32> to vector<16x32xf32>
    %424 = arith.mulf %422, %423 : vector<16x32xf32>
    %425 = arith.addf %421, %424 : vector<16x32xf32>
    %c9 = arith.constant 9 : index
    %c0_109 = arith.constant 0 : index
    %c0_110 = arith.constant 0 : index
    %426 = vector.load %arg10[%c9, %c0_109, %c0_110] : memref<18x24x32xf32, #tpu.memory_space<vmem>>, vector<1x24x32xf32>
    %427 = vector.shape_cast %426 : vector<1x24x32xf32> to vector<24x32xf32>
    %428 = vector.extract_strided_slice %427 {offsets = [0, 0], sizes = [16, 32], strides = [1, 1]} : vector<24x32xf32> to vector<16x32xf32>
    %429 = vector.broadcast %43 : vector<1x32xf32> to vector<16x32xf32>
    %430 = arith.mulf %428, %429 : vector<16x32xf32>
    %431 = arith.addf %425, %430 : vector<16x32xf32>
    %432 = vector.extract_strided_slice %427 {offsets = [1, 0], sizes = [16, 32], strides = [1, 1]} : vector<24x32xf32> to vector<16x32xf32>
    %433 = vector.broadcast %44 : vector<1x32xf32> to vector<16x32xf32>
    %434 = arith.mulf %432, %433 : vector<16x32xf32>
    %435 = arith.addf %431, %434 : vector<16x32xf32>
    %436 = vector.extract_strided_slice %427 {offsets = [2, 0], sizes = [16, 32], strides = [1, 1]} : vector<24x32xf32> to vector<16x32xf32>
    %437 = vector.broadcast %45 : vector<1x32xf32> to vector<16x32xf32>
    %438 = arith.mulf %436, %437 : vector<16x32xf32>
    %439 = arith.addf %435, %438 : vector<16x32xf32>
    %440 = vector.broadcast %46 : vector<1x32xf32> to vector<16x32xf32>
    %441 = arith.addf %439, %440 : vector<16x32xf32>
    %cst_111 = arith.constant 0.000000e+00 : f32
    %cst_112 = arith.constant 6.000000e+00 : f32
    %442 = vector.broadcast %cst_111 : f32 to vector<16x32xf32>
    %443 = arith.maximumf %442, %441 : vector<16x32xf32>
    %444 = vector.broadcast %cst_112 : f32 to vector<16x32xf32>
    %445 = arith.minimumf %444, %443 : vector<16x32xf32>
    %c112 = arith.constant 112 : index
    %c0_113 = arith.constant 0 : index
    %446 = vector.load %arg11[%c112, %c0_113] : memref<256x32xf32, #tpu.memory_space<vmem>>, vector<16x32xf32>
    tpu.vector_store %arg11[%c112, %c0_113], %445 {strides = array<i32>} : memref<256x32xf32, #tpu.memory_space<vmem>>, vector<16x32xf32>,
    %cst_114 = arith.constant 0.000000e+00 : f32
    %447 = vector.broadcast %cst_114 : f32 to vector<16x32xf32>
    %c8_115 = arith.constant 8 : index
    %c0_116 = arith.constant 0 : index
    %c0_117 = arith.constant 0 : index
    %448 = vector.load %arg10[%c8_115, %c0_116, %c0_117] : memref<18x24x32xf32, #tpu.memory_space<vmem>>, vector<1x24x32xf32>
    %449 = vector.shape_cast %448 : vector<1x24x32xf32> to vector<24x32xf32>
    %450 = vector.extract_strided_slice %449 {offsets = [0, 0], sizes = [16, 32], strides = [1, 1]} : vector<24x32xf32> to vector<16x32xf32>
    %451 = vector.broadcast %37 : vector<1x32xf32> to vector<16x32xf32>
    %452 = arith.mulf %450, %451 : vector<16x32xf32>
    %453 = arith.addf %447, %452 : vector<16x32xf32>
    %454 = vector.extract_strided_slice %449 {offsets = [1, 0], sizes = [16, 32], strides = [1, 1]} : vector<24x32xf32> to vector<16x32xf32>
    %455 = vector.broadcast %38 : vector<1x32xf32> to vector<16x32xf32>
    %456 = arith.mulf %454, %455 : vector<16x32xf32>
    %457 = arith.addf %453, %456 : vector<16x32xf32>
    %458 = vector.extract_strided_slice %449 {offsets = [2, 0], sizes = [16, 32], strides = [1, 1]} : vector<24x32xf32> to vector<16x32xf32>
    %459 = vector.broadcast %39 : vector<1x32xf32> to vector<16x32xf32>
    %460 = arith.mulf %458, %459 : vector<16x32xf32>
    %461 = arith.addf %457, %460 : vector<16x32xf32>
    %c9_118 = arith.constant 9 : index
    %c0_119 = arith.constant 0 : index
    %c0_120 = arith.constant 0 : index
    %462 = vector.load %arg10[%c9_118, %c0_119, %c0_120] : memref<18x24x32xf32, #tpu.memory_space<vmem>>, vector<1x24x32xf32>
    %463 = vector.shape_cast %462 : vector<1x24x32xf32> to vector<24x32xf32>
    %464 = vector.extract_strided_slice %463 {offsets = [0, 0], sizes = [16, 32], strides = [1, 1]} : vector<24x32xf32> to vector<16x32xf32>
    %465 = vector.broadcast %40 : vector<1x32xf32> to vector<16x32xf32>
    %466 = arith.mulf %464, %465 : vector<16x32xf32>
    %467 = arith.addf %461, %466 : vector<16x32xf32>
    %468 = vector.extract_strided_slice %463 {offsets = [1, 0], sizes = [16, 32], strides = [1, 1]} : vector<24x32xf32> to vector<16x32xf32>
    %469 = vector.broadcast %41 : vector<1x32xf32> to vector<16x32xf32>
    %470 = arith.mulf %468, %469 : vector<16x32xf32>
    %471 = arith.addf %467, %470 : vector<16x32xf32>
    %472 = vector.extract_strided_slice %463 {offsets = [2, 0], sizes = [16, 32], strides = [1, 1]} : vector<24x32xf32> to vector<16x32xf32>
    %473 = vector.broadcast %42 : vector<1x32xf32> to vector<16x32xf32>
    %474 = arith.mulf %472, %473 : vector<16x32xf32>
    %475 = arith.addf %471, %474 : vector<16x32xf32>
    %c10 = arith.constant 10 : index
    %c0_121 = arith.constant 0 : index
    %c0_122 = arith.constant 0 : index
    %476 = vector.load %arg10[%c10, %c0_121, %c0_122] : memref<18x24x32xf32, #tpu.memory_space<vmem>>, vector<1x24x32xf32>
    %477 = vector.shape_cast %476 : vector<1x24x32xf32> to vector<24x32xf32>
    %478 = vector.extract_strided_slice %477 {offsets = [0, 0], sizes = [16, 32], strides = [1, 1]} : vector<24x32xf32> to vector<16x32xf32>
    %479 = vector.broadcast %43 : vector<1x32xf32> to vector<16x32xf32>
    %480 = arith.mulf %478, %479 : vector<16x32xf32>
    %481 = arith.addf %475, %480 : vector<16x32xf32>
    %482 = vector.extract_strided_slice %477 {offsets = [1, 0], sizes = [16, 32], strides = [1, 1]} : vector<24x32xf32> to vector<16x32xf32>
    %483 = vector.broadcast %44 : vector<1x32xf32> to vector<16x32xf32>
    %484 = arith.mulf %482, %483 : vector<16x32xf32>
    %485 = arith.addf %481, %484 : vector<16x32xf32>
    %486 = vector.extract_strided_slice %477 {offsets = [2, 0], sizes = [16, 32], strides = [1, 1]} : vector<24x32xf32> to vector<16x32xf32>
    %487 = vector.broadcast %45 : vector<1x32xf32> to vector<16x32xf32>
    %488 = arith.mulf %486, %487 : vector<16x32xf32>
    %489 = arith.addf %485, %488 : vector<16x32xf32>
    %490 = vector.broadcast %46 : vector<1x32xf32> to vector<16x32xf32>
    %491 = arith.addf %489, %490 : vector<16x32xf32>
    %cst_123 = arith.constant 0.000000e+00 : f32
    %cst_124 = arith.constant 6.000000e+00 : f32
    %492 = vector.broadcast %cst_123 : f32 to vector<16x32xf32>
    %493 = arith.maximumf %492, %491 : vector<16x32xf32>
    %494 = vector.broadcast %cst_124 : f32 to vector<16x32xf32>
    %495 = arith.minimumf %494, %493 : vector<16x32xf32>
    %c128 = arith.constant 128 : index
    %c0_125 = arith.constant 0 : index
    %496 = vector.load %arg11[%c128, %c0_125] : memref<256x32xf32, #tpu.memory_space<vmem>>, vector<16x32xf32>
    tpu.vector_store %arg11[%c128, %c0_125], %495 {strides = array<i32>} : memref<256x32xf32, #tpu.memory_space<vmem>>, vector<16x32xf32>,
    %cst_126 = arith.constant 0.000000e+00 : f32
    %497 = vector.broadcast %cst_126 : f32 to vector<16x32xf32>
    %c9_127 = arith.constant 9 : index
    %c0_128 = arith.constant 0 : index
    %c0_129 = arith.constant 0 : index
    %498 = vector.load %arg10[%c9_127, %c0_128, %c0_129] : memref<18x24x32xf32, #tpu.memory_space<vmem>>, vector<1x24x32xf32>
    %499 = vector.shape_cast %498 : vector<1x24x32xf32> to vector<24x32xf32>
    %500 = vector.extract_strided_slice %499 {offsets = [0, 0], sizes = [16, 32], strides = [1, 1]} : vector<24x32xf32> to vector<16x32xf32>
    %501 = vector.broadcast %37 : vector<1x32xf32> to vector<16x32xf32>
    %502 = arith.mulf %500, %501 : vector<16x32xf32>
    %503 = arith.addf %497, %502 : vector<16x32xf32>
    %504 = vector.extract_strided_slice %499 {offsets = [1, 0], sizes = [16, 32], strides = [1, 1]} : vector<24x32xf32> to vector<16x32xf32>
    %505 = vector.broadcast %38 : vector<1x32xf32> to vector<16x32xf32>
    %506 = arith.mulf %504, %505 : vector<16x32xf32>
    %507 = arith.addf %503, %506 : vector<16x32xf32>
    %508 = vector.extract_strided_slice %499 {offsets = [2, 0], sizes = [16, 32], strides = [1, 1]} : vector<24x32xf32> to vector<16x32xf32>
    %509 = vector.broadcast %39 : vector<1x32xf32> to vector<16x32xf32>
    %510 = arith.mulf %508, %509 : vector<16x32xf32>
    %511 = arith.addf %507, %510 : vector<16x32xf32>
    %c10_130 = arith.constant 10 : index
    %c0_131 = arith.constant 0 : index
    %c0_132 = arith.constant 0 : index
    %512 = vector.load %arg10[%c10_130, %c0_131, %c0_132] : memref<18x24x32xf32, #tpu.memory_space<vmem>>, vector<1x24x32xf32>
    %513 = vector.shape_cast %512 : vector<1x24x32xf32> to vector<24x32xf32>
    %514 = vector.extract_strided_slice %513 {offsets = [0, 0], sizes = [16, 32], strides = [1, 1]} : vector<24x32xf32> to vector<16x32xf32>
    %515 = vector.broadcast %40 : vector<1x32xf32> to vector<16x32xf32>
    %516 = arith.mulf %514, %515 : vector<16x32xf32>
    %517 = arith.addf %511, %516 : vector<16x32xf32>
    %518 = vector.extract_strided_slice %513 {offsets = [1, 0], sizes = [16, 32], strides = [1, 1]} : vector<24x32xf32> to vector<16x32xf32>
    %519 = vector.broadcast %41 : vector<1x32xf32> to vector<16x32xf32>
    %520 = arith.mulf %518, %519 : vector<16x32xf32>
    %521 = arith.addf %517, %520 : vector<16x32xf32>
    %522 = vector.extract_strided_slice %513 {offsets = [2, 0], sizes = [16, 32], strides = [1, 1]} : vector<24x32xf32> to vector<16x32xf32>
    %523 = vector.broadcast %42 : vector<1x32xf32> to vector<16x32xf32>
    %524 = arith.mulf %522, %523 : vector<16x32xf32>
    %525 = arith.addf %521, %524 : vector<16x32xf32>
    %c11 = arith.constant 11 : index
    %c0_133 = arith.constant 0 : index
    %c0_134 = arith.constant 0 : index
    %526 = vector.load %arg10[%c11, %c0_133, %c0_134] : memref<18x24x32xf32, #tpu.memory_space<vmem>>, vector<1x24x32xf32>
    %527 = vector.shape_cast %526 : vector<1x24x32xf32> to vector<24x32xf32>
    %528 = vector.extract_strided_slice %527 {offsets = [0, 0], sizes = [16, 32], strides = [1, 1]} : vector<24x32xf32> to vector<16x32xf32>
    %529 = vector.broadcast %43 : vector<1x32xf32> to vector<16x32xf32>
    %530 = arith.mulf %528, %529 : vector<16x32xf32>
    %531 = arith.addf %525, %530 : vector<16x32xf32>
    %532 = vector.extract_strided_slice %527 {offsets = [1, 0], sizes = [16, 32], strides = [1, 1]} : vector<24x32xf32> to vector<16x32xf32>
    %533 = vector.broadcast %44 : vector<1x32xf32> to vector<16x32xf32>
    %534 = arith.mulf %532, %533 : vector<16x32xf32>
    %535 = arith.addf %531, %534 : vector<16x32xf32>
    %536 = vector.extract_strided_slice %527 {offsets = [2, 0], sizes = [16, 32], strides = [1, 1]} : vector<24x32xf32> to vector<16x32xf32>
    %537 = vector.broadcast %45 : vector<1x32xf32> to vector<16x32xf32>
    %538 = arith.mulf %536, %537 : vector<16x32xf32>
    %539 = arith.addf %535, %538 : vector<16x32xf32>
    %540 = vector.broadcast %46 : vector<1x32xf32> to vector<16x32xf32>
    %541 = arith.addf %539, %540 : vector<16x32xf32>
    %cst_135 = arith.constant 0.000000e+00 : f32
    %cst_136 = arith.constant 6.000000e+00 : f32
    %542 = vector.broadcast %cst_135 : f32 to vector<16x32xf32>
    %543 = arith.maximumf %542, %541 : vector<16x32xf32>
    %544 = vector.broadcast %cst_136 : f32 to vector<16x32xf32>
    %545 = arith.minimumf %544, %543 : vector<16x32xf32>
    %c144 = arith.constant 144 : index
    %c0_137 = arith.constant 0 : index
    %546 = vector.load %arg11[%c144, %c0_137] : memref<256x32xf32, #tpu.memory_space<vmem>>, vector<16x32xf32>
    tpu.vector_store %arg11[%c144, %c0_137], %545 {strides = array<i32>} : memref<256x32xf32, #tpu.memory_space<vmem>>, vector<16x32xf32>,
    %cst_138 = arith.constant 0.000000e+00 : f32
    %547 = vector.broadcast %cst_138 : f32 to vector<16x32xf32>
    %c10_139 = arith.constant 10 : index
    %c0_140 = arith.constant 0 : index
    %c0_141 = arith.constant 0 : index
    %548 = vector.load %arg10[%c10_139, %c0_140, %c0_141] : memref<18x24x32xf32, #tpu.memory_space<vmem>>, vector<1x24x32xf32>
    %549 = vector.shape_cast %548 : vector<1x24x32xf32> to vector<24x32xf32>
    %550 = vector.extract_strided_slice %549 {offsets = [0, 0], sizes = [16, 32], strides = [1, 1]} : vector<24x32xf32> to vector<16x32xf32>
    %551 = vector.broadcast %37 : vector<1x32xf32> to vector<16x32xf32>
    %552 = arith.mulf %550, %551 : vector<16x32xf32>
    %553 = arith.addf %547, %552 : vector<16x32xf32>
    %554 = vector.extract_strided_slice %549 {offsets = [1, 0], sizes = [16, 32], strides = [1, 1]} : vector<24x32xf32> to vector<16x32xf32>
    %555 = vector.broadcast %38 : vector<1x32xf32> to vector<16x32xf32>
    %556 = arith.mulf %554, %555 : vector<16x32xf32>
    %557 = arith.addf %553, %556 : vector<16x32xf32>
    %558 = vector.extract_strided_slice %549 {offsets = [2, 0], sizes = [16, 32], strides = [1, 1]} : vector<24x32xf32> to vector<16x32xf32>
    %559 = vector.broadcast %39 : vector<1x32xf32> to vector<16x32xf32>
    %560 = arith.mulf %558, %559 : vector<16x32xf32>
    %561 = arith.addf %557, %560 : vector<16x32xf32>
    %c11_142 = arith.constant 11 : index
    %c0_143 = arith.constant 0 : index
    %c0_144 = arith.constant 0 : index
    %562 = vector.load %arg10[%c11_142, %c0_143, %c0_144] : memref<18x24x32xf32, #tpu.memory_space<vmem>>, vector<1x24x32xf32>
    %563 = vector.shape_cast %562 : vector<1x24x32xf32> to vector<24x32xf32>
    %564 = vector.extract_strided_slice %563 {offsets = [0, 0], sizes = [16, 32], strides = [1, 1]} : vector<24x32xf32> to vector<16x32xf32>
    %565 = vector.broadcast %40 : vector<1x32xf32> to vector<16x32xf32>
    %566 = arith.mulf %564, %565 : vector<16x32xf32>
    %567 = arith.addf %561, %566 : vector<16x32xf32>
    %568 = vector.extract_strided_slice %563 {offsets = [1, 0], sizes = [16, 32], strides = [1, 1]} : vector<24x32xf32> to vector<16x32xf32>
    %569 = vector.broadcast %41 : vector<1x32xf32> to vector<16x32xf32>
    %570 = arith.mulf %568, %569 : vector<16x32xf32>
    %571 = arith.addf %567, %570 : vector<16x32xf32>
    %572 = vector.extract_strided_slice %563 {offsets = [2, 0], sizes = [16, 32], strides = [1, 1]} : vector<24x32xf32> to vector<16x32xf32>
    %573 = vector.broadcast %42 : vector<1x32xf32> to vector<16x32xf32>
    %574 = arith.mulf %572, %573 : vector<16x32xf32>
    %575 = arith.addf %571, %574 : vector<16x32xf32>
    %c12 = arith.constant 12 : index
    %c0_145 = arith.constant 0 : index
    %c0_146 = arith.constant 0 : index
    %576 = vector.load %arg10[%c12, %c0_145, %c0_146] : memref<18x24x32xf32, #tpu.memory_space<vmem>>, vector<1x24x32xf32>
    %577 = vector.shape_cast %576 : vector<1x24x32xf32> to vector<24x32xf32>
    %578 = vector.extract_strided_slice %577 {offsets = [0, 0], sizes = [16, 32], strides = [1, 1]} : vector<24x32xf32> to vector<16x32xf32>
    %579 = vector.broadcast %43 : vector<1x32xf32> to vector<16x32xf32>
    %580 = arith.mulf %578, %579 : vector<16x32xf32>
    %581 = arith.addf %575, %580 : vector<16x32xf32>
    %582 = vector.extract_strided_slice %577 {offsets = [1, 0], sizes = [16, 32], strides = [1, 1]} : vector<24x32xf32> to vector<16x32xf32>
    %583 = vector.broadcast %44 : vector<1x32xf32> to vector<16x32xf32>
    %584 = arith.mulf %582, %583 : vector<16x32xf32>
    %585 = arith.addf %581, %584 : vector<16x32xf32>
    %586 = vector.extract_strided_slice %577 {offsets = [2, 0], sizes = [16, 32], strides = [1, 1]} : vector<24x32xf32> to vector<16x32xf32>
    %587 = vector.broadcast %45 : vector<1x32xf32> to vector<16x32xf32>
    %588 = arith.mulf %586, %587 : vector<16x32xf32>
    %589 = arith.addf %585, %588 : vector<16x32xf32>
    %590 = vector.broadcast %46 : vector<1x32xf32> to vector<16x32xf32>
    %591 = arith.addf %589, %590 : vector<16x32xf32>
    %cst_147 = arith.constant 0.000000e+00 : f32
    %cst_148 = arith.constant 6.000000e+00 : f32
    %592 = vector.broadcast %cst_147 : f32 to vector<16x32xf32>
    %593 = arith.maximumf %592, %591 : vector<16x32xf32>
    %594 = vector.broadcast %cst_148 : f32 to vector<16x32xf32>
    %595 = arith.minimumf %594, %593 : vector<16x32xf32>
    %c160 = arith.constant 160 : index
    %c0_149 = arith.constant 0 : index
    %596 = vector.load %arg11[%c160, %c0_149] : memref<256x32xf32, #tpu.memory_space<vmem>>, vector<16x32xf32>
    tpu.vector_store %arg11[%c160, %c0_149], %595 {strides = array<i32>} : memref<256x32xf32, #tpu.memory_space<vmem>>, vector<16x32xf32>,
    %cst_150 = arith.constant 0.000000e+00 : f32
    %597 = vector.broadcast %cst_150 : f32 to vector<16x32xf32>
    %c11_151 = arith.constant 11 : index
    %c0_152 = arith.constant 0 : index
    %c0_153 = arith.constant 0 : index
    %598 = vector.load %arg10[%c11_151, %c0_152, %c0_153] : memref<18x24x32xf32, #tpu.memory_space<vmem>>, vector<1x24x32xf32>
    %599 = vector.shape_cast %598 : vector<1x24x32xf32> to vector<24x32xf32>
    %600 = vector.extract_strided_slice %599 {offsets = [0, 0], sizes = [16, 32], strides = [1, 1]} : vector<24x32xf32> to vector<16x32xf32>
    %601 = vector.broadcast %37 : vector<1x32xf32> to vector<16x32xf32>
    %602 = arith.mulf %600, %601 : vector<16x32xf32>
    %603 = arith.addf %597, %602 : vector<16x32xf32>
    %604 = vector.extract_strided_slice %599 {offsets = [1, 0], sizes = [16, 32], strides = [1, 1]} : vector<24x32xf32> to vector<16x32xf32>
    %605 = vector.broadcast %38 : vector<1x32xf32> to vector<16x32xf32>
    %606 = arith.mulf %604, %605 : vector<16x32xf32>
    %607 = arith.addf %603, %606 : vector<16x32xf32>
    %608 = vector.extract_strided_slice %599 {offsets = [2, 0], sizes = [16, 32], strides = [1, 1]} : vector<24x32xf32> to vector<16x32xf32>
    %609 = vector.broadcast %39 : vector<1x32xf32> to vector<16x32xf32>
    %610 = arith.mulf %608, %609 : vector<16x32xf32>
    %611 = arith.addf %607, %610 : vector<16x32xf32>
    %c12_154 = arith.constant 12 : index
    %c0_155 = arith.constant 0 : index
    %c0_156 = arith.constant 0 : index
    %612 = vector.load %arg10[%c12_154, %c0_155, %c0_156] : memref<18x24x32xf32, #tpu.memory_space<vmem>>, vector<1x24x32xf32>
    %613 = vector.shape_cast %612 : vector<1x24x32xf32> to vector<24x32xf32>
    %614 = vector.extract_strided_slice %613 {offsets = [0, 0], sizes = [16, 32], strides = [1, 1]} : vector<24x32xf32> to vector<16x32xf32>
    %615 = vector.broadcast %40 : vector<1x32xf32> to vector<16x32xf32>
    %616 = arith.mulf %614, %615 : vector<16x32xf32>
    %617 = arith.addf %611, %616 : vector<16x32xf32>
    %618 = vector.extract_strided_slice %613 {offsets = [1, 0], sizes = [16, 32], strides = [1, 1]} : vector<24x32xf32> to vector<16x32xf32>
    %619 = vector.broadcast %41 : vector<1x32xf32> to vector<16x32xf32>
    %620 = arith.mulf %618, %619 : vector<16x32xf32>
    %621 = arith.addf %617, %620 : vector<16x32xf32>
    %622 = vector.extract_strided_slice %613 {offsets = [2, 0], sizes = [16, 32], strides = [1, 1]} : vector<24x32xf32> to vector<16x32xf32>
    %623 = vector.broadcast %42 : vector<1x32xf32> to vector<16x32xf32>
    %624 = arith.mulf %622, %623 : vector<16x32xf32>
    %625 = arith.addf %621, %624 : vector<16x32xf32>
    %c13 = arith.constant 13 : index
    %c0_157 = arith.constant 0 : index
    %c0_158 = arith.constant 0 : index
    %626 = vector.load %arg10[%c13, %c0_157, %c0_158] : memref<18x24x32xf32, #tpu.memory_space<vmem>>, vector<1x24x32xf32>
    %627 = vector.shape_cast %626 : vector<1x24x32xf32> to vector<24x32xf32>
    %628 = vector.extract_strided_slice %627 {offsets = [0, 0], sizes = [16, 32], strides = [1, 1]} : vector<24x32xf32> to vector<16x32xf32>
    %629 = vector.broadcast %43 : vector<1x32xf32> to vector<16x32xf32>
    %630 = arith.mulf %628, %629 : vector<16x32xf32>
    %631 = arith.addf %625, %630 : vector<16x32xf32>
    %632 = vector.extract_strided_slice %627 {offsets = [1, 0], sizes = [16, 32], strides = [1, 1]} : vector<24x32xf32> to vector<16x32xf32>
    %633 = vector.broadcast %44 : vector<1x32xf32> to vector<16x32xf32>
    %634 = arith.mulf %632, %633 : vector<16x32xf32>
    %635 = arith.addf %631, %634 : vector<16x32xf32>
    %636 = vector.extract_strided_slice %627 {offsets = [2, 0], sizes = [16, 32], strides = [1, 1]} : vector<24x32xf32> to vector<16x32xf32>
    %637 = vector.broadcast %45 : vector<1x32xf32> to vector<16x32xf32>
    %638 = arith.mulf %636, %637 : vector<16x32xf32>
    %639 = arith.addf %635, %638 : vector<16x32xf32>
    %640 = vector.broadcast %46 : vector<1x32xf32> to vector<16x32xf32>
    %641 = arith.addf %639, %640 : vector<16x32xf32>
    %cst_159 = arith.constant 0.000000e+00 : f32
    %cst_160 = arith.constant 6.000000e+00 : f32
    %642 = vector.broadcast %cst_159 : f32 to vector<16x32xf32>
    %643 = arith.maximumf %642, %641 : vector<16x32xf32>
    %644 = vector.broadcast %cst_160 : f32 to vector<16x32xf32>
    %645 = arith.minimumf %644, %643 : vector<16x32xf32>
    %c176 = arith.constant 176 : index
    %c0_161 = arith.constant 0 : index
    %646 = vector.load %arg11[%c176, %c0_161] : memref<256x32xf32, #tpu.memory_space<vmem>>, vector<16x32xf32>
    tpu.vector_store %arg11[%c176, %c0_161], %645 {strides = array<i32>} : memref<256x32xf32, #tpu.memory_space<vmem>>, vector<16x32xf32>,
    %cst_162 = arith.constant 0.000000e+00 : f32
    %647 = vector.broadcast %cst_162 : f32 to vector<16x32xf32>
    %c12_163 = arith.constant 12 : index
    %c0_164 = arith.constant 0 : index
    %c0_165 = arith.constant 0 : index
    %648 = vector.load %arg10[%c12_163, %c0_164, %c0_165] : memref<18x24x32xf32, #tpu.memory_space<vmem>>, vector<1x24x32xf32>
    %649 = vector.shape_cast %648 : vector<1x24x32xf32> to vector<24x32xf32>
    %650 = vector.extract_strided_slice %649 {offsets = [0, 0], sizes = [16, 32], strides = [1, 1]} : vector<24x32xf32> to vector<16x32xf32>
    %651 = vector.broadcast %37 : vector<1x32xf32> to vector<16x32xf32>
    %652 = arith.mulf %650, %651 : vector<16x32xf32>
    %653 = arith.addf %647, %652 : vector<16x32xf32>
    %654 = vector.extract_strided_slice %649 {offsets = [1, 0], sizes = [16, 32], strides = [1, 1]} : vector<24x32xf32> to vector<16x32xf32>
    %655 = vector.broadcast %38 : vector<1x32xf32> to vector<16x32xf32>
    %656 = arith.mulf %654, %655 : vector<16x32xf32>
    %657 = arith.addf %653, %656 : vector<16x32xf32>
    %658 = vector.extract_strided_slice %649 {offsets = [2, 0], sizes = [16, 32], strides = [1, 1]} : vector<24x32xf32> to vector<16x32xf32>
    %659 = vector.broadcast %39 : vector<1x32xf32> to vector<16x32xf32>
    %660 = arith.mulf %658, %659 : vector<16x32xf32>
    %661 = arith.addf %657, %660 : vector<16x32xf32>
    %c13_166 = arith.constant 13 : index
    %c0_167 = arith.constant 0 : index
    %c0_168 = arith.constant 0 : index
    %662 = vector.load %arg10[%c13_166, %c0_167, %c0_168] : memref<18x24x32xf32, #tpu.memory_space<vmem>>, vector<1x24x32xf32>
    %663 = vector.shape_cast %662 : vector<1x24x32xf32> to vector<24x32xf32>
    %664 = vector.extract_strided_slice %663 {offsets = [0, 0], sizes = [16, 32], strides = [1, 1]} : vector<24x32xf32> to vector<16x32xf32>
    %665 = vector.broadcast %40 : vector<1x32xf32> to vector<16x32xf32>
    %666 = arith.mulf %664, %665 : vector<16x32xf32>
    %667 = arith.addf %661, %666 : vector<16x32xf32>
    %668 = vector.extract_strided_slice %663 {offsets = [1, 0], sizes = [16, 32], strides = [1, 1]} : vector<24x32xf32> to vector<16x32xf32>
    %669 = vector.broadcast %41 : vector<1x32xf32> to vector<16x32xf32>
    %670 = arith.mulf %668, %669 : vector<16x32xf32>
    %671 = arith.addf %667, %670 : vector<16x32xf32>
    %672 = vector.extract_strided_slice %663 {offsets = [2, 0], sizes = [16, 32], strides = [1, 1]} : vector<24x32xf32> to vector<16x32xf32>
    %673 = vector.broadcast %42 : vector<1x32xf32> to vector<16x32xf32>
    %674 = arith.mulf %672, %673 : vector<16x32xf32>
    %675 = arith.addf %671, %674 : vector<16x32xf32>
    %c14 = arith.constant 14 : index
    %c0_169 = arith.constant 0 : index
    %c0_170 = arith.constant 0 : index
    %676 = vector.load %arg10[%c14, %c0_169, %c0_170] : memref<18x24x32xf32, #tpu.memory_space<vmem>>, vector<1x24x32xf32>
    %677 = vector.shape_cast %676 : vector<1x24x32xf32> to vector<24x32xf32>
    %678 = vector.extract_strided_slice %677 {offsets = [0, 0], sizes = [16, 32], strides = [1, 1]} : vector<24x32xf32> to vector<16x32xf32>
    %679 = vector.broadcast %43 : vector<1x32xf32> to vector<16x32xf32>
    %680 = arith.mulf %678, %679 : vector<16x32xf32>
    %681 = arith.addf %675, %680 : vector<16x32xf32>
    %682 = vector.extract_strided_slice %677 {offsets = [1, 0], sizes = [16, 32], strides = [1, 1]} : vector<24x32xf32> to vector<16x32xf32>
    %683 = vector.broadcast %44 : vector<1x32xf32> to vector<16x32xf32>
    %684 = arith.mulf %682, %683 : vector<16x32xf32>
    %685 = arith.addf %681, %684 : vector<16x32xf32>
    %686 = vector.extract_strided_slice %677 {offsets = [2, 0], sizes = [16, 32], strides = [1, 1]} : vector<24x32xf32> to vector<16x32xf32>
    %687 = vector.broadcast %45 : vector<1x32xf32> to vector<16x32xf32>
    %688 = arith.mulf %686, %687 : vector<16x32xf32>
    %689 = arith.addf %685, %688 : vector<16x32xf32>
    %690 = vector.broadcast %46 : vector<1x32xf32> to vector<16x32xf32>
    %691 = arith.addf %689, %690 : vector<16x32xf32>
    %cst_171 = arith.constant 0.000000e+00 : f32
    %cst_172 = arith.constant 6.000000e+00 : f32
    %692 = vector.broadcast %cst_171 : f32 to vector<16x32xf32>
    %693 = arith.maximumf %692, %691 : vector<16x32xf32>
    %694 = vector.broadcast %cst_172 : f32 to vector<16x32xf32>
    %695 = arith.minimumf %694, %693 : vector<16x32xf32>
    %c192 = arith.constant 192 : index
    %c0_173 = arith.constant 0 : index
    %696 = vector.load %arg11[%c192, %c0_173] : memref<256x32xf32, #tpu.memory_space<vmem>>, vector<16x32xf32>
    tpu.vector_store %arg11[%c192, %c0_173], %695 {strides = array<i32>} : memref<256x32xf32, #tpu.memory_space<vmem>>, vector<16x32xf32>,
    %cst_174 = arith.constant 0.000000e+00 : f32
    %697 = vector.broadcast %cst_174 : f32 to vector<16x32xf32>
    %c13_175 = arith.constant 13 : index
    %c0_176 = arith.constant 0 : index
    %c0_177 = arith.constant 0 : index
    %698 = vector.load %arg10[%c13_175, %c0_176, %c0_177] : memref<18x24x32xf32, #tpu.memory_space<vmem>>, vector<1x24x32xf32>
    %699 = vector.shape_cast %698 : vector<1x24x32xf32> to vector<24x32xf32>
    %700 = vector.extract_strided_slice %699 {offsets = [0, 0], sizes = [16, 32], strides = [1, 1]} : vector<24x32xf32> to vector<16x32xf32>
    %701 = vector.broadcast %37 : vector<1x32xf32> to vector<16x32xf32>
    %702 = arith.mulf %700, %701 : vector<16x32xf32>
    %703 = arith.addf %697, %702 : vector<16x32xf32>
    %704 = vector.extract_strided_slice %699 {offsets = [1, 0], sizes = [16, 32], strides = [1, 1]} : vector<24x32xf32> to vector<16x32xf32>
    %705 = vector.broadcast %38 : vector<1x32xf32> to vector<16x32xf32>
    %706 = arith.mulf %704, %705 : vector<16x32xf32>
    %707 = arith.addf %703, %706 : vector<16x32xf32>
    %708 = vector.extract_strided_slice %699 {offsets = [2, 0], sizes = [16, 32], strides = [1, 1]} : vector<24x32xf32> to vector<16x32xf32>
    %709 = vector.broadcast %39 : vector<1x32xf32> to vector<16x32xf32>
    %710 = arith.mulf %708, %709 : vector<16x32xf32>
    %711 = arith.addf %707, %710 : vector<16x32xf32>
    %c14_178 = arith.constant 14 : index
    %c0_179 = arith.constant 0 : index
    %c0_180 = arith.constant 0 : index
    %712 = vector.load %arg10[%c14_178, %c0_179, %c0_180] : memref<18x24x32xf32, #tpu.memory_space<vmem>>, vector<1x24x32xf32>
    %713 = vector.shape_cast %712 : vector<1x24x32xf32> to vector<24x32xf32>
    %714 = vector.extract_strided_slice %713 {offsets = [0, 0], sizes = [16, 32], strides = [1, 1]} : vector<24x32xf32> to vector<16x32xf32>
    %715 = vector.broadcast %40 : vector<1x32xf32> to vector<16x32xf32>
    %716 = arith.mulf %714, %715 : vector<16x32xf32>
    %717 = arith.addf %711, %716 : vector<16x32xf32>
    %718 = vector.extract_strided_slice %713 {offsets = [1, 0], sizes = [16, 32], strides = [1, 1]} : vector<24x32xf32> to vector<16x32xf32>
    %719 = vector.broadcast %41 : vector<1x32xf32> to vector<16x32xf32>
    %720 = arith.mulf %718, %719 : vector<16x32xf32>
    %721 = arith.addf %717, %720 : vector<16x32xf32>
    %722 = vector.extract_strided_slice %713 {offsets = [2, 0], sizes = [16, 32], strides = [1, 1]} : vector<24x32xf32> to vector<16x32xf32>
    %723 = vector.broadcast %42 : vector<1x32xf32> to vector<16x32xf32>
    %724 = arith.mulf %722, %723 : vector<16x32xf32>
    %725 = arith.addf %721, %724 : vector<16x32xf32>
    %c15 = arith.constant 15 : index
    %c0_181 = arith.constant 0 : index
    %c0_182 = arith.constant 0 : index
    %726 = vector.load %arg10[%c15, %c0_181, %c0_182] : memref<18x24x32xf32, #tpu.memory_space<vmem>>, vector<1x24x32xf32>
    %727 = vector.shape_cast %726 : vector<1x24x32xf32> to vector<24x32xf32>
    %728 = vector.extract_strided_slice %727 {offsets = [0, 0], sizes = [16, 32], strides = [1, 1]} : vector<24x32xf32> to vector<16x32xf32>
    %729 = vector.broadcast %43 : vector<1x32xf32> to vector<16x32xf32>
    %730 = arith.mulf %728, %729 : vector<16x32xf32>
    %731 = arith.addf %725, %730 : vector<16x32xf32>
    %732 = vector.extract_strided_slice %727 {offsets = [1, 0], sizes = [16, 32], strides = [1, 1]} : vector<24x32xf32> to vector<16x32xf32>
    %733 = vector.broadcast %44 : vector<1x32xf32> to vector<16x32xf32>
    %734 = arith.mulf %732, %733 : vector<16x32xf32>
    %735 = arith.addf %731, %734 : vector<16x32xf32>
    %736 = vector.extract_strided_slice %727 {offsets = [2, 0], sizes = [16, 32], strides = [1, 1]} : vector<24x32xf32> to vector<16x32xf32>
    %737 = vector.broadcast %45 : vector<1x32xf32> to vector<16x32xf32>
    %738 = arith.mulf %736, %737 : vector<16x32xf32>
    %739 = arith.addf %735, %738 : vector<16x32xf32>
    %740 = vector.broadcast %46 : vector<1x32xf32> to vector<16x32xf32>
    %741 = arith.addf %739, %740 : vector<16x32xf32>
    %cst_183 = arith.constant 0.000000e+00 : f32
    %cst_184 = arith.constant 6.000000e+00 : f32
    %742 = vector.broadcast %cst_183 : f32 to vector<16x32xf32>
    %743 = arith.maximumf %742, %741 : vector<16x32xf32>
    %744 = vector.broadcast %cst_184 : f32 to vector<16x32xf32>
    %745 = arith.minimumf %744, %743 : vector<16x32xf32>
    %c208 = arith.constant 208 : index
    %c0_185 = arith.constant 0 : index
    %746 = vector.load %arg11[%c208, %c0_185] : memref<256x32xf32, #tpu.memory_space<vmem>>, vector<16x32xf32>
    tpu.vector_store %arg11[%c208, %c0_185], %745 {strides = array<i32>} : memref<256x32xf32, #tpu.memory_space<vmem>>, vector<16x32xf32>,
    %cst_186 = arith.constant 0.000000e+00 : f32
    %747 = vector.broadcast %cst_186 : f32 to vector<16x32xf32>
    %c14_187 = arith.constant 14 : index
    %c0_188 = arith.constant 0 : index
    %c0_189 = arith.constant 0 : index
    %748 = vector.load %arg10[%c14_187, %c0_188, %c0_189] : memref<18x24x32xf32, #tpu.memory_space<vmem>>, vector<1x24x32xf32>
    %749 = vector.shape_cast %748 : vector<1x24x32xf32> to vector<24x32xf32>
    %750 = vector.extract_strided_slice %749 {offsets = [0, 0], sizes = [16, 32], strides = [1, 1]} : vector<24x32xf32> to vector<16x32xf32>
    %751 = vector.broadcast %37 : vector<1x32xf32> to vector<16x32xf32>
    %752 = arith.mulf %750, %751 : vector<16x32xf32>
    %753 = arith.addf %747, %752 : vector<16x32xf32>
    %754 = vector.extract_strided_slice %749 {offsets = [1, 0], sizes = [16, 32], strides = [1, 1]} : vector<24x32xf32> to vector<16x32xf32>
    %755 = vector.broadcast %38 : vector<1x32xf32> to vector<16x32xf32>
    %756 = arith.mulf %754, %755 : vector<16x32xf32>
    %757 = arith.addf %753, %756 : vector<16x32xf32>
    %758 = vector.extract_strided_slice %749 {offsets = [2, 0], sizes = [16, 32], strides = [1, 1]} : vector<24x32xf32> to vector<16x32xf32>
    %759 = vector.broadcast %39 : vector<1x32xf32> to vector<16x32xf32>
    %760 = arith.mulf %758, %759 : vector<16x32xf32>
    %761 = arith.addf %757, %760 : vector<16x32xf32>
    %c15_190 = arith.constant 15 : index
    %c0_191 = arith.constant 0 : index
    %c0_192 = arith.constant 0 : index
    %762 = vector.load %arg10[%c15_190, %c0_191, %c0_192] : memref<18x24x32xf32, #tpu.memory_space<vmem>>, vector<1x24x32xf32>
    %763 = vector.shape_cast %762 : vector<1x24x32xf32> to vector<24x32xf32>
    %764 = vector.extract_strided_slice %763 {offsets = [0, 0], sizes = [16, 32], strides = [1, 1]} : vector<24x32xf32> to vector<16x32xf32>
    %765 = vector.broadcast %40 : vector<1x32xf32> to vector<16x32xf32>
    %766 = arith.mulf %764, %765 : vector<16x32xf32>
    %767 = arith.addf %761, %766 : vector<16x32xf32>
    %768 = vector.extract_strided_slice %763 {offsets = [1, 0], sizes = [16, 32], strides = [1, 1]} : vector<24x32xf32> to vector<16x32xf32>
    %769 = vector.broadcast %41 : vector<1x32xf32> to vector<16x32xf32>
    %770 = arith.mulf %768, %769 : vector<16x32xf32>
    %771 = arith.addf %767, %770 : vector<16x32xf32>
    %772 = vector.extract_strided_slice %763 {offsets = [2, 0], sizes = [16, 32], strides = [1, 1]} : vector<24x32xf32> to vector<16x32xf32>
    %773 = vector.broadcast %42 : vector<1x32xf32> to vector<16x32xf32>
    %774 = arith.mulf %772, %773 : vector<16x32xf32>
    %775 = arith.addf %771, %774 : vector<16x32xf32>
    %c16_193 = arith.constant 16 : index
    %c0_194 = arith.constant 0 : index
    %c0_195 = arith.constant 0 : index
    %776 = vector.load %arg10[%c16_193, %c0_194, %c0_195] : memref<18x24x32xf32, #tpu.memory_space<vmem>>, vector<1x24x32xf32>
    %777 = vector.shape_cast %776 : vector<1x24x32xf32> to vector<24x32xf32>
    %778 = vector.extract_strided_slice %777 {offsets = [0, 0], sizes = [16, 32], strides = [1, 1]} : vector<24x32xf32> to vector<16x32xf32>
    %779 = vector.broadcast %43 : vector<1x32xf32> to vector<16x32xf32>
    %780 = arith.mulf %778, %779 : vector<16x32xf32>
    %781 = arith.addf %775, %780 : vector<16x32xf32>
    %782 = vector.extract_strided_slice %777 {offsets = [1, 0], sizes = [16, 32], strides = [1, 1]} : vector<24x32xf32> to vector<16x32xf32>
    %783 = vector.broadcast %44 : vector<1x32xf32> to vector<16x32xf32>
    %784 = arith.mulf %782, %783 : vector<16x32xf32>
    %785 = arith.addf %781, %784 : vector<16x32xf32>
    %786 = vector.extract_strided_slice %777 {offsets = [2, 0], sizes = [16, 32], strides = [1, 1]} : vector<24x32xf32> to vector<16x32xf32>
    %787 = vector.broadcast %45 : vector<1x32xf32> to vector<16x32xf32>
    %788 = arith.mulf %786, %787 : vector<16x32xf32>
    %789 = arith.addf %785, %788 : vector<16x32xf32>
    %790 = vector.broadcast %46 : vector<1x32xf32> to vector<16x32xf32>
    %791 = arith.addf %789, %790 : vector<16x32xf32>
    %cst_196 = arith.constant 0.000000e+00 : f32
    %cst_197 = arith.constant 6.000000e+00 : f32
    %792 = vector.broadcast %cst_196 : f32 to vector<16x32xf32>
    %793 = arith.maximumf %792, %791 : vector<16x32xf32>
    %794 = vector.broadcast %cst_197 : f32 to vector<16x32xf32>
    %795 = arith.minimumf %794, %793 : vector<16x32xf32>
    %c224 = arith.constant 224 : index
    %c0_198 = arith.constant 0 : index
    %796 = vector.load %arg11[%c224, %c0_198] : memref<256x32xf32, #tpu.memory_space<vmem>>, vector<16x32xf32>
    tpu.vector_store %arg11[%c224, %c0_198], %795 {strides = array<i32>} : memref<256x32xf32, #tpu.memory_space<vmem>>, vector<16x32xf32>,
    %cst_199 = arith.constant 0.000000e+00 : f32
    %797 = vector.broadcast %cst_199 : f32 to vector<16x32xf32>
    %c15_200 = arith.constant 15 : index
    %c0_201 = arith.constant 0 : index
    %c0_202 = arith.constant 0 : index
    %798 = vector.load %arg10[%c15_200, %c0_201, %c0_202] : memref<18x24x32xf32, #tpu.memory_space<vmem>>, vector<1x24x32xf32>
    %799 = vector.shape_cast %798 : vector<1x24x32xf32> to vector<24x32xf32>
    %800 = vector.extract_strided_slice %799 {offsets = [0, 0], sizes = [16, 32], strides = [1, 1]} : vector<24x32xf32> to vector<16x32xf32>
    %801 = vector.broadcast %37 : vector<1x32xf32> to vector<16x32xf32>
    %802 = arith.mulf %800, %801 : vector<16x32xf32>
    %803 = arith.addf %797, %802 : vector<16x32xf32>
    %804 = vector.extract_strided_slice %799 {offsets = [1, 0], sizes = [16, 32], strides = [1, 1]} : vector<24x32xf32> to vector<16x32xf32>
    %805 = vector.broadcast %38 : vector<1x32xf32> to vector<16x32xf32>
    %806 = arith.mulf %804, %805 : vector<16x32xf32>
    %807 = arith.addf %803, %806 : vector<16x32xf32>
    %808 = vector.extract_strided_slice %799 {offsets = [2, 0], sizes = [16, 32], strides = [1, 1]} : vector<24x32xf32> to vector<16x32xf32>
    %809 = vector.broadcast %39 : vector<1x32xf32> to vector<16x32xf32>
    %810 = arith.mulf %808, %809 : vector<16x32xf32>
    %811 = arith.addf %807, %810 : vector<16x32xf32>
    %c16_203 = arith.constant 16 : index
    %c0_204 = arith.constant 0 : index
    %c0_205 = arith.constant 0 : index
    %812 = vector.load %arg10[%c16_203, %c0_204, %c0_205] : memref<18x24x32xf32, #tpu.memory_space<vmem>>, vector<1x24x32xf32>
    %813 = vector.shape_cast %812 : vector<1x24x32xf32> to vector<24x32xf32>
    %814 = vector.extract_strided_slice %813 {offsets = [0, 0], sizes = [16, 32], strides = [1, 1]} : vector<24x32xf32> to vector<16x32xf32>
    %815 = vector.broadcast %40 : vector<1x32xf32> to vector<16x32xf32>
    %816 = arith.mulf %814, %815 : vector<16x32xf32>
    %817 = arith.addf %811, %816 : vector<16x32xf32>
    %818 = vector.extract_strided_slice %813 {offsets = [1, 0], sizes = [16, 32], strides = [1, 1]} : vector<24x32xf32> to vector<16x32xf32>
    %819 = vector.broadcast %41 : vector<1x32xf32> to vector<16x32xf32>
    %820 = arith.mulf %818, %819 : vector<16x32xf32>
    %821 = arith.addf %817, %820 : vector<16x32xf32>
    %822 = vector.extract_strided_slice %813 {offsets = [2, 0], sizes = [16, 32], strides = [1, 1]} : vector<24x32xf32> to vector<16x32xf32>
    %823 = vector.broadcast %42 : vector<1x32xf32> to vector<16x32xf32>
    %824 = arith.mulf %822, %823 : vector<16x32xf32>
    %825 = arith.addf %821, %824 : vector<16x32xf32>
    %c17 = arith.constant 17 : index
    %c0_206 = arith.constant 0 : index
    %c0_207 = arith.constant 0 : index
    %826 = vector.load %arg10[%c17, %c0_206, %c0_207] : memref<18x24x32xf32, #tpu.memory_space<vmem>>, vector<1x24x32xf32>
    %827 = vector.shape_cast %826 : vector<1x24x32xf32> to vector<24x32xf32>
    %828 = vector.extract_strided_slice %827 {offsets = [0, 0], sizes = [16, 32], strides = [1, 1]} : vector<24x32xf32> to vector<16x32xf32>
    %829 = vector.broadcast %43 : vector<1x32xf32> to vector<16x32xf32>
    %830 = arith.mulf %828, %829 : vector<16x32xf32>
    %831 = arith.addf %825, %830 : vector<16x32xf32>
    %832 = vector.extract_strided_slice %827 {offsets = [1, 0], sizes = [16, 32], strides = [1, 1]} : vector<24x32xf32> to vector<16x32xf32>
    %833 = vector.broadcast %44 : vector<1x32xf32> to vector<16x32xf32>
    %834 = arith.mulf %832, %833 : vector<16x32xf32>
    %835 = arith.addf %831, %834 : vector<16x32xf32>
    %836 = vector.extract_strided_slice %827 {offsets = [2, 0], sizes = [16, 32], strides = [1, 1]} : vector<24x32xf32> to vector<16x32xf32>
    %837 = vector.broadcast %45 : vector<1x32xf32> to vector<16x32xf32>
    %838 = arith.mulf %836, %837 : vector<16x32xf32>
    %839 = arith.addf %835, %838 : vector<16x32xf32>
    %840 = vector.broadcast %46 : vector<1x32xf32> to vector<16x32xf32>
    %841 = arith.addf %839, %840 : vector<16x32xf32>
    %cst_208 = arith.constant 0.000000e+00 : f32
    %cst_209 = arith.constant 6.000000e+00 : f32
    %842 = vector.broadcast %cst_208 : f32 to vector<16x32xf32>
    %843 = arith.maximumf %842, %841 : vector<16x32xf32>
    %844 = vector.broadcast %cst_209 : f32 to vector<16x32xf32>
    %845 = arith.minimumf %844, %843 : vector<16x32xf32>
    %c240 = arith.constant 240 : index
    %c0_210 = arith.constant 0 : index
    %846 = vector.load %arg11[%c240, %c0_210] : memref<256x32xf32, #tpu.memory_space<vmem>>, vector<16x32xf32>
    tpu.vector_store %arg11[%c240, %c0_210], %845 {strides = array<i32>} : memref<256x32xf32, #tpu.memory_space<vmem>>, vector<16x32xf32>,
    %c0_211 = arith.constant 0 : index
    %c0_212 = arith.constant 0 : index
    %847 = vector.load %arg11[%c0_211, %c0_212] : memref<256x32xf32, #tpu.memory_space<vmem>>, vector<256x32xf32>
    %c0_213 = arith.constant 0 : index
    %c0_214 = arith.constant 0 : index
    %848 = vector.load %arg7[%c0_213, %c0_214] : memref<32x8xf32, #tpu.memory_space<vmem>>, vector<32x8xf32>
    %cst_215 = arith.constant dense<0.000000e+00> : vector<256x8xf32>
    %849 = tpu.matmul %847, %848, %cst_215 {dimension_numbers = #tpu.dot_dimension_numbers<[1], [0], [0], [1], [0, 0, 1, 1], [], []>} : vector<256x32xf32>, vector<32x8xf32>, vector<256x8xf32> -> vector<256x8xf32>
    %c0_216 = arith.constant 0 : index
    %c0_217 = arith.constant 0 : index
    %850 = vector.load %arg8[%c0_216, %c0_217] : memref<1x8xf32, #tpu.memory_space<vmem>>, vector<1x8xf32>
    %851 = vector.broadcast %850 : vector<1x8xf32> to vector<256x8xf32>
    %852 = arith.addf %849, %851 : vector<256x8xf32>
    %c1_i32_218 = arith.constant 1 : i32
    %853 = arith.addi %0, %c1_i32_218 : i32
    %c0_219 = arith.constant 0 : index
    %854 = arith.index_cast %853 : i32 to index
    %c1_220 = arith.constant 1 : index
    %c0_221 = arith.constant 0 : index
    %855 = vector.load %arg2[%c0_219, %854, %c1_220, %c0_221] : memref<1x18x24x8xf32, #tpu.memory_space<vmem>>, vector<1x16x16x8xf32>
    %856 = vector.shape_cast %855 : vector<1x16x16x8xf32> to vector<16x16x8xf32>
    %857 = vector.shape_cast %856 : vector<16x16x8xf32> to vector<256x8xf32>
    %858 = arith.addf %852, %857 : vector<256x8xf32>
    %859 = vector.shape_cast %858 : vector<256x8xf32> to vector<16x16x8xf32>
    %c0_222 = arith.constant 0 : index
    %c0_223 = arith.constant 0 : index
    %c0_224 = arith.constant 0 : index
    %c0_225 = arith.constant 0 : index
    %860 = vector.load %arg9[%c0_222, %c0_223, %c0_224, %c0_225] : memref<1x16x16x8xf32, #tpu.memory_space<vmem>>, vector<1x16x16x8xf32>
    %861 = vector.shape_cast %860 : vector<1x16x16x8xf32> to vector<16x16x8xf32>
    %862 = vector.shape_cast %859 : vector<16x16x8xf32> to vector<1x16x16x8xf32>
    tpu.vector_store %arg9[%c0_222, %c0_223, %c0_224, %c0_225], %862 {strides = array<i32>} : memref<1x16x16x8xf32, #tpu.memory_space<vmem>>, vector<1x16x16x8xf32>,
    return
  }
  func.func @transform_0(%arg0: i32, %arg1: i32) -> (i32, i32, i32, i32) {
    %c0_i32 = arith.constant 0 : i32
    %c0_i32_0 = arith.constant 0 : i32
    %c0_i32_1 = arith.constant 0 : i32
    %c0_i32_2 = arith.constant 0 : i32
    return %arg0, %c0_i32, %c0_i32_0, %c0_i32_1 : i32, i32, i32, i32
  }
  func.func @transform_1(%arg0: i32, %arg1: i32) -> (i32, i32) {
    %c0_i32 = arith.constant 0 : i32
    %c0_i32_0 = arith.constant 0 : i32
    %c0_i32_1 = arith.constant 0 : i32
    return %c0_i32, %c0_i32_0 : i32, i32
  }
  func.func @transform_2(%arg0: i32, %arg1: i32) -> (i32, i32) {
    %c0_i32 = arith.constant 0 : i32
    %c0_i32_0 = arith.constant 0 : i32
    %c0_i32_1 = arith.constant 0 : i32
    return %c0_i32, %c0_i32_0 : i32, i32
  }
  func.func @transform_3(%arg0: i32, %arg1: i32) -> (i32, i32) {
    %c0_i32 = arith.constant 0 : i32
    %c0_i32_0 = arith.constant 0 : i32
    %c0_i32_1 = arith.constant 0 : i32
    return %c0_i32, %c0_i32_0 : i32, i32
  }
  func.func @transform_4(%arg0: i32, %arg1: i32) -> (i32, i32) {
    %c0_i32 = arith.constant 0 : i32
    %c0_i32_0 = arith.constant 0 : i32
    %c0_i32_1 = arith.constant 0 : i32
    return %c0_i32, %c0_i32_0 : i32, i32
  }
  func.func @transform_5(%arg0: i32, %arg1: i32) -> (i32, i32) {
    %c0_i32 = arith.constant 0 : i32
    %c0_i32_0 = arith.constant 0 : i32
    %c0_i32_1 = arith.constant 0 : i32
    return %c0_i32, %c0_i32_0 : i32, i32
  }
  func.func @transform_6(%arg0: i32, %arg1: i32) -> (i32, i32) {
    %c0_i32 = arith.constant 0 : i32
    %c0_i32_0 = arith.constant 0 : i32
    %c0_i32_1 = arith.constant 0 : i32
    return %c0_i32, %c0_i32_0 : i32, i32
  }
  func.func @transform_7(%arg0: i32, %arg1: i32) -> (i32, i32, i32, i32) {
    %c0_i32 = arith.constant 0 : i32
    %c0_i32_0 = arith.constant 0 : i32
    %c0_i32_1 = arith.constant 0 : i32
    return %arg0, %arg1, %c0_i32, %c0_i32_0 : i32, i32, i32, i32
  }
}

</mosaic_0001>

<bundles_post_ra>
// kernel: tpu_custom_call.1
= control target key start
LH: loop header
LB: loop body
LE: loop exit
PB: predicated region body
PF: predicated region fallthrough
CT: control target
= control target key end

     0   :  { %s4060_s24 = smov 0   ;;  %s4062_s25 = smov 0   ;;  %s7144_s0 = inlined_call_operand.vmem [shape: f32[2,18,24,8], index: 0, kind: input, shape index: {}]   ;;  %s7145_s1 = inlined_call_operand.vmem [shape: f32[8,32], index: 1, kind: input, shape index: {}]   ;;  %s7146_s2 = inlined_call_operand.vmem [shape: f32[1,32], index: 2, kind: input, shape index: {}]   ;;  %s7147_s3 = inlined_call_operand.vmem [shape: f32[9,32], index: 3, kind: input, shape index: {}]   ;;  %s7148_s4 = inlined_call_operand.vmem [shape: f32[1,32], index: 4, kind: input, shape index: {}]   ;;  %s7149_s5 = inlined_call_operand.vmem [shape: f32[32,8], index: 5, kind: input, shape index: {}]   ;;  %s7150_s6 = inlined_call_operand.vmem [shape: f32[1,8], index: 6, kind: input, shape index: {}]   ;;  %s7151_s7 = inlined_call_operand.vmem [shape: f32[2,16,16,8], index: 7, kind: output, shape index: {}]  }
   0x1   :  { %s4064_s26 = smov 0  }
   0x2 LB: > { %s29_s27 = sadd.s32 1, %s4013_s25  ;;  %p3683_p0 = scmp.ge.s32.totalorder %s4017_s26, 1  ;;  %s4017_s26 = sphi %s4064_s26, %s17_s26   ;;  %s4013_s25 = sphi %s4062_s25, %s7853_s25   ;;  %s4009_s24 = sphi %s4060_s24, %s7852_s24  }
   0x3   : > { %p31_p1 = scmp.ge.s32.totalorder %s29_s27, 2  ;;  %p251_p2 = scmp.lt.s32.totalorder %s4017_s26, 3 }
   0x5   : > { %s7855_s27 = smov (%p31_p1, %s29_s27), 0  ;;  %p252_p3 = pnand %p3683_p0, %p251_p2 }
   0x7   : > { %255 = sbr.rel (%p252_p3) target bundleno = 751 (0x2ef), region = 48 }
   0xc   : > { %v305_v0 = vlaneseq  ;;  %v736_v1 = vld [vmem:[%s7145_s1] sm:$0xff]  ;;  %p288_p4 = scmp.lt.s32.totalorder %s4009_s24, 1  ;;  %vm741_vm2 = vcmask 64512   ;;  %v4019_v8 = vmov 0.0   ;;  %vm1245_vm7 = vcmask 261120  }
   0xd   : > { %919 = vmatpush.msra.mxu0 %v736_v1  ;;  %3811 = vmatpush.msra.mxu2 %v736_v1  ;;  %vm1318_vm8 = vcmask 1046528   ;;  %vm1335_vm9 = vcmask 1045504  }
   0xe   : > { %v4081_v2 = vshrl.u32 %v305_v0, 7  ;;  %s7857_s24 = smov (!%p288_p4, %s4009_s24), 1  ;;  %v4085_v3 = vand.u32 127, %v305_v0  ;;  %3812 = vmatpush.msra.mxu3 %v736_v1 }
   0xf   : > { %s3817_s30 = smul.u32 432, %s7857_s24  ;;  %s3810_s21 = sshll.u32 %s7857_s24, 8 }
  0x10   : > { %3843 = vset.pattern.permute.xlu0 %v4081_v2  ;;  %v4089_v4 = vadd.s32 8, %v4081_v2  ;;  %v4092_v5 = vadd.s32 16, %v4081_v2  ;;  %vm315_vm0 = vcmp.ge.s32.totalorder %v4081_v2, 1  ;;  %vm324_vm1 = vcmp.ge.s32.totalorder %v4085_v3, 1  ;;  %s6746_s23 = scalar_lea.vmem %s7151_s7, %s3810_s21 }
  0x11   : > { %vm325_vm3 = vmand %vm315_vm0, %vm324_vm1  ;;  %vm328_vm4 = vcmp.le.s32.totalorder %v4085_v3, 16  ;;  %s4105_s10 = scalar_lea.vmem %s7144_s0, %s3817_s30 }
  0x12   : > { %3867 = vset.pattern.permute.xlu2 %v4089_v4  ;;  %3855 = vset.pattern.permute.xlu1 %v4092_v5  ;;  %vm329_vm5 = vmand %vm325_vm3, %vm328_vm4  ;;  %v682_v6 = vld [vmem:[%s4105_s10] sm:$0xff]  ;;  %v704_v7 = vld [vmem:[%s4105_s10 + $0xb0] sm:$0xff]  ;;  %vm320_vm10 = vcmp.le.s32.totalorder %v4092_v5, 16 }
  0x13   : > { %v4112_v9 = vsel %vm329_vm5, 1.0, %v4019_v8  ;;  %3690 = vmatmul.msk.f32.vlgmr.msra.gmra.mxu0 %vm741_vm2, %v682_v6  ;;  %3712 = vmatmul.msk.f32.vlgmr.msra.gmra.mxu2 %vm741_vm2, %v704_v7  ;;  %v683_v16 = vld [vmem:[%s4105_s10 + $0x8] sm:$0xff]  ;;  %v705_v17 = vld [vmem:[%s4105_s10 + $0xb8] sm:$0xff]  ;;  %v684_v18 = vld [vmem:[%s4105_s10 + $0x10] sm:$0xff] }
  0x14   : > { %v338_v10 = vperm.slane %v4112_v9, 0  ;;  %v357_v11 = vperm.slane %v4112_v9, 1  ;;  %v376_v12 = vperm.slane %v4112_v9, 2  ;;  %v395_v13 = vperm.slane %v4112_v9, 3  ;;  %v706_v19 = vld [vmem:[%s4105_s10 + $0xc0] sm:$0xff]  ;;  %v685_v20 = vld [vmem:[%s4105_s10 + $0x18] sm:$0xff]  ;;  %vm330_vm6 = vmand %vm324_vm1, %vm328_vm4 }
  0x15   : > { %v707_v21 = vld [vmem:[%s4105_s10 + $0xc8] sm:$0xff]  ;;  %v414_v22 = vperm.slane %v4112_v9, 4  ;;  %v433_v23 = vperm.slane %v4112_v9, 5  ;;  %v686_v25 = vld [vmem:[%s4105_s10 + $0x20] sm:$0xff]  ;;  %v708_v26 = vld [vmem:[%s4105_s10 + $0xd0] sm:$0xff]  ;;  %v4148_v27 = vsel %vm330_vm6, 1.0, %v4019_v8 }
  0x16   : > { %v3844_v14 = vpack.i.bf16 %v357_v11, %v338_v10  ;;  %v3868_v15 = vpack.i.bf16 %v395_v13, %v376_v12  ;;  %v452_v28 = vperm.slane %v4112_v9, 6  ;;  %v566_v29 = vperm.slane %v4148_v27, 4  ;;  %v687_v30 = vld [vmem:[%s4105_s10 + $0x28] sm:$0xff]  ;;  %v709_v31 = vld [vmem:[%s4105_s10 + $0xd8] sm:$0xff]  ;;  %v688_v35 = vld [vmem:[%s4105_s10 + $0x30] sm:$0xff] }
  0x17   : > { %v3879_v24 = vpack.i.bf16 %v433_v23, %v414_v22  ;;  %v4156_v32 = vperm.slane %v4148_v27, 2  ;;  %v710_v36 = vld [vmem:[%s4105_s10 + $0xe0] sm:$0xff]  ;;  %v547_v37 = vperm.slane %v4148_v27, 3  ;;  %v490_v39 = vperm.slane %v4148_v27, 0  ;;  %v689_v41 = vld [vmem:[%s4105_s10 + $0x38] sm:$0xff]  ;;  %v711_v42 = vld [vmem:[%s4105_s10 + $0xe8] sm:$0xff] }
  0x18   : > { %3845 = vperm.xlu0 %3843, %v3844_v14   ;;  %v3920_v33 = vpack.i.bf16 %v566_v29, %v452_v28  ;;  %v585_v40 = vperm.slane %v4148_v27, 5  ;;  %v690_v45 = vld [vmem:[%s4105_s10 + $0x40] sm:$0xff]  ;;  %v712_v46 = vld [vmem:[%s4105_s10 + $0xf0] sm:$0xff]  ;;  %v471_v47 = vperm.slane %v4112_v9, 7  ;;  %v509_v50 = vperm.slane %v4148_v27, 1  ;;  %v691_v52 = vld [vmem:[%s4105_s10 + $0x48] sm:$0xff] }
  0x19   : > { %v3897_v34 = vpack.i.bf16 %v452_v28, %v4156_v32  ;;  %v3903_v38 = vpack.i.bf16 %v547_v37, %v4156_v32  ;;  %v3909_v44 = vpack.i.bf16 %v547_v37, %v452_v28  ;;  %v3915_v48 = vpack.i.bf16 %v566_v29, %v547_v37  ;;  %v713_v53 = vld [vmem:[%s4105_s10 + $0xf8] sm:$0xff]  ;;  %v692_v56 = vld [vmem:[%s4105_s10 + $0x50] sm:$0xff]  ;;  %v714_v57 = vld [vmem:[%s4105_s10 + $0x100] sm:$0xff] }
  0x1a   : > { %3869 = vperm.xlu2 %3867, %v3868_v15   ;;  %3857 = vperm.xlu1 %3855, %v3844_v14   ;;  %v3936_v43 = vpack.i.bf16 %v490_v39, %v585_v40  ;;  %v3925_v49 = vpack.i.bf16 %v471_v47, %v566_v29  ;;  %v623_v51 = vperm.slane %v4148_v27, 7  ;;  %v3930_v55 = vpack.i.bf16 %v585_v40, %v471_v47  ;;  %v726_v59 = vld [vmem:[%s4105_s10 + $0x160] sm:$0xff]  ;;  %v693_v61 = vld [vmem:[%s4105_s10 + $0x58] sm:$0xff]  ;;  %v715_v62 = vld [vmem:[%s4105_s10 + $0x108] sm:$0xff] }
  0x1b   : > { %3691 = vmatmul.msk.f32.gmra.mxu0 %vm741_vm2, %v683_v16  ;;  %3713 = vmatmul.msk.f32.gmra.mxu2 %vm741_vm2, %v705_v17  ;;  %v604_v58 = vperm.slane %v4148_v27, 6  ;;  %v727_v63 = vld [vmem:[%s4105_s10 + $0x168] sm:$0xff]  ;;  %v694_v0 = vld [vmem:[%s4105_s10 + $0x60] sm:$0xff]  ;;  %v716_v1 = vld [vmem:[%s4105_s10 + $0x110] sm:$0xff] }
  0x1c   : > { %v3965_v54 = vpack.i.bf16 %v623_v51, %v509_v50  ;;  %3734 = vmatmul.msk.f32.vlgmr.msra.gmra.mxu3 %vm741_vm2, %v726_v59  ;;  %v728_v6 = vld [vmem:[%s4105_s10 + $0x170] sm:$0xff]  ;;  %v695_v9 = vld [vmem:[%s4105_s10 + $0x68] sm:$0xff]  ;;  %v717_v10 = vld [vmem:[%s4105_s10 + $0x118] sm:$0xff] }
  0x1d   : > { %v3947_v60 = vpack.i.bf16 %v604_v58, %v490_v39  ;;  %v3953_v7 = vpack.i.bf16 %v509_v50, %v604_v58  ;;  %v729_v11 = vld [vmem:[%s4105_s10 + $0x178] sm:$0xff]  ;;  %v696_v12 = vld [vmem:[%s4105_s10 + $0x70] sm:$0xff]  ;;  %v718_v13 = vld [vmem:[%s4105_s10 + $0x120] sm:$0xff] }
  0x1e   : > { %v719_v16 = vld [vmem:[%s4105_s10 + $0x128] sm:$0xff]  ;;  %v698_v22 = vld [vmem:[%s4105_s10 + $0x80] sm:$0xff]  ;;  %vm327_vm11 = vmand %vm320_vm10, %vm324_vm1 }
  0x1f   : > { %vm331_vm12 = vmand %vm327_vm11, %vm328_vm4 }
  0x20   : > { %3849 = vset.pattern.permute.xlu0 %v4089_v4 }
  0x22   : > { %3873 = vset.pattern.permute.xlu2 %v4092_v5  ;;  %3861 = vset.pattern.permute.xlu1 %v4081_v2 }
  0x23   : > { %3692 = vmatmul.msk.f32.gmra.mxu0 %vm741_vm2, %v684_v18  ;;  %3714 = vmatmul.msk.f32.gmra.mxu2 %vm741_vm2, %v706_v19  ;;  %v731_v18 = vld [vmem:[%s4105_s10 + $0x188] sm:$0xff]  ;;  %v4236_v19 = vld [vmem:[%s7146_s2] ss:$0 sm:$0xff] }
  0x24   : > { %3735 = vmatmul.msk.f32.gmra.mxu3 %vm741_vm2, %v727_v63 }
  0x28   : > { %3851 = vperm.xlu0 %3849, %v3844_v14   ;;  %v730_v14 = vld [vmem:[%s4105_s10 + $0x180] sm:$0xff] }
  0x2a   : > { %3875 = vperm.xlu2 %3873, %v3868_v15   ;;  %3863 = vperm.xlu1 %3861, %v3868_v15   ;;  %v697_v15 = vld [vmem:[%s4105_s10 + $0x78] sm:$0xff] }
  0x2b   : > { %3693 = vmatmul.msk.f32.gmra.mxu0 %vm741_vm2, %v685_v20  ;;  %3715 = vmatmul.msk.f32.gmra.mxu2 %vm741_vm2, %v707_v21 }
  0x2c   : > { %3736 = vmatmul.msk.f32.gmra.mxu3 %vm741_vm2, %v728_v6  ;;  %v724_v6 = vld [vmem:[%s4105_s10 + $0x150] sm:$0xff] }
  0x30   : > { %3890 = vset.pattern.permute.xlu0 %v4092_v5 }
  0x32   : > { %3884 = vset.pattern.permute.xlu2 %v4089_v4  ;;  %3880 = vperm.xlu1 %3861, %v3879_v24  }
  0x33   : > { %3694 = vmatmul.msk.f32.gmra.mxu0 %vm741_vm2, %v686_v25  ;;  %3716 = vmatmul.msk.f32.gmra.mxu2 %vm741_vm2, %v708_v26  ;;  %v732_v26 = vld [vmem:[%s4105_s10 + $0x190] sm:$0xff] }
  0x34   : > { %3737 = vmatmul.msk.f32.gmra.mxu3 %vm741_vm2, %v729_v11 }
  0x38   : > { %3892 = vperm.xlu0 %3890, %v3879_v24  }
  0x3a   : > { %3886 = vperm.xlu2 %3884, %v3879_v24   ;;  %3896 = vset.pattern.permute.xlu1 %v4089_v4 }
  0x3b   : > { %3695 = vmatmul.msk.f32.gmra.mxu0 %vm741_vm2, %v687_v30  ;;  %3717 = vmatmul.msk.f32.gmra.mxu2 %vm741_vm2, %v709_v31 }
  0x3c   : > { %3738 = vmatmul.msk.f32.gmra.mxu3 %vm741_vm2, %v730_v14 }
  0x40   : > { %3921 = vperm.xlu0 %3890, %v3920_v33   ;;  %v721_v33 = vld [vmem:[%s4105_s10 + $0x138] sm:$0xff] }
  0x42   : > { %3902 = vset.pattern.permute.xlu2 %v4092_v5  ;;  %3898 = vperm.xlu1 %3896, %v3897_v34  }
  0x43   : > { %3696 = vmatmul.msk.f32.gmra.mxu0 %vm741_vm2, %v688_v35  ;;  %3718 = vmatmul.msk.f32.gmra.mxu2 %vm741_vm2, %v710_v36 }
  0x44   : > { %3739 = vmatmul.msk.f32.gmra.mxu3 %vm741_vm2, %v731_v18  ;;  %v734_v18 = vld [vmem:[%s4105_s10 + $0x1a0] sm:$0xff] }
  0x48   : > { %3935 = vset.pattern.permute.xlu0 %v4081_v2 }
  0x4a   : > { %3904 = vperm.xlu2 %3902, %v3903_v38   ;;  %3908 = vset.pattern.permute.xlu1 %v4081_v2 }
  0x4b   : > { %3697 = vmatmul.msk.f32.gmra.mxu0 %vm741_vm2, %v689_v41  ;;  %3719 = vmatmul.msk.f32.gmra.mxu2 %vm741_vm2, %v711_v42 }
  0x4c   : > { %3740 = vmatmul.msk.f32.gmra.mxu3 %vm741_vm2, %v732_v26 }
  0x50   : > { %3937 = vperm.xlu0 %3935, %v3936_v43   ;;  %v700_v43 = vld [vmem:[%s4105_s10 + $0x90] sm:$0xff] }
  0x52   : > { %3914 = vset.pattern.permute.xlu2 %v4089_v4  ;;  %3910 = vperm.xlu1 %3908, %v3909_v44   ;;  %v722_v44 = vld [vmem:[%s4105_s10 + $0x140] sm:$0xff] }
  0x53   : > { %3698 = vmatmul.msk.f32.gmra.mxu0 %vm741_vm2, %v690_v45  ;;  %3720 = vmatmul.msk.f32.gmra.mxu2 %vm741_vm2, %v712_v46  ;;  %v733_v46 = vld [vmem:[%s4105_s10 + $0x198] sm:$0xff] }
  0x54   : > { %3741 = vmatmul.msk.f32.gmra.mxu3 %vm741_vm2, %v733_v46 }
  0x58   : > { %3964 = vset.pattern.permute.xlu0 %v4089_v4 }
  0x5a   : > { %3916 = vperm.xlu2 %3914, %v3915_v48   ;;  %3926 = vperm.xlu1 %3908, %v3925_v49  }
  0x5b   : > { %3699 = vmatmul.msk.f32.gmra.mxu0 %vm741_vm2, %v691_v52  ;;  %3721 = vmatmul.msk.f32.gmra.mxu2 %vm741_vm2, %v713_v53 }
  0x5c   : > { %3742 = vmatmul.msk.f32.gmra.mxu3 %vm741_vm2, %v734_v18 }
  0x60   : > { %3966 = vperm.xlu0 %3964, %v3965_v54  }
  0x62   : > { %3931 = vperm.xlu2 %3914, %v3930_v55   ;;  %3941 = vset.pattern.permute.xlu1 %v4092_v5 }
  0x63   : > { %3700 = vmatmul.msk.f32.gmra.mxu0 %vm741_vm2, %v692_v56  ;;  %3722 = vmatmul.msk.f32.gmra.mxu2 %vm741_vm2, %v714_v57 }
  0x68   : > { %3981 = vset.pattern.permute.xlu0 %v4092_v5 }
  0x6a   : > { %3948 = vperm.xlu2 %3914, %v3947_v60   ;;  %3943 = vperm.xlu1 %3941, %v3930_v55   ;;  %v723_v55 = vld [vmem:[%s4105_s10 + $0x148] sm:$0xff] }
  0x6b   : > { %3701 = vmatmul.msk.f32.gmra.mxu0 %vm741_vm2, %v693_v61  ;;  %3723 = vmatmul.msk.f32.gmra.mxu2 %vm741_vm2, %v715_v62 }
  0x72   : > { %3958 = vset.pattern.permute.xlu2 %v4092_v5  ;;  %3952 = vset.pattern.permute.xlu1 %v4081_v2  ;;  %v3970_v2 = vpack.i.bf16 %v4156_v32, %v623_v51  ;;  %v699_v32 = vld [vmem:[%s4105_s10 + $0x88] sm:$0xff] }
  0x73   : > { %3702 = vmatmul.msk.f32.gmra.mxu0 %vm741_vm2, %v694_v0  ;;  %3724 = vmatmul.msk.f32.gmra.mxu2 %vm741_vm2, %v716_v1  ;;  %v702_v1 = vld [vmem:[%s4105_s10 + $0xa0] sm:$0xff] }
  0x74   : > { %v4230_v17 = vpop.permute.xlu2 %3869 }
  0x7a   : > { %3960 = vperm.xlu2 %3958, %v3947_v60   ;;  %3954 = vperm.xlu1 %3952, %v3953_v7  }
  0x7b   : > { %3703 = vmatmul.msk.f32.gmra.mxu0 %vm741_vm2, %v695_v9  ;;  %3725 = vmatmul.msk.f32.gmra.mxu2 %vm741_vm2, %v717_v10  ;;  %v4288_v10 = vld [vmem:[%s7147_s3] sm:$0xff] }
  0x82   : > { %3976 = vperm.xlu2 %3958, %v3965_v54   ;;  %3971 = vperm.xlu1 %3952, %v3970_v2   ;;  %v701_v54 = vld [vmem:[%s4105_s10 + $0x98] sm:$0xff] }
  0x83   : > { %3704 = vmatmul.msk.f32.gmra.mxu0 %vm741_vm2, %v696_v12  ;;  %3726 = vmatmul.msk.f32.gmra.mxu2 %vm741_vm2, %v718_v13 }
  0x84   : > { %v4245_v28 = vpop.permute.xlu2 %3875 }
  0x8a   : > { %3980 = vset.pattern.permute.xlu2 %v4089_v4  ;;  %v3846_v20 = vpop.permute.xlu0 %3845  ;;  %v720_v4 = vld [vmem:[%s4105_s10 + $0x130] sm:$0xff] }
  0x8b   : > { %3705 = vmatmul.msk.f32.gmra.mxu0 %vm741_vm2, %v697_v15  ;;  %3727 = vmatmul.msk.f32.gmra.mxu2 %vm741_vm2, %v719_v16  ;;  %v3847_v25 = vunpack.i.l.bf16 %v3846_v20  ;;  %v3848_v58 = vunpack.i.h.bf16 %v3846_v20  ;;  %v4298_v16 = vperm.slane %v4288_v10, 1 }
  0x8c   : > { %v4259_v45 = vpop.permute.xlu1 %3857 }
  0x8d   : > { %v3859_v49 = vunpack.i.l.bf16 %v4259_v45 }
  0x90   : > { %v921_v21 = vpop.f32.mrf.mxu0 }
  0x91   : > { %v922_v23 = vadd.f32 %v4236_v19, %v921_v21 }
  0x93   : > { %v1083_v24 = vmax.f32 %v922_v23, 0.0  ;;  %3706 = vmatmul.msk.f32.gmra.mxu0 %vm741_vm2, %v698_v22  ;;  %3728 = vmatmul.msk.f32.gmra.mxu2 %vm741_vm2, %v720_v4 }
  0x94   : > { %v4254_v41 = vpop.permute.xlu2 %3886 }
  0x95   : > { %v1137_v27 = vmin.f32 %v1083_v24, 6.0  ;;  %7291 = vst [vmem:[#allocation4_spill] sm:$0xff] %v4254_v41  ;;  %v4308_v24 = vperm.slane %v4288_v10, 2 }
  0x96   : > { %v987_v29 = vpop.f32.mrf.mxu2 }
  0x97   : > { %v1191_v30 = vmul.f32 %v3847_v25, %v1137_v27  ;;  %v988_v13 = vadd.f32 %v4236_v19, %v987_v29  ;;  %7296 = vst [vmem:[#allocation9_spill] sm:$0xff] %v4308_v24  ;;  %v703_v29 = vld [vmem:[%s4105_s10 + $0xa8] sm:$0xff] }
  0x98   : > { %v924_v31 = vpop.f32.mrf.mxu0 }
  0x99   : > { %1246 = vst.msk [vmem:[#allocation2] sm:$0xff] %vm1245_vm7, %v1191_v30  ;;  %v925_v34 = vadd.f32 %v4236_v19, %v924_v31  ;;  %v725_v30 = vld [vmem:[%s4105_s10 + $0x158] sm:$0xff] }
  0x9a   : > { %v3852_v35 = vpop.permute.xlu0 %3851 }
  0x9b   : > { %v1084_v36 = vmax.f32 %v925_v34, 0.0  ;;  %3707 = vmatmul.msk.f32.gmra.mxu0 %vm741_vm2, %v699_v32  ;;  %3729 = vmatmul.msk.f32.gmra.mxu2 %vm741_vm2, %v721_v33  ;;  %v3853_v37 = vunpack.i.l.bf16 %v3852_v35  ;;  %v3854_v11 = vunpack.i.h.bf16 %v3852_v35  ;;  %v4319_v32 = vperm.slane %v4288_v10, 0 }
  0x9c   : > { %v4277_v61 = vpop.permute.xlu1 %3863  ;;  %v1105_v33 = vmax.f32 %v988_v13, 0.0 }
  0x9d   : > { %v1138_v38 = vmin.f32 %v1084_v36, 6.0  ;;  %7297 = vst [vmem:[#allocation10_spill] sm:$0xff] %v4319_v32 }
  0x9e   : > { %v990_v39 = vpop.f32.mrf.mxu2 }
  0x9f   : > { %v1192_v40 = vmul.f32 %v3853_v37, %v1138_v38  ;;  %v991_v26 = vadd.f32 %v4236_v19, %v990_v39  ;;  %v3860_v39 = vunpack.i.h.bf16 %v4259_v45  ;;  %v4337_v45 = vperm.slane %v4288_v10, 3 }
  0xa0   : > { %v927_v42 = vpop.f32.mrf.mxu0  ;;  %v1303_v20 = vld [vmem:[#allocation2] sm:$0xff] }
  0xa1   : > { %1247 = vst.msk [vmem:[#allocation2 + $0x8] sm:$0xff] %vm1245_vm7, %v1192_v40  ;;  %v928_v47 = vadd.f32 %v4236_v19, %v927_v42  ;;  %v1312_v35 = vmul.f32 %v4298_v16, %v1303_v20 }
  0xa3   : > { %3708 = vmatmul.msk.f32.gmra.mxu0 %vm741_vm2, %v700_v43  ;;  %3730 = vmatmul.msk.f32.gmra.mxu2 %vm741_vm2, %v722_v44  ;;  %v1085_v48 = vmax.f32 %v928_v47, 0.0  ;;  %v1329_v47 = vmul.f32 %v4308_v24, %v1303_v20 }
  0xa4   : > { %v4269_v56 = vpop.permute.xlu2 %3904  ;;  %v4303_v4 = vpop.permute.xlu1 %3880 }
  0xa5   : > { %v1139_v50 = vmin.f32 %v1085_v48, 6.0  ;;  %7295 = vst [vmem:[#allocation8_spill] sm:$0xff] %v4303_v4  ;;  %v3273_v4 = vld [vmem:[%s7149_s5 + $0x18] sm:$0xff] }
  0xa6   : > { %v993_v51 = vpop.f32.mrf.mxu2  ;;  %3386 = vmatpush.msra.mxu1 %v3273_v4  ;;  %3813 = vmatpush.msrb.mxu3 %v3273_v4 }
  0xa7   : > { %v1193_v52 = vmul.f32 %v3859_v49, %v1139_v50  ;;  %v994_v42 = vadd.f32 %v4236_v19, %v993_v51  ;;  %v1106_v49 = vmax.f32 %v991_v26, 0.0 }
  0xa8   : > { %v930_v53 = vpop.f32.mrf.mxu0  ;;  %v4295_v14 = vld [vmem:[#allocation2 + $0x8] sm:$0xff] }
  0xa9   : > { %1248 = vst.msk [vmem:[#allocation2 + $0x10] sm:$0xff] %vm1245_vm7, %v1193_v52  ;;  %v931_v57 = vadd.f32 %v4236_v19, %v930_v53  ;;  %v4312_v25 = vmul.f32 %v4298_v16, %v4295_v14  ;;  %v1159_v52 = vmin.f32 %v1105_v33, 6.0 }
  0xaa   : > { %v4275_v60 = vpop.permute.xlu0 %3892 }
  0xab   : > { %3709 = vmatmul.msk.f32.gmra.mxu0 %vm741_vm2, %v701_v54  ;;  %3731 = vmatmul.msk.f32.gmra.mxu2 %vm741_vm2, %v723_v55  ;;  %v1086_v59 = vmax.f32 %v931_v57, 0.0  ;;  %7292 = vst [vmem:[#allocation5_spill] sm:$0xff] %v4275_v60  ;;  %v1320_v48 = vrot.slane %v4312_v25, 1  ;;  %v1319_v54 = vrot.slane %v1312_v35, 1  ;;  %v4342_v55 = vmul.f32 %v4308_v24, %v4295_v14 }
  0xad   : > { %v1140_v62 = vmin.f32 %v1086_v59, 6.0  ;;  %v1107_v59 = vmax.f32 %v994_v42, 0.0  ;;  %v1337_v26 = vrot.slane %v4342_v55, 2  ;;  %v1308_v42 = vmul.f32 %v4319_v32, %v4295_v14 }
  0xae   : > { %v4281_v7 = vpop.f32.mrf.mxu2 }
  0xaf   : > { %v1194_v63 = vmul.f32 %v3848_v58, %v1140_v62  ;;  %v4346_v58 = vperm.slane %v4288_v10, 4  ;;  %v4349_v62 = vperm.slane %v4288_v10, 5  ;;  %v997_v18 = vadd.f32 %v4236_v19, %v4281_v7 }
  0xb0   : > { %v933_v0 = vpop.f32.mrf.mxu0  ;;  %v1305_v40 = vld [vmem:[#allocation2 + $0x10] sm:$0xff]  ;;  %v1161_v33 = vmin.f32 %v1107_v59, 6.0  ;;  %v4370_v7 = vperm.slane %v4288_v10, 6 }
  0xb1   : > { %v934_v9 = vadd.f32 %v4236_v19, %v933_v0  ;;  %1249 = vst.msk [vmem:[#allocation2 + $0x18] sm:$0xff] %vm1245_vm7, %v1194_v63  ;;  %v1314_v57 = vmul.f32 %v4298_v16, %v1305_v40 }
  0xb2   : > { %v4301_v22 = vpop.permute.xlu0 %3921  ;;  %7299 = vst [vmem:[#allocation12_spill] sm:$0xff] %v4349_v62 }
  0xb3   : > { %v1087_v2 = vmax.f32 %v934_v9, 0.0  ;;  %3710 = vmatmul.msk.f32.gmra.mxu0 %vm741_vm2, %v702_v1  ;;  %3732 = vmatmul.msk.f32.gmra.mxu2 %vm741_vm2, %v724_v6  ;;  %7294 = vst [vmem:[#allocation7_spill] sm:$0xff] %v4301_v22  ;;  %v1307_v1 = vmul.f32 %v4319_v32, %v1303_v20  ;;  %v1336_v6 = vrot.slane %v1329_v47, 2  ;;  %v1321_v9 = vsel %vm1318_vm8, %v1319_v54, %v1320_v48 }
  0xb4   : > { %v4290_v12 = vpop.permute.xlu2 %3916  ;;  %v4363_v20 = vpop.permute.xlu1 %3898  ;;  %7302 = vst [vmem:[#allocation15_spill] sm:$0xff] %v4370_v7 }
  0xb5   : > { %7293 = vst [vmem:[#allocation6_spill] sm:$0xff] %v4290_v12  ;;  %v1141_v15 = vmin.f32 %v1087_v2, 6.0  ;;  %v1338_v14 = vsel %vm1335_vm9, %v1336_v6, %v1337_v26 }
  0xb6   : > { %v999_v43 = vpop.f32.mrf.mxu2  ;;  %7301 = vst [vmem:[#allocation14_spill] sm:$0xff] %v4363_v20 }
  0xb7   : > { %v1195_v21 = vmul.f32 %v3854_v11, %v1141_v15  ;;  %v4353_v11 = vmin.f32 %v1106_v49, 6.0  ;;  %v4380_v49 = vperm.slane %v4288_v10, 7 }
  0xb8   : > { %v936_v27 = vpop.f32.mrf.mxu0 }
  0xb9   : > { %1250 = vst.msk [vmem:[#allocation2 + $0x20] sm:$0xff] %vm1245_vm7, %v1195_v21  ;;  %v937_v34 = vadd.f32 %v4236_v19, %v936_v27  ;;  %v1322_v27 = vrot.slane %v1314_v57, 1 }
  0xbb   : > { %v1088_v44 = vmax.f32 %v937_v34, 0.0  ;;  %3711 = vmatmul.msk.f32.gmra.mxu0 %vm741_vm2, %v703_v29  ;;  %3733 = vmatmul.msk.f32.gmra.mxu2 %vm741_vm2, %v725_v30  ;;  %v3865_v29 = vunpack.i.l.bf16 %v4277_v61  ;;  %v1326_v34 = vadd.f32 %v1321_v9, %v1307_v1  ;;  %v1323_v59 = vsel %vm1318_vm8, %v1320_v48, %v1322_v27 }
  0xbc   : > { %v4329_v46 = vpop.permute.xlu2 %3931 }
  0xbd   : > { %7298 = vst [vmem:[#allocation11_spill] sm:$0xff] %v4329_v46  ;;  %v1142_v51 = vmin.f32 %v1088_v44, 6.0  ;;  %v3933_v53 = vunpack.i.l.bf16 %v4329_v46  ;;  %v1331_v44 = vmul.f32 %v4308_v24, %v1305_v40  ;;  %v1346_v40 = vld [vmem:[#allocation2 + $0x18] sm:$0xff]  ;;  %v1343_v10 = vadd.f32 %v1338_v14, %v1326_v34 }
  0xbe   : > { %v1002_v55 = vpop.f32.mrf.mxu2  ;;  %v1441_v48 = vmul.f32 %v1346_v40, %v4319_v32 }
  0xbf   : > { %v1196_v63 = vmul.f32 %v3860_v39, %v1142_v51  ;;  %v1213_v0 = vmul.f32 %v3933_v53, %v1159_v52  ;;  %v735_v39 = vld [vmem:[%s4105_s10 + $0x1a8] sm:$0xff]  ;;  %v1108_v51 = vmax.f32 %v997_v18, 0.0  ;;  %v1339_v18 = vrot.slane %v1331_v44, 2 }
  0xc0   : > { %v939_v2 = vpop.f32.mrf.mxu0  ;;  %v4377_v47 = vld [vmem:[#allocation2 + $0x20] sm:$0xff]  ;;  %3743 = vmatmul.msk.f32.gmra.mxu3 %vm741_vm2, %v735_v39  ;;  %v1371_v39 = vmul.f32 %v4349_v62, %v1346_v40 }
  0xc1   : > { %1251 = vst.msk [vmem:[#allocation2 + $0x28] sm:$0xff] %vm1245_vm7, %v1196_v63  ;;  %v940_v30 = vadd.f32 %v4236_v19, %v939_v2  ;;  %v1000_v63 = vadd.f32 %v4236_v19, %v999_v43  ;;  %v4390_v1 = vmul.f32 %v4346_v58, %v4377_v47  ;;  %v1355_v43 = vmul.f32 %v4346_v58, %v1346_v40 }
  0xc2   : > { %v4361_v25 = vpop.permute.xlu0 %3937  ;;  %1268 = vst.msk [vmem:[#allocation2 + $0xb0] sm:$0xff] %vm1245_vm7, %v1213_v0  ;;  %v4424_v6 = vmul.f32 %v4377_v47, %v4308_v24  ;;  %v1377_v54 = vrot.slane %v1371_v39, 2 }
  0xc3   : > { %7300 = vst [vmem:[#allocation13_spill] sm:$0xff] %v4361_v25  ;;  %v3940_v35 = vunpack.i.h.bf16 %v4361_v25  ;;  %v1089_v52 = vmax.f32 %v940_v30, 0.0  ;;  %v1327_v30 = vadd.f32 %v1323_v59, %v1308_v42  ;;  %v1109_v44 = vmax.f32 %v1000_v63, 0.0 }
  0xc4   : > { %v4411_v42 = vmul.f32 %v4349_v62, %v4377_v47  ;;  %v4415_v59 = vpop.permute.xlu2 %3948  ;;  %v4417_v14 = vpop.permute.xlu1 %3910  ;;  %v1445_v63 = vmul.f32 %v1346_v40, %v4298_v16  ;;  %v1361_v53 = vrot.slane %v1355_v43, 1 }
  0xc5   : > { %v1215_v57 = vmul.f32 %v3940_v35, %v1161_v33  ;;  %v1143_v0 = vmin.f32 %v1089_v52, 6.0  ;;  %v4398_v33 = vmin.f32 %v1108_v51, 6.0  ;;  %v1350_v35 = vmul.f32 %v4337_v45, %v1346_v40  ;;  %7303 = vst [vmem:[#allocation16_spill] sm:$0xff] %v4415_v59 }
  0xc6   : > { %v4405_v52 = vmul.f32 %v4377_v47, %v4298_v16  ;;  %7304 = vst [vmem:[#allocation17_spill] sm:$0xff] %v4417_v14  ;;  %v1378_v43 = vrot.slane %v4411_v42, 2  ;;  %v1451_v51 = vrot.slane %v1445_v63, 1  ;;  %v4447_v42 = vld [vmem:[%s7147_s3 + $0x8] ss:$0 sm:$0xff]  ;;  %v3950_v23 = vunpack.i.l.bf16 %v4415_v59 }
  0xc7   : > { %1270 = vst.msk [vmem:[#allocation2 + $0xc0] sm:$0xff] %vm1245_vm7, %v1215_v57  ;;  %v1197_v27 = vmul.f32 %v3865_v29, %v1143_v0  ;;  %v1362_v29 = vrot.slane %v4390_v1, 1  ;;  %v1003_v57 = vadd.f32 %v4236_v19, %v1002_v55  ;;  %v1340_v0 = vsel %vm1335_vm9, %v1337_v26, %v1339_v18 }
  0xc8   : > { %v1344_v38 = vadd.f32 %v1340_v0, %v1327_v30  ;;  %v1351_v55 = vmul.f32 %v4337_v45, %v4377_v47  ;;  %v1348_v34 = vld [vmem:[#allocation2 + $0x28] sm:$0xff]  ;;  %v1352_v9 = vadd.f32 %v1350_v35, %v1343_v10  ;;  %v1452_v26 = vrot.slane %v4405_v52, 1  ;;  %v942_v13 = vpop.f32.mrf.mxu0  ;;  %v1005_v0 = vpop.f32.mrf.mxu2 }
  0xc9   : > { %1252 = vst.msk [vmem:[#allocation2 + $0x30] sm:$0xff] %vm1245_vm7, %v1197_v27  ;;  %v1460_v27 = vmul.f32 %v1346_v40, %v4308_v24  ;;  %v4430_v18 = vmin.f32 %v1109_v44, 6.0  ;;  %v1363_v50 = vsel %vm1318_vm8, %v1361_v53, %v1362_v29  ;;  %v1110_v30 = vmax.f32 %v1003_v57, 0.0  ;;  %v4439_v39 = vld [vmem:[#allocation2 + $0xb0] sm:$0xff] }
  0xca   : > { %v1467_v10 = vrot.slane %v4424_v6, 2  ;;  %v1357_v35 = vmul.f32 %v4346_v58, %v1348_v34  ;;  %v1353_v52 = vadd.f32 %v1351_v55, %v1344_v38  ;;  %v1442_v44 = vmul.f32 %v4377_v47, %v4319_v32 }
  0xcb   : > { %v1466_v2 = vrot.slane %v1460_v27, 2  ;;  %v1373_v53 = vmul.f32 %v4349_v62, %v1348_v34  ;;  %v1453_v57 = vsel %vm1318_vm8, %v1451_v51, %v1452_v26  ;;  %v1447_v6 = vmul.f32 %v1348_v34, %v4298_v16 }
  0xcc   : > { %v1462_v63 = vmul.f32 %v1348_v34, %v4308_v24  ;;  %v1368_v27 = vadd.f32 %v1363_v50, %v1352_v9  ;;  %v4455_v38 = vmul.f32 %v4439_v39, %v4380_v49  ;;  %v4457_v47 = vmin.f32 %v1110_v30, 6.0 }
  0xcd   : > { %v1379_v55 = vsel %vm1335_vm9, %v1377_v54, %v1378_v43  ;;  %v1364_v15 = vrot.slane %v1357_v35, 1  ;;  %v4464_v51 = vsel %vm1335_vm9, %v1466_v2, %v1467_v10  ;;  %v1006_v50 = vadd.f32 %v4236_v19, %v1005_v0  ;;  %v4477_v35 = vpop.permute.xlu1 %3926 }
  0xce   : > { %7305 = vst [vmem:[#allocation18_spill] sm:$0xff] %v4455_v38  ;;  %v1380_v9 = vrot.slane %v1373_v53, 2  ;;  %v4470_v34 = vmul.f32 %v4447_v42, %v4439_v39  ;;  %v1458_v30 = vadd.f32 %v1453_v57, %v1441_v48  ;;  %v1454_v2 = vrot.slane %v1447_v6, 1 }
  0xcf   : > { %7308 = vst [vmem:[#allocation21_spill] sm:$0xff] %v4477_v35  ;;  %v1469_v40 = vrot.slane %v1462_v63, 2  ;;  %v4479_v21 = vadd.f32 %v1379_v55, %v1368_v27  ;;  %v4484_v53 = vmul.f32 %v4439_v39, %v4370_v7  ;;  %v4489_v57 = vmul.f32 %v4439_v39, %v4337_v45 }
  0xd0   : > { %7307 = vst [vmem:[#allocation20_spill] sm:$0xff] %v4470_v34  ;;  %v1365_v6 = vsel %vm1318_vm8, %v1362_v29, %v1364_v15  ;;  %v1216_v63 = vmul.f32 %v3950_v23, %v4398_v33  ;;  %v1111_v27 = vmax.f32 %v1006_v50, 0.0  ;;  %v943_v55 = vadd.f32 %v4236_v19, %v942_v13  ;;  %v945_v0 = vpop.f32.mrf.mxu0  ;;  %v1008_v23 = vpop.f32.mrf.mxu2 }
  0xd1   : > { %7309 = vst [vmem:[#allocation22_spill] sm:$0xff] %v4484_v53  ;;  %v4500_v48 = vsel %vm1335_vm9, %v1378_v43, %v1380_v9  ;;  %v4505_v54 = vmul.f32 %v4439_v39, %v4346_v58  ;;  %v4509_v15 = vmul.f32 %v4439_v39, %v4349_v62  ;;  %v1455_v13 = vsel %vm1318_vm8, %v1452_v26, %v1454_v2 }
  0xd2   : > { %7310 = vst [vmem:[#allocation23_spill] sm:$0xff] %v4489_v57  ;;  %v4513_v3 = vsel %vm1335_vm9, %v1467_v10, %v1469_v40  ;;  %v1090_v1 = vmax.f32 %v943_v55, 0.0  ;;  %v1009_v33 = vadd.f32 %v4236_v19, %v1008_v23  ;;  %v4517_v29 = vadd.f32 %v1365_v6, %v1353_v52  ;;  %v4522_v37 = vpop.permute.xlu0 %3966  ;;  %v4527_v23 = vld [vmem:[#allocation2 + $0xc0] sm:$0xff]  ;;  %v1387_v6 = vld [vmem:[#allocation2 + $0x30] sm:$0xff] }
  0xd3   : > { %7311 = vst [vmem:[#allocation24_spill] sm:$0xff] %v4505_v54  ;;  %v3689_v43 = vsel %vm331_vm12, 1.0, %v4019_v8  ;;  %v946_v50 = vadd.f32 %v4236_v19, %v945_v0  ;;  %v1165_v31 = vmin.f32 %v1111_v27, 6.0  ;;  %v7315_v53 = vunpack.i.l.bf16 %v4230_v17 }
  0xd4   : > { %v4461_v36 = vpop.permute.xlu2 %3960  ;;  %7312 = vst [vmem:[#allocation25_spill] sm:$0xff] %v4509_v15  ;;  %v1144_v26 = vmin.f32 %v1090_v1, 6.0  ;;  %v1112_v2 = vmax.f32 %v1009_v33, 0.0  ;;  %v642_v40 = vperm.slane %v3689_v43, 0  ;;  %v3968_v1 = vunpack.i.l.bf16 %v4522_v37 }
  0xd5   : > { %7306 = vst [vmem:[#allocation19_spill] sm:$0xff] %v4461_v36  ;;  %v3962_v9 = vunpack.i.l.bf16 %v4461_v36  ;;  %v1091_v52 = vmax.f32 %v946_v50, 0.0  ;;  %v4564_v55 = vmul.f32 %v4380_v49, %v1387_v6  ;;  %v4597_v59 = vmul.f32 %v1387_v6, %v4319_v32 }
  0xd6   : > { %1271 = vst.msk [vmem:[#allocation2 + $0xc8] sm:$0xff] %vm1245_vm7, %v1216_v63  ;;  %v1459_v63 = vadd.f32 %v1455_v13, %v1442_v44  ;;  %v1198_v34 = vmul.f32 %v7315_v53, %v1144_v26  ;;  %v1166_v27 = vmin.f32 %v1112_v2, 6.0  ;;  %647 = vperm.xlu1 %3952, %v642_v40   ;;  %659 = vperm.xlu0 %3981, %v642_v40  }
  0xd7   : > { %7313 = vst [vmem:[#allocation26_spill] sm:$0xff] %v4522_v37  ;;  %v1217_v8 = vmul.f32 %v3962_v9, %v4430_v18  ;;  %v4536_v44 = vmul.f32 %v4439_v39, %v4319_v32  ;;  %v4540_v13 = vmul.f32 %v4439_v39, %v4298_v16  ;;  %v1145_v18 = vmin.f32 %v1091_v52, 6.0  ;;  %653 = vperm.xlu2 %3980, %v642_v40  }
  0xd8   : > { %v4548_v53 = vmul.f32 %v4439_v39, %v4308_v24  ;;  %v1473_v9 = vadd.f32 %v4464_v51, %v1458_v30  ;;  %v4553_v26 = vmul.f32 %v4527_v23, %v4370_v7  ;;  %1253 = vst.msk [vmem:[#allocation2 + $0x38] sm:$0xff] %vm1245_vm7, %v1198_v34  ;;  %v1219_v2 = vmul.f32 %v3968_v1, %v1165_v31  ;;  %v948_v57 = vpop.f32.mrf.mxu0 }
  0xd9   : > { %7316 = vst [vmem:[#allocation28_spill] sm:$0xff] %v4540_v13  ;;  %v1391_v52 = vmul.f32 %v4370_v7, %v1387_v6  ;;  %v7321_v40 = vunpack.i.l.bf16 %v4245_v28  ;;  %v4567_v51 = vmul.f32 %v4447_v42, %v1387_v6  ;;  %v4570_v34 = vperm.slane %v3689_v43, 1 }
  0xda   : > { %1272 = vst.msk [vmem:[#allocation2 + $0xd0] sm:$0xff] %vm1245_vm7, %v1217_v8  ;;  %v4559_v8 = vmul.f32 %v4527_v23, %v4380_v49  ;;  %v1478_v30 = vmul.f32 %v1387_v6, %v4337_v45  ;;  %v4575_v1 = vmul.f32 %v1387_v6, %v4346_v58  ;;  %v4620_v25 = vmul.f32 %v4527_v23, %v4298_v16 }
  0xdb   : > { %7318 = vst [vmem:[#allocation30_spill] sm:$0xff] %v4548_v53  ;;  %v1199_v0 = vmul.f32 %v7321_v40, %v1145_v18  ;;  %v4578_v18 = vmul.f32 %v1387_v6, %v4349_v62  ;;  %v1565_v40 = vmul.f32 %v1387_v6, %v4298_v16  ;;  %v4594_v38 = vadd.f32 %v1391_v52, %v4479_v21 }
  0xdc   : > { %v4524_v10 = vpop.permute.xlu2 %3976  ;;  %v4544_v50 = vpop.permute.xlu1 %3943  ;;  %7319 = vst [vmem:[#allocation31_spill] sm:$0xff] %v4553_v26  ;;  %v4590_v26 = vmul.f32 %v4527_v23, %v4337_v45  ;;  %v4614_v52 = vadd.f32 %v1478_v30, %v1473_v9  ;;  %v2291_v30 = vrot.slane %v4620_v25, 1 }
  0xdd   : > { %7314 = vst [vmem:[#allocation27_spill] sm:$0xff] %v4524_v10  ;;  %v3978_v33 = vunpack.i.l.bf16 %v4524_v10  ;;  %v3945_v31 = vunpack.i.l.bf16 %v4544_v50  ;;  %v2114_v46 = vld [vmem:[#allocation2 + $0xc8] sm:$0xff] }
  0xde   : > { %7317 = vst [vmem:[#allocation29_spill] sm:$0xff] %v4544_v50  ;;  %666 = vperm.xlu1 %3952, %v4570_v34   ;;  %v4676_v60 = vmul.f32 %v2114_v46, %v4298_v16  ;;  %v4681_v36 = vmul.f32 %v2114_v46, %v4380_v49  ;;  %v4697_v14 = vmul.f32 %v2114_v46, %v4370_v7 }
  0xdf   : > { %7320 = vst [vmem:[#allocation32_spill] sm:$0xff] %v4559_v8  ;;  %v1220_v39 = vmul.f32 %v3978_v33, %v1166_v27  ;;  %v4582_v27 = vmul.f32 %v4447_v42, %v4527_v23  ;;  %v1011_v33 = vpop.f32.mrf.mxu2  ;;  %v1214_v21 = vmul.f32 %v3945_v31, %v4353_v11  ;;  %v4622_v43 = vld [vmem:[#allocation2 + $0x38] sm:$0xff]  ;;  %672 = vperm.xlu2 %3980, %v4570_v34  }
  0xe0   : > { %7322 = vst [vmem:[#allocation33_spill] sm:$0xff] %v4564_v55  ;;  %v1474_v11 = vadd.f32 %v4513_v3, %v1459_v63  ;;  %v1479_v9 = vmul.f32 %v4622_v43, %v4337_v45  ;;  %v4647_v31 = vmul.f32 %v4527_v23, %v4319_v32  ;;  %v2282_v4 = vmul.f32 %v2114_v46, %v4319_v32 }
  0xe1   : > { %7323 = vst [vmem:[#allocation34_spill] sm:$0xff] %v4567_v51  ;;  %v2115_v51 = vld [vmem:[#allocation2 + $0xd0] sm:$0xff] }
  0xe2   : > { %1274 = vst.msk [vmem:[#allocation2 + $0xe0] sm:$0xff] %vm1245_vm7, %v1219_v2  ;;  %v4605_v2 = vmul.f32 %v4527_v23, %v4349_v62  ;;  %v4640_v3 = vadd.f32 %v1479_v9, %v1474_v11  ;;  %v1562_v11 = vmul.f32 %v4622_v43, %v4319_v32 }
  0xe3   : > { %7324 = vst [vmem:[#allocation35_spill] sm:$0xff] %v4582_v27  ;;  %v4652_v27 = vadd.f32 %v4500_v48, %v4517_v29 }
  0xe4   : > { %1254 = vst.msk [vmem:[#allocation2 + $0x40] sm:$0xff] %vm1245_vm7, %v1199_v0  ;;  %v4601_v0 = vmul.f32 %v4527_v23, %v4346_v58 }
  0xe5   : > { %7325 = vst [vmem:[#allocation36_spill] sm:$0xff] %v4590_v26  ;;  %v4627_v26 = vmul.f32 %v4527_v23, %v4308_v24  ;;  %v4661_v23 = vmul.f32 %v4622_v43, %v4308_v24 }
  0xe6   : > { %1275 = vst.msk [vmem:[#allocation2 + $0xe8] sm:$0xff] %vm1245_vm7, %v1220_v39  ;;  %v4610_v39 = vmul.f32 %v1387_v6, %v4308_v24  ;;  %v1571_v6 = vrot.slane %v1565_v40, 1  ;;  %v1566_v40 = vmul.f32 %v4622_v43, %v4298_v16  ;;  %3982 = vset.pattern.permute.xlu1 %v4092_v5  ;;  %v4689_v5 = vmul.f32 %v4447_v42, %v2114_v46 }
  0xe7   : > { %7326 = vst [vmem:[#allocation37_spill] sm:$0xff] %v4594_v38  ;;  %v1014_v29 = vpop.f32.mrf.mxu2  ;;  %v1587_v35 = vrot.slane %v4661_v23, 2  ;;  %v2292_v23 = vrot.slane %v4676_v60, 1  ;;  %v4716_v38 = vmul.f32 %v2114_v46, %v4337_v45 }
  0xe8   : > { %7327 = vst [vmem:[#allocation38_spill] sm:$0xff] %v4627_v26  ;;  %v1572_v22 = vrot.slane %v1566_v40, 1  ;;  %v4667_v40 = vmul.f32 %v2114_v46, %v4346_v58  ;;  %v7337_v26 = vrot.slane %v4605_v2, 2 }
  0xe9   : > { %1269 = vst.msk [vmem:[#allocation2 + $0xb8] sm:$0xff] %vm1245_vm7, %v1214_v21  ;;  %v1012_v21 = vadd.f32 %v4236_v19, %v1011_v33  ;;  %v949_v33 = vadd.f32 %v4236_v19, %v948_v57 }
  0xea   : > { %v1573_v8 = vsel %vm1318_vm8, %v1571_v6, %v1572_v22  ;;  %v4673_v6 = vmul.f32 %v2114_v46, %v4349_v62  ;;  %7328 = vst [vmem:[#allocation39_spill] sm:$0xff] %v4681_v36  ;;  %v4748_v36 = vsel %vm1318_vm8, %v2291_v30, %v2292_v23  ;;  %v1498_v30 = vmul.f32 %v4622_v43, %v4349_v62 }
  0xeb   : > { %v4642_v63 = vld [vmem:[#allocation2 + $0x40] sm:$0xff]  ;;  %v1113_v57 = vmax.f32 %v1012_v21, 0.0  ;;  %v1092_v9 = vmax.f32 %v949_v33, 0.0  ;;  %v4686_v21 = vadd.f32 %v4236_v19, %v1014_v29  ;;  %7329 = vst [vmem:[#allocation40_spill] sm:$0xff] %v4689_v5  ;;  %v4700_v33 = vmul.f32 %v2114_v46, %v4308_v24 }
  0xec   : > { %v1567_v25 = vmul.f32 %v4642_v63, %v4298_v16  ;;  %v1582_v48 = vmul.f32 %v4642_v63, %v4308_v24  ;;  %7330 = vst [vmem:[#allocation41_spill] sm:$0xff] %v4697_v14  ;;  %v951_v14 = vpop.f32.mrf.mxu0  ;;  %v1499_v2 = vmul.f32 %v4642_v63, %v4349_v62 }
  0xed   : > { %7331 = vst [vmem:[#allocation42_spill] sm:$0xff] %v4716_v38  ;;  %v4723_v37 = vmin.f32 %v1113_v57, 6.0  ;;  %v4730_v46 = vadd.f32 %v4236_v19, %v951_v14  ;;  %v7336_v57 = vrot.slane %v4673_v6, 2  ;;  %v1392_v14 = vmul.f32 %v4370_v7, %v4622_v43 }
  0xee   : > { %v1574_v41 = vrot.slane %v1567_v25, 1  ;;  %v1589_v12 = vrot.slane %v1582_v48, 2  ;;  %678 = vperm.xlu1 %3982, %v4570_v34   ;;  %v4754_v34 = vmul.f32 %v4380_v49, %v4622_v43 }
  0xef   : > { %7332 = vst [vmem:[#allocation43_spill] sm:$0xff] %v4723_v37  ;;  %v4745_v5 = vsel %vm1335_vm9, %v7337_v26, %v7336_v57  ;;  %v7340_v26 = vunpack.i.h.bf16 %v4277_v61  ;;  %v4773_v37 = vmul.f32 %v4447_v42, %v4642_v63  ;;  %v7341_v61 = vrot.slane %v4610_v39, 2  ;;  %v2234_v39 = vld [vmem:[#allocation2 + $0xe0] sm:$0xff] }
  0xf0   : > { %v1575_v25 = vsel %vm1318_vm8, %v1572_v22, %v1574_v41  ;;  %v4709_v48 = vsel %vm1335_vm9, %v1587_v35, %v1589_v12  ;;  %v1146_v41 = vmin.f32 %v1092_v9, 6.0  ;;  %v1483_v12 = vmul.f32 %v4622_v43, %v4346_v58  ;;  %7338 = vst [vmem:[#allocation45_spill] sm:$0xff] %v4745_v5 }
  0xf1   : > { %v4702_v29 = vadd.f32 %v1575_v25, %v1562_v11  ;;  %v3272_v11 = vld [vmem:[%s7149_s5 + $0x10] sm:$0xff]  ;;  %v2287_v22 = vmul.f32 %v2115_v51, %v4298_v16  ;;  %v1484_v25 = vmul.f32 %v4642_v63, %v4346_v58  ;;  %v7333_v9 = vrot.slane %v4667_v40, 1  ;;  %7339 = vst [vmem:[#allocation46_spill] sm:$0xff] %v4754_v34 }
  0xf2   : > { %3387 = vmatpush.msra.mxu1 %v3272_v11  ;;  %3814 = vmatpush.msrb.mxu3 %v3272_v11  ;;  %v7334_v11 = vrot.slane %v4601_v0, 1  ;;  %v4758_v0 = vmul.f32 %v4447_v42, %v4622_v43  ;;  %v1578_v5 = vadd.f32 %v1573_v8, %v4597_v59  ;;  %v2204_v43 = vmul.f32 %v2115_v51, %v4346_v58 }
  0xf3   : > { %v2294_v57 = vrot.slane %v2287_v22, 1  ;;  %v1491_v38 = vrot.slane %v1484_v25, 1  ;;  %v2219_v22 = vmul.f32 %v2115_v51, %v4349_v62  ;;  %v2302_v59 = vmul.f32 %v2115_v51, %v4308_v24 }
  0xf4   : > { %v4738_v60 = vsel %vm1318_vm8, %v7334_v11, %v7333_v9  ;;  %v1200_v9 = vmul.f32 %v7340_v26, %v1146_v41  ;;  %v1489_v11 = vrot.slane %v1483_v12, 1  ;;  %v1588_v41 = vsel %vm1335_vm9, %v7341_v61, %v1587_v35 }
  0xf5   : > { %7335 = vst [vmem:[#allocation44_spill] sm:$0xff] %v4738_v60  ;;  %v4769_v60 = vmul.f32 %v4380_v49, %v4642_v63  ;;  %v4782_v8 = vadd.f32 %v1588_v41, %v1578_v5  ;;  %v4785_v12 = vadd.f32 %v1392_v14, %v4652_v27  ;;  %v1506_v25 = vrot.slane %v1499_v2, 2  ;;  %v1995_v14 = vld [vmem:[#allocation2 + $0xb8] sm:$0xff] }
  0xf6   : > { %1255 = vst.msk [vmem:[#allocation2 + $0x48] sm:$0xff] %vm1245_vm7, %v1200_v9  ;;  %v4789_v26 = vmul.f32 %v2115_v51, %v4380_v49  ;;  %v1504_v9 = vrot.slane %v1498_v30, 2  ;;  %v4793_v61 = vmul.f32 %v4447_v42, %v2115_v51  ;;  %v2295_v55 = vsel %vm1318_vm8, %v2292_v23, %v2294_v57 }
  0xf7   : > { %7342 = vst [vmem:[#allocation47_spill] sm:$0xff] %v4785_v12  ;;  %v7345_v5 = vrot.slane %v4575_v1, 1  ;;  %v1492_v41 = vsel %vm1318_vm8, %v1489_v11, %v1491_v38  ;;  %v2211_v63 = vrot.slane %v2204_v43, 1  ;;  %v2226_v12 = vrot.slane %v2219_v22, 2 }
  0xf8   : > { %7343 = vst [vmem:[#allocation48_spill] sm:$0xff] %v4789_v26  ;;  %v2309_v34 = vrot.slane %v2302_v59, 2  ;;  %v4803_v30 = vmul.f32 %v2234_v39, %v4380_v49  ;;  %v4806_v51 = vsel %vm1335_vm9, %v1504_v9, %v1506_v25  ;;  %v2299_v1 = vadd.f32 %v2295_v55, %v2282_v4  ;;  %v2235_v4 = vld [vmem:[#allocation2 + $0xe8] sm:$0xff] }
  0xf9   : > { %7344 = vst [vmem:[#allocation49_spill] sm:$0xff] %v4793_v61  ;;  %v1490_v27 = vsel %vm1318_vm8, %v7345_v5, %v1489_v11  ;;  %v4810_v57 = vmul.f32 %v4447_v42, %v2234_v39  ;;  %v4813_v5 = vadd.f32 %v1492_v41, %v4640_v3  ;;  %v4817_v11 = vmul.f32 %v2234_v39, %v4346_v58 }
  0xfa   : > { %7346 = vst [vmem:[#allocation50_spill] sm:$0xff] %v4803_v30  ;;  %v4820_v43 = vmul.f32 %v2234_v39, %v4349_v62  ;;  %v4823_v22 = vmul.f32 %v2234_v39, %v4370_v7  ;;  %v4826_v59 = vmul.f32 %v2234_v39, %v4298_v16  ;;  %v4829_v55 = vmul.f32 %v2234_v39, %v4308_v24 }
  0xfb   : > { %7347 = vst [vmem:[#allocation51_spill] sm:$0xff] %v4810_v57  ;;  %v1495_v3 = vadd.f32 %v1490_v27, %v4614_v52  ;;  %v7349_v25 = vrot.slane %v4667_v40, 1  ;;  %v7351_v38 = vrot.slane %v4673_v6, 2  ;;  %v7353_v2 = vrot.slane %v4700_v33, 2  ;;  %v3271_v6 = vld [vmem:[%s7149_s5 + $0x8] sm:$0xff] }
  0xfc   : > { %7348 = vst [vmem:[#allocation52_spill] sm:$0xff] %v4823_v22  ;;  %v2319_v27 = vmul.f32 %v2234_v39, %v4337_v45  ;;  %v4849_v40 = vmul.f32 %v2234_v39, %v4319_v32  ;;  %3388 = vmatpush.msra.mxu1 %v3271_v6  ;;  %3815 = vmatpush.msrb.mxu3 %v3271_v6  ;;  %v1017_v22 = vpop.f32.mrf.mxu2  ;;  %v7357_v39 = vmax.f32 %v4686_v21, 0.0  ;;  %v1093_v57 = vmax.f32 %v4730_v46, 0.0 }
  0xfd   : > { %v4835_v41 = vsel %vm1318_vm8, %v7349_v25, %v2211_v63  ;;  %v4840_v23 = vsel %vm1335_vm9, %v7351_v38, %v2226_v12  ;;  %v2310_v35 = vsel %vm1335_vm9, %v7353_v2, %v2309_v34  ;;  %v7354_v34 = vrot.slane %v4578_v18, 2  ;;  %v3270_v18 = vld [vmem:[%s7149_s5] sm:$0xff] }
  0xfe   : > { %7350 = vst [vmem:[#allocation53_spill] sm:$0xff] %v4835_v41  ;;  %v2314_v52 = vadd.f32 %v2310_v35, %v2299_v1  ;;  %v4860_v38 = vmul.f32 %v2235_v4, %v4380_v49  ;;  %v4867_v25 = vmul.f32 %v4447_v42, %v2235_v4  ;;  %v2339_v6 = vmul.f32 %v2235_v4, %v4349_v62 }
  0xff   : > { %7352 = vst [vmem:[#allocation54_spill] sm:$0xff] %v4840_v23  ;;  %v1505_v2 = vsel %vm1335_vm9, %v7354_v34, %v1504_v9  ;;  %v2324_v34 = vmul.f32 %v2235_v4, %v4346_v58  ;;  %v1168_v35 = vmin.f32 %v7357_v39, 6.0  ;;  %3389 = vmatpush.msra.mxu1 %v3270_v18  ;;  %3816 = vmatpush.msrb.mxu3 %v3270_v18  ;;  %v4880_v23 = vpop.permute.xlu1 %3954  ;;  %v7359_v30 = vunpack.i.l.bf16 %v4363_v20 }
 0x100   : > { %7355 = vst [vmem:[#allocation55_spill] sm:$0xff] %v4860_v38  ;;  %v4864_v1 = vadd.f32 %v1505_v2, %v1495_v3  ;;  %v954_v3 = vpop.f32.mrf.mxu0  ;;  %v2321_v2 = vadd.f32 %v2319_v27, %v2314_v52  ;;  %v2407_v63 = vmul.f32 %v2235_v4, %v4298_v16  ;;  %v2422_v12 = vmul.f32 %v2235_v4, %v4308_v24  ;;  %v1513_v52 = vld [vmem:[#allocation2 + $0x48] sm:$0xff] }
 0x101   : > { %7356 = vst [vmem:[#allocation56_spill] sm:$0xff] %v4867_v25  ;;  %v1222_v61 = vmul.f32 %v7359_v30, %v1168_v35  ;;  %v4887_v21 = vadd.f32 %v4709_v48, %v4702_v29  ;;  %v1018_v39 = vadd.f32 %v4236_v19, %v1017_v22  ;;  %v4892_v27 = vmul.f32 %v1995_v14, %v4380_v49 }
 0x102   : > { %7358 = vst [vmem:[#allocation57_spill] sm:$0xff] %v4880_v23  ;;  %v1147_v4 = vmin.f32 %v1093_v57, 6.0  ;;  %v955_v46 = vadd.f32 %v4236_v19, %v954_v3  ;;  %v2331_v18 = vrot.slane %v2324_v34, 1  ;;  %v2346_v41 = vrot.slane %v2339_v6, 2 }
 0x103   : > { %7360 = vst [vmem:[#allocation58_spill] sm:$0xff] %v4892_v27  ;;  %v1115_v9 = vmax.f32 %v1018_v39, 0.0  ;;  %v3957_v30 = vunpack.i.h.bf16 %v4880_v23  ;;  %v2414_v35 = vrot.slane %v2407_v63, 1  ;;  %v2429_v29 = vrot.slane %v2422_v12, 2 }
 0x104   : > { %1277 = vst.msk [vmem:[#allocation2 + $0xf8] sm:$0xff] %vm1245_vm7, %v1222_v61  ;;  %v7361_v48 = vunpack.i.h.bf16 %v4230_v17  ;;  %v1094_v38 = vmax.f32 %v955_v46, 0.0  ;;  %v2167_v57 = vmul.f32 %v1995_v14, %v4298_v16  ;;  %v4904_v61 = vmul.f32 %v4447_v42, %v1995_v14 }
 0x105   : > { %v1169_v26 = vmin.f32 %v1115_v9, 6.0  ;;  %v1218_v19 = vmul.f32 %v3957_v30, %v4457_v47  ;;  %v2084_v63 = vmul.f32 %v1995_v14, %v4346_v58  ;;  %v7363_v12 = vrot.slane %v4817_v11, 1 }
 0x106   : > { %v1201_v22 = vmul.f32 %v7361_v48, %v1147_v4  ;;  %7362 = vst [vmem:[#allocation59_spill] sm:$0xff] %v4904_v61  ;;  %v1148_v17 = vmin.f32 %v1094_v38, 6.0  ;;  %v7364_v3 = vrot.slane %v4820_v43, 2  ;;  %v2099_v47 = vmul.f32 %v1995_v14, %v4349_v62 }
 0x107   : > { %v2332_v6 = vsel %vm1318_vm8, %v7363_v12, %v2331_v18  ;;  %v7365_v39 = vunpack.i.l.bf16 %v4269_v56  ;;  %1273 = vst.msk [vmem:[#allocation2 + $0xd8] sm:$0xff] %vm1245_vm7, %v1218_v19  ;;  %v1516_v46 = vmul.f32 %v1513_v52, %v4370_v7  ;;  %v7366_v30 = vrot.slane %v4826_v59, 1 }
 0x108   : > { %1256 = vst.msk [vmem:[#allocation2 + $0x50] sm:$0xff] %vm1245_vm7, %v1201_v22  ;;  %v2347_v9 = vsel %vm1335_vm9, %v7364_v3, %v2346_v41  ;;  %v7367_v48 = vrot.slane %v4829_v55, 2  ;;  %v7368_v22 = vunpack.i.h.bf16 %v4245_v28  ;;  %v4928_v12 = vmul.f32 %v1513_v52, %v4380_v49 }
 0x109   : > { %v1223_v4 = vmul.f32 %v7365_v39, %v1169_v26  ;;  %v2415_v38 = vsel %vm1318_vm8, %v7366_v30, %v2414_v35  ;;  %v4931_v26 = vmul.f32 %v4447_v42, %v1513_v52  ;;  %v2174_v19 = vrot.slane %v2167_v57, 1 }
 0x10a   : > { %v2430_v18 = vsel %vm1335_vm9, %v7367_v48, %v2429_v29  ;;  %v1202_v41 = vmul.f32 %v7368_v22, %v1148_v17  ;;  %v2182_v3 = vmul.f32 %v1995_v14, %v4308_v24  ;;  %v1598_v35 = vmul.f32 %v1513_v52, %v4337_v45 }
 0x10b   : > { %1278 = vst.msk [vmem:[#allocation2 + $0x100] sm:$0xff] %vm1245_vm7, %v1223_v4  ;;  %v4937_v39 = vmul.f32 %v1513_v52, %v4346_v58  ;;  %v4940_v29 = vmul.f32 %v1513_v52, %v4349_v62  ;;  %v1685_v28 = vmul.f32 %v1513_v52, %v4298_v16  ;;  %v4945_v17 = vmul.f32 %v1513_v52, %v4308_v24 }
 0x10c   : > { %1257 = vst.msk [vmem:[#allocation2 + $0x58] sm:$0xff] %vm1245_vm7, %v1202_v41  ;;  %v2336_v57 = vadd.f32 %v2332_v6, %v2321_v2  ;;  %v2419_v14 = vadd.f32 %v2415_v38, %v4849_v40  ;;  %v2091_v30 = vrot.slane %v2084_v63, 1  ;;  %v4949_v4 = vadd.f32 %v1516_v46, %v4864_v1  ;;  %v2354_v46 = vld [vmem:[#allocation2 + $0xf8] sm:$0xff] }
 0x10d   : > { %v4952_v48 = vmul.f32 %v1513_v52, %v4319_v32  ;;  %v2106_v34 = vrot.slane %v2099_v47, 2  ;;  %v7369_v27 = vrot.slane %v4540_v13, 1  ;;  %v2189_v6 = vrot.slane %v2182_v3, 2 }
 0x10e   : > { %v4961_v40 = vadd.f32 %v1598_v35, %v4782_v8  ;;  %v1691_v63 = vrot.slane %v1685_v28, 1  ;;  %v7370_v38 = vrot.slane %v4505_v54, 1  ;;  %v4972_v41 = vmul.f32 %v2354_v46, %v4346_v58 }
 0x10f   : > { %v2175_v2 = vsel %vm1318_vm8, %v7369_v27, %v2174_v19  ;;  %v4975_v27 = vmul.f32 %v2354_v46, %v4349_v62  ;;  %v4977_v8 = vld [vmem:[#allocation2 + $0x50] sm:$0xff]  ;;  %v957_v19 = vpop.f32.mrf.mxu0  ;;  %v7374_v3 = vrot.slane %v4509_v15, 2  ;;  %v2351_v25 = vadd.f32 %v2347_v9, %v2336_v57 }
 0x110   : > { %v4969_v22 = vsel %vm1318_vm8, %v7370_v38, %v2091_v30  ;;  %7372 = vst [vmem:[#allocation61_spill] sm:$0xff] %v4972_v41  ;;  %v2179_v28 = vadd.f32 %v2175_v2, %v4536_v44  ;;  %v2434_v52 = vadd.f32 %v2430_v18, %v2419_v14  ;;  %v1020_v38 = vpop.f32.mrf.mxu2  ;;  %v7376_v1 = vrot.slane %v4548_v53, 2  ;;  %v4999_v44 = vld [vmem:[%s7146_s2] ss:$0 sm:$0xff] }
 0x111   : > { %7371 = vst [vmem:[#allocation60_spill] sm:$0xff] %v4969_v22  ;;  %v4982_v35 = vsel %vm1335_vm9, %v7374_v3, %v2106_v34  ;;  %v4992_v22 = vadd.f32 %v4806_v51, %v4813_v5  ;;  %v2298_v61 = vadd.f32 %v4748_v36, %v4647_v31  ;;  %v1021_v34 = vadd.f32 %v4999_v44, %v1020_v38  ;;  %v7377_v14 = vld [vmem:[#allocation46_spill] sm:$0xff]  ;;  %v7379_v5 = vld [vmem:[#allocation33_spill] sm:$0xff] }
 0x112   : > { %7373 = vst [vmem:[#allocation62_spill] sm:$0xff] %v4975_v27  ;;  %v4985_v30 = vld [vmem:[#allocation2 + $0x100] sm:$0xff]  ;;  %v2190_v47 = vsel %vm1335_vm9, %v7376_v1, %v2189_v6  ;;  %v2439_v9 = vmul.f32 %v2354_v46, %v4337_v45  ;;  %v1686_v18 = vmul.f32 %v4977_v8, %v4298_v16  ;;  %v958_v57 = vadd.f32 %v4999_v44, %v957_v19  ;;  %v7384_v6 = vld [vmem:[#allocation37_spill] sm:$0xff] }
 0x113   : > { %7375 = vst [vmem:[#allocation63_spill] sm:$0xff] %v4982_v35  ;;  %v7378_v51 = vrot.slane %v7377_v14, 1  ;;  %v7380_v2 = vrot.slane %v7379_v5, 1  ;;  %v2444_v1 = vmul.f32 %v4985_v30, %v4346_v58  ;;  %v2459_v3 = vmul.f32 %v4985_v30, %v4349_v62  ;;  %v7382_v53 = vld [vmem:[#allocation38_spill] sm:$0xff] }
 0x114   : > { %v2194_v38 = vadd.f32 %v2190_v47, %v2179_v28  ;;  %v1692_v35 = vrot.slane %v1686_v18, 1  ;;  %v7381_v15 = vrot.slane %v4700_v33, 2  ;;  %v7383_v5 = vrot.slane %v7382_v53, 2  ;;  %v5110_v19 = vld [vmem:[%s7148_s4] ss:$0 sm:$0xff] }
 0x115   : > { %v1404_v36 = vsel %vm1318_vm8, %v7380_v2, %v7378_v51  ;;  %v2451_v2 = vrot.slane %v2444_v1, 1  ;;  %v2466_v31 = vrot.slane %v2459_v3, 2  ;;  %v1116_v54 = vmax.f32 %v1021_v34, 0.0  ;;  %v7392_v1 = vld [vmem:[#allocation34_spill] sm:$0xff] }
 0x116   : > { %v2308_v51 = vsel %vm1335_vm9, %v7383_v5, %v7381_v15  ;;  %v1409_v13 = vadd.f32 %v1404_v36, %v7384_v6  ;;  %v2441_v50 = vadd.f32 %v2439_v9, %v2434_v52  ;;  %v1693_v20 = vsel %vm1318_vm8, %v1691_v63, %v1692_v35  ;;  %v5039_v52 = vld [vmem:[#allocation2 + $0x58] sm:$0xff] }
 0x117   : > { %v1095_v10 = vmax.f32 %v958_v57, 0.0  ;;  %v7385_v47 = vrot.slane %v4769_v60, 1  ;;  %v7386_v28 = vrot.slane %v7377_v14, 1  ;;  %v2357_v33 = vmul.f32 %v2354_v46, %v4370_v7  ;;  %v7389_v60 = vld [vmem:[#allocation42_spill] sm:$0xff] }
 0x118   : > { %v7387_v53 = vrot.slane %v4972_v41, 1  ;;  %v7388_v34 = vrot.slane %v4975_v27, 2  ;;  %v5041_v63 = vadd.f32 %v2308_v51, %v2298_v61  ;;  %v5044_v9 = vadd.f32 %v7389_v60, %v2194_v38 }
 0x119   : > { %v1406_v18 = vsel %vm1318_vm8, %v7386_v28, %v7385_v47  ;;  %v1701_v57 = vmul.f32 %v4977_v8, %v4308_v24  ;;  %v7391_v6 = vrot.slane %v4758_v0, 2  ;;  %v7393_v3 = vrot.slane %v7392_v1, 2  ;;  %v7394_v47 = vld [vmem:[#allocation47_spill] sm:$0xff] }
 0x11a   : > { %v2452_v15 = vsel %vm1318_vm8, %v7387_v53, %v2451_v2  ;;  %v5037_v36 = vsel %vm1335_vm9, %v7388_v34, %v2466_v31  ;;  %7390 = vst [vmem:[#allocation46_spill] sm:$0xff] %v5044_v9  ;;  %v1170_v31 = vmin.f32 %v1116_v54, 6.0  ;;  %v5056_v28 = vadd.f32 %v1406_v18, %v7394_v47  ;;  %v5121_v9 = vpop.permute.xlu1 %3971 }
 0x11b   : > { %v5048_v14 = vadd.f32 %v2452_v15, %v2441_v50  ;;  %v1420_v5 = vsel %vm1335_vm9, %v7393_v3, %v7391_v6  ;;  %v7395_v61 = vrot.slane %v4773_v37, 2  ;;  %v7396_v38 = vmov %v7391_v6 }
 0x11c   : > { %v1425_v2 = vadd.f32 %v1420_v5, %v1409_v13  ;;  %v5066_v50 = vmul.f32 %v2354_v46, %v4380_v49  ;;  %v1687_v53 = vmul.f32 %v5039_v52, %v4298_v16  ;;  %v1702_v54 = vmul.f32 %v5039_v52, %v4308_v24 }
 0x11d   : > { %v5063_v51 = vsel %vm1335_vm9, %v7396_v38, %v7395_v61  ;;  %v1149_v13 = vmin.f32 %v1095_v10, 6.0  ;;  %v5072_v15 = vadd.f32 %v2357_v33, %v2351_v25  ;;  %v5075_v18 = vmul.f32 %v4447_v42, %v2354_v46  ;;  %v7402_v38 = vld [vmem:[#allocation8_spill] sm:$0xff] }
 0x11e   : > { %7397 = vst [vmem:[#allocation33_spill] sm:$0xff] %v5066_v50  ;;  %v5078_v37 = vmul.f32 %v2354_v46, %v4319_v32  ;;  %v5081_v0 = vmul.f32 %v2354_v46, %v4298_v16  ;;  %v5084_v34 = vmul.f32 %v2354_v46, %v4308_v24  ;;  %v1707_v60 = vrot.slane %v1701_v57, 2  ;;  %v960_v46 = vpop.f32.mrf.mxu0 }
 0x11f   : > { %7398 = vst [vmem:[#allocation38_spill] sm:$0xff] %v5072_v15  ;;  %v1694_v6 = vrot.slane %v1687_v53, 1  ;;  %v1709_v1 = vrot.slane %v1702_v54, 2  ;;  %v1517_v10 = vmul.f32 %v4977_v8, %v4370_v7  ;;  %v5090_v25 = vmul.f32 %v4977_v8, %v4380_v49 }
 0x120   : > { %7399 = vst [vmem:[#allocation37_spill] sm:$0xff] %v5075_v18  ;;  %v5094_v33 = vmul.f32 %v4447_v42, %v4977_v8  ;;  %v1682_v3 = vmul.f32 %v4977_v8, %v4319_v32  ;;  %v1599_v57 = vmul.f32 %v4977_v8, %v4337_v45  ;;  %v1603_v53 = vmul.f32 %v4977_v8, %v4346_v58 }
 0x121   : > { %v1695_v5 = vsel %vm1318_vm8, %v1692_v35, %v1694_v6  ;;  %v1710_v47 = vsel %vm1335_vm9, %v1707_v60, %v1709_v1  ;;  %v2527_v35 = vmul.f32 %v4985_v30, %v4298_v16  ;;  %v5115_v6 = vld [vmem:[#allocation2 + $0xd8] sm:$0xff]  ;;  %v7403_v15 = vunpack.i.l.bf16 %v7402_v38 }
 0x122   : > { %v1699_v54 = vadd.f32 %v1695_v5, %v1682_v3  ;;  %v7400_v1 = vld [vmem:[#allocation17_spill] sm:$0xff]  ;;  %v5124_v3 = vadd.f32 %v1517_v10, %v4992_v22  ;;  %v5130_v23 = vmul.f32 %v4977_v8, %v4349_v62  ;;  %v1601_v27 = vadd.f32 %v1599_v57, %v4887_v21  ;;  %v1023_v57 = vpop.f32.mrf.mxu2 }
 0x123   : > { %v7401_v61 = vunpack.i.h.bf16 %v7400_v1  ;;  %v1203_v50 = vmul.f32 %v7403_v15, %v1149_v13  ;;  %v1698_v13 = vadd.f32 %v1693_v20, %v4952_v48  ;;  %v7405_v22 = vrot.slane %v4945_v17, 2 }
 0x124   : > { %7404 = vst [vmem:[#allocation42_spill] sm:$0xff] %v5124_v3  ;;  %v1609_v10 = vrot.slane %v1603_v53, 1  ;;  %v1430_v8 = vadd.f32 %v5110_v19, %v1425_v2  ;;  %v3974_v21 = vunpack.i.h.bf16 %v5121_v9  ;;  %v2534_v20 = vrot.slane %v2527_v35, 1  ;;  %v7409_v53 = vld [vmem:[#allocation43_spill] sm:$0xff] }
 0x125   : > { %v1224_v18 = vmul.f32 %v7401_v61, %v1170_v31  ;;  %v1604_v31 = vmul.f32 %v5039_v52, %v4346_v58  ;;  %v1708_v15 = vsel %vm1335_vm9, %v7405_v22, %v1707_v60  ;;  %v2322_v61 = vmul.f32 %v5115_v6, %v4346_v58  ;;  %1258 = vst.msk [vmem:[#allocation2 + $0x60] sm:$0xff] %vm1245_vm7, %v1203_v50 }
 0x126   : > { %v2405_v17 = vmul.f32 %v5115_v6, %v4298_v16  ;;  %v5151_v48 = vadd.f32 %v1708_v15, %v1698_v13  ;;  %v5155_v60 = vmul.f32 %v4447_v42, %v4985_v30  ;;  %v2542_v2 = vmul.f32 %v4985_v30, %v4308_v24 }
 0x127   : > { %1279 = vst.msk [vmem:[#allocation2 + $0x108] sm:$0xff] %vm1245_vm7, %v1224_v18  ;;  %v5147_v18 = vmul.f32 %v4985_v30, %v4380_v49  ;;  %v1432_v50 = vmax.f32 %v1430_v8, 0.0  ;;  %v1221_v22 = vmul.f32 %v3974_v21, %v7409_v53  ;;  %v5162_v5 = vmul.f32 %v5039_v52, %v4380_v49 }
 0x128   : > { %7407 = vst [vmem:[#allocation47_spill] sm:$0xff] %v5151_v48  ;;  %v1611_v35 = vrot.slane %v1604_v31, 1  ;;  %v2318_v1 = vmul.f32 %v5115_v6, %v4337_v45  ;;  %v5168_v13 = vadd.f32 %v5037_v36, %v5048_v14  ;;  %v1619_v15 = vmul.f32 %v5039_v52, %v4349_v62 }
 0x129   : > { %7406 = vst [vmem:[#allocation34_spill] sm:$0xff] %v5147_v18  ;;  %v2328_v3 = vrot.slane %v2322_v61, 1  ;;  %v1434_v30 = vmin.f32 %v1432_v50, 6.0  ;;  %v5173_v8 = vadd.f32 %v1710_v47, %v1699_v54  ;;  %v7410_v21 = vrot.slane %v4937_v39, 1 }
 0x12a   : > { %7408 = vst [vmem:[#allocation8_spill] sm:$0xff] %v5155_v60  ;;  %v1624_v53 = vrot.slane %v5130_v23, 2  ;;  %v7411_v41 = vrot.slane %v5081_v0, 1  ;;  %v2411_v14 = vrot.slane %v2405_v17, 1  ;;  %v5186_v50 = vmul.f32 %v4447_v42, %v5039_v52 }
 0x12b   : > { %1276 = vst.msk [vmem:[#allocation2 + $0xf0] sm:$0xff] %vm1245_vm7, %v1221_v22  ;;  %v1610_v31 = vsel %vm1318_vm8, %v7410_v21, %v1609_v10  ;;  %v2337_v39 = vmul.f32 %v5115_v6, %v4349_v62  ;;  %v2549_v47 = vrot.slane %v2542_v2, 2  ;;  %v2320_v54 = vadd.f32 %v2318_v1, %v5041_v63 }
 0x12c   : > { %v2535_v36 = vsel %vm1318_vm8, %v7411_v41, %v2534_v20  ;;  %1436 = vst.msk [vmem:[#allocation3] sm:$0xff] %vm1245_vm7, %v1434_v30  ;;  %v2420_v41 = vmul.f32 %v5115_v6, %v4308_v24  ;;  %v1612_v17 = vsel %vm1318_vm8, %v1609_v10, %v1611_v35  ;;  %v1626_v22 = vrot.slane %v1619_v15, 2  ;;  %v1026_v15 = vpop.f32.mrf.mxu2 }
 0x12d   : > { %v2539_v20 = vadd.f32 %v2535_v36, %v5078_v37  ;;  %v7412_v52 = vrot.slane %v4817_v11, 1  ;;  %v5202_v30 = vmul.f32 %v5115_v6, %v4380_v49  ;;  %v5206_v2 = vmul.f32 %v4447_v42, %v5115_v6  ;;  %v963_v36 = vpop.f32.mrf.mxu0 }
 0x12e   : > { %v7415_v63 = vrot.slane %v4826_v59, 1  ;;  %v1615_v37 = vadd.f32 %v1610_v31, %v4961_v40  ;;  %v2343_v35 = vrot.slane %v2337_v39, 2  ;;  %v2401_v11 = vmul.f32 %v5115_v6, %v4319_v32 }
 0x12f   : > { %v2330_v21 = vsel %vm1318_vm8, %v2328_v3, %v7412_v52  ;;  %7413 = vst [vmem:[#allocation43_spill] sm:$0xff] %v5202_v30  ;;  %v1024_v3 = vadd.f32 %v4999_v44, %v1023_v57  ;;  %v7416_v52 = vrot.slane %v5084_v34, 2  ;;  %v2426_v59 = vrot.slane %v2420_v41, 2 }
 0x130   : > { %7414 = vst [vmem:[#allocation64_spill] sm:$0xff] %v5206_v2  ;;  %v2413_v1 = vsel %vm1318_vm8, %v2411_v14, %v7415_v63  ;;  %v2335_v48 = vadd.f32 %v2330_v21, %v2320_v54  ;;  %v961_v14 = vadd.f32 %v4999_v44, %v960_v46  ;;  %v1616_v63 = vadd.f32 %v1612_v17, %v1601_v27  ;;  %v2473_v46 = vld [vmem:[#allocation2 + $0x108] sm:$0xff]  ;;  %v1053_v27 = vpop.f32.mrf.mxu3 }
 0x131   : > { %v2550_v61 = vsel %vm1335_vm9, %v7416_v52, %v2549_v47  ;;  %v5222_v40 = vmul.f32 %v5115_v6, %v4370_v7  ;;  %v2418_v31 = vadd.f32 %v2413_v1, %v2401_v11  ;;  %v7418_v39 = vrot.slane %v4940_v29, 2 }
 0x132   : > { %v1627_v10 = vsel %vm1335_vm9, %v1624_v53, %v1626_v22  ;;  %v7419_v6 = vrot.slane %v4820_v43, 2  ;;  %v5237_v17 = vld [vmem:[#allocation2 + $0xf0] sm:$0xff]  ;;  %v1117_v21 = vmax.f32 %v1024_v3, 0.0  ;;  %v7421_v22 = vrot.slane %v4928_v12, 1 }
 0x133   : > { %7417 = vst [vmem:[#allocation65_spill] sm:$0xff] %v5222_v40  ;;  %v1625_v57 = vsel %vm1335_vm9, %v7418_v39, %v1624_v53  ;;  %v3238_v41 = vld [vmem:[#allocation3] sm:$0xff]  ;;  %v7420_v53 = vrot.slane %v5090_v25, 1  ;;  %v7422_v11 = vrot.slane %v4829_v55, 2  ;;  %v1096_v39 = vmax.f32 %v961_v14, 0.0  ;;  %v7456_v40 = vld [vmem:[#allocation62_spill] sm:$0xff] }
 0x134   : > { %v5230_v54 = vadd.f32 %v1625_v57, %v1615_v37  ;;  %3744 = vmatmul.msk.f32.vlgmr.msra.gmra.mxu1 %vm1245_vm7, %v3238_v41  ;;  %v2345_v29 = vsel %vm1335_vm9, %v2343_v35, %v7419_v6  ;;  %v1426_v43 = vadd.f32 %v5063_v51, %v5056_v28  ;;  %v5253_v57 = vadd.f32 %v2550_v61, %v2539_v20 }
 0x135   : > { %v1528_v1 = vsel %vm1318_vm8, %v7421_v22, %v7420_v53  ;;  %v5244_v37 = vadd.f32 %v2345_v29, %v2335_v48  ;;  %v2428_v52 = vsel %vm1335_vm9, %v2426_v59, %v7422_v11  ;;  %v5255_v3 = vadd.f32 %v1627_v10, %v1616_v63  ;;  %v7428_v53 = vld [vmem:[#allocation6_spill] sm:$0xff]  ;;  %v1029_v11 = vpop.f32.mrf.mxu2 }
 0x136   : > { %v5251_v35 = vadd.f32 %v2428_v52, %v2418_v31  ;;  %v7423_v12 = vrot.slane %v5094_v33, 2  ;;  %v7424_v41 = vrot.slane %v4931_v26, 2  ;;  %v5265_v55 = vmul.f32 %v2473_v46, %v4370_v7  ;;  %v966_v52 = vpop.f32.mrf.mxu0 }
 0x137   : > { %v5268_v59 = vmul.f32 %v2473_v46, %v4380_v49  ;;  %v2525_v28 = vmul.f32 %v5237_v17, %v4298_v16  ;;  %v5273_v51 = vadd.f32 %v1528_v1, %v4949_v4  ;;  %v5276_v61 = vmul.f32 %v4447_v42, %v2473_v46 }
 0x138   : > { %v5262_v48 = vsel %vm1335_vm9, %v7424_v41, %v7423_v12  ;;  %7425 = vst [vmem:[#allocation66_spill] sm:$0xff] %v5265_v55  ;;  %v2558_v26 = vmul.f32 %v2473_v46, %v4337_v45  ;;  %v2540_v20 = vmul.f32 %v5237_v17, %v4308_v24  ;;  %v1171_v10 = vmin.f32 %v1117_v21, 6.0 }
 0x139   : > { %7426 = vst [vmem:[#allocation67_spill] sm:$0xff] %v5268_v59  ;;  %v2531_v14 = vrot.slane %v2525_v28, 1  ;;  %v1150_v63 = vmin.f32 %v1096_v39, 6.0  ;;  %v1431_v31 = vadd.f32 %v5110_v19, %v1426_v43  ;;  %v1027_v6 = vadd.f32 %v4999_v44, %v1026_v15  ;;  %v7431_v15 = vld [vmem:[#allocation4_spill] sm:$0xff] }
 0x13a   : > { %7427 = vst [vmem:[#allocation68_spill] sm:$0xff] %v5276_v61  ;;  %v5284_v29 = vmul.f32 %v2473_v46, %v4346_v58  ;;  %v2521_v4 = vmul.f32 %v5237_v17, %v4319_v32  ;;  %v2546_v42 = vrot.slane %v2540_v20, 2  ;;  %v7429_v22 = vunpack.i.l.bf16 %v7428_v53 }
 0x13b   : > { %v5291_v21 = vmul.f32 %v2473_v46, %v4349_v62  ;;  %v7430_v39 = vrot.slane %v5081_v0, 1  ;;  %v7432_v12 = vunpack.i.l.bf16 %v7431_v15  ;;  %v1433_v28 = vmax.f32 %v1431_v31, 0.0 }
 0x13c   : > { %v1225_v1 = vmul.f32 %v7429_v22, %v1171_v10  ;;  %v7433_v23 = vrot.slane %v5084_v34, 2  ;;  %v1118_v10 = vmax.f32 %v1027_v6, 0.0  ;;  %v964_v22 = vadd.f32 %v4999_v44, %v963_v36  ;;  %v1633_v36 = vld [vmem:[#allocation2 + $0x60] sm:$0xff] }
 0x13d   : > { %v2533_v43 = vsel %vm1318_vm8, %v2531_v14, %v7430_v39  ;;  %v1204_v41 = vmul.f32 %v7432_v12, %v1150_v63  ;;  %v1435_v0 = vmin.f32 %v1433_v28, 6.0  ;;  %v1030_v14 = vadd.f32 %v4999_v44, %v1029_v11 }
 0x13e   : > { %v2538_v47 = vadd.f32 %v2533_v43, %v2521_v4  ;;  %v2548_v20 = vsel %vm1335_vm9, %v2546_v42, %v7433_v23  ;;  %1280 = vst.msk [vmem:[#allocation2 + $0x110] sm:$0xff] %vm1245_vm7, %v1225_v1  ;;  %v1054_v39 = vadd.f32 %v4999_v44, %v1053_v27  ;;  %v967_v63 = vadd.f32 %v4999_v44, %v966_v52 }
 0x13f   : > { %1259 = vst.msk [vmem:[#allocation2 + $0x68] sm:$0xff] %vm1245_vm7, %v1204_v41  ;;  %v5308_v31 = vmul.f32 %v2473_v46, %v4319_v32  ;;  %v1172_v23 = vmin.f32 %v1118_v10, 6.0  ;;  %v1097_v4 = vmax.f32 %v964_v22, 0.0  ;;  %v5311_v6 = vmul.f32 %v2473_v46, %v4298_v16 }
 0x140   : > { %v2553_v34 = vadd.f32 %v2548_v20, %v2538_v47  ;;  %1437 = vst.msk [vmem:[#allocation3 + $0x8] sm:$0xff] %vm1245_vm7, %v1435_v0  ;;  %v1119_v42 = vmax.f32 %v1030_v14, 0.0  ;;  %v1127_v1 = vmax.f32 %v1054_v39, 0.0  ;;  %v1098_v43 = vmax.f32 %v967_v63, 0.0 }
 0x141   : > { %v7434_v52 = vunpack.i.h.bf16 %v4269_v56  ;;  %v1151_v41 = vmin.f32 %v1097_v4, 6.0  ;;  %v5320_v47 = vmul.f32 %v2473_v46, %v4308_v24  ;;  %v2568_v0 = vrot.slane %v5284_v29, 1  ;;  %v7438_v46 = vld [vmem:[#allocation21_spill] sm:$0xff] }
 0x142   : > { %v5315_v27 = vadd.f32 %v2558_v26, %v2553_v34  ;;  %v1173_v28 = vmin.f32 %v1119_v42, 6.0  ;;  %v1181_v20 = vmin.f32 %v1127_v1, 6.0  ;;  %v1152_v10 = vmin.f32 %v1098_v43, 6.0  ;;  %v7435_v26 = vld [vmem:[#allocation5_spill] sm:$0xff]  ;;  %v7440_v42 = vld [vmem:[#allocation19_spill] sm:$0xff] }
 0x143   : > { %v1226_v12 = vmul.f32 %v7434_v52, %v1172_v23  ;;  %v1636_v14 = vmul.f32 %v1633_v36, %v4370_v7  ;;  %v7436_v39 = vunpack.i.l.bf16 %v7435_v26  ;;  %v5329_v56 = vmul.f32 %v1633_v36, %v4380_v49 }
 0x144   : > { %v7439_v23 = vunpack.i.l.bf16 %v7438_v46  ;;  %v7441_v1 = vunpack.i.h.bf16 %v7440_v42  ;;  %v7442_v29 = vunpack.i.h.bf16 %v7402_v38  ;;  %v5365_v42 = vmul.f32 %v1633_v36, %v4346_v58 }
 0x145   : > { %1281 = vst.msk [vmem:[#allocation2 + $0x118] sm:$0xff] %vm1245_vm7, %v1226_v12  ;;  %v1205_v63 = vmul.f32 %v7436_v39, %v1151_v41  ;;  %v5331_v34 = vld [vmem:[#allocation2 + $0x110] sm:$0xff]  ;;  %v2442_v41 = vmul.f32 %v5237_v17, %v4346_v58  ;;  %v2356_v55 = vmul.f32 %v5237_v17, %v4370_v7  ;;  %v7450_v12 = vld [vmem:[#allocation61_spill] sm:$0xff]  ;;  %v7457_v18 = vrot.slane %v7456_v40, 2 }
 0x146   : > { %7437 = vst [vmem:[#allocation6_spill] sm:$0xff] %v5329_v56  ;;  %v1227_v4 = vmul.f32 %v7439_v23, %v1173_v28  ;;  %v1235_v43 = vmul.f32 %v7441_v1, %v1181_v20  ;;  %v1206_v52 = vmul.f32 %v7442_v29, %v1152_v10  ;;  %v2477_v39 = vmul.f32 %v5331_v34, %v4370_v7  ;;  %v5350_v20 = vld [vmem:[%s7147_s3 + $0x8] ss:$0 sm:$0xff] }
 0x147   : > { %1260 = vst.msk [vmem:[#allocation2 + $0x70] sm:$0xff] %vm1245_vm7, %v1205_v63  ;;  %v5353_v38 = vmul.f32 %v5350_v20, %v1633_v36  ;;  %v1718_v10 = vmul.f32 %v1633_v36, %v4337_v45  ;;  %v5358_v23 = vmul.f32 %v5331_v34, %v4346_v58  ;;  %v5362_v63 = vadd.f32 %v1636_v14, %v5230_v54  ;;  %v3239_v11 = vld [vmem:[#allocation3 + $0x8] sm:$0xff]  ;;  %v5386_v22 = vld [vmem:[#allocation2 + $0x68] sm:$0xff] }
 0x148   : > { %1282 = vst.msk [vmem:[#allocation2 + $0x120] sm:$0xff] %vm1245_vm7, %v1227_v4  ;;  %v5368_v1 = vmul.f32 %v1633_v36, %v4349_v62  ;;  %v5371_v29 = vadd.f32 %v2477_v39, %v5168_v13  ;;  %v2438_v4 = vmul.f32 %v5237_v17, %v4337_v45  ;;  %v2457_v54 = vmul.f32 %v5237_v17, %v4349_v62 }
 0x149   : > { %7443 = vst [vmem:[#allocation4_spill] sm:$0xff] %v5353_v38  ;;  %v7212_v14 = vrot.slane %v5358_v23, 1  ;;  %3745 = vmatmul.msk.f32.gmra.mxu1 %vm1245_vm7, %v3239_v11  ;;  %v5383_v13 = vmul.f32 %v1633_v36, %v4319_v32  ;;  %v1805_v39 = vmul.f32 %v1633_v36, %v4298_v16  ;;  %v1548_v28 = vadd.f32 %v5262_v48, %v5273_v51 }
 0x14a   : > { %7444 = vst [vmem:[#allocation5_spill] sm:$0xff] %v5362_v63  ;;  %v5395_v11 = vmul.f32 %v1633_v36, %v4308_v24  ;;  %v5406_v48 = vmul.f32 %v5237_v17, %v4380_v49  ;;  %v5410_v51 = vmul.f32 %v5350_v20, %v5237_v17  ;;  %v2440_v36 = vadd.f32 %v2438_v4, %v5251_v35 }
 0x14b   : > { %7445 = vst [vmem:[#allocation19_spill] sm:$0xff] %v5368_v1  ;;  %v5423_v60 = vadd.f32 %v5110_v19, %v1548_v28  ;;  %v5427_v17 = vmul.f32 %v5331_v34, %v4380_v49  ;;  %v5431_v35 = vmul.f32 %v5350_v20, %v5331_v34  ;;  %v7460_v40 = vrot.slane %v5090_v25, 1  ;;  %v1032_v1 = vpop.f32.mrf.mxu2 }
 0x14c   : > { %7446 = vst [vmem:[#allocation69_spill] sm:$0xff] %v5371_v29  ;;  %v7447_v29 = vld [vmem:[#allocation47_spill] sm:$0xff]  ;;  %v2475_v28 = vld [vmem:[#allocation2 + $0x118] sm:$0xff]  ;;  %v1637_v25 = vmul.f32 %v5386_v22, %v4370_v7  ;;  %v7463_v46 = vrot.slane %v5291_v21, 2 }
 0x14d   : > { %1290 = vst.msk [vmem:[#allocation2 + $0x160] sm:$0xff] %vm1245_vm7, %v1235_v43  ;;  %v2448_v43 = vrot.slane %v2442_v41, 1  ;;  %v5392_v61 = vadd.f32 %v1718_v10, %v7447_v29  ;;  %v2463_v10 = vrot.slane %v2457_v54, 2  ;;  %v1811_v29 = vrot.slane %v1805_v39, 1 }
 0x14e   : > { %1261 = vst.msk [vmem:[#allocation2 + $0x78] sm:$0xff] %vm1245_vm7, %v1206_v52  ;;  %v2570_v52 = vsel %vm1318_vm8, %v2568_v0, %v7212_v14  ;;  %v1806_v0 = vmul.f32 %v5386_v22, %v4298_v16  ;;  %v7451_v41 = vrot.slane %v7450_v12, 1  ;;  %v5420_v14 = vmul.f32 %v5331_v34, %v4298_v16  ;;  %v1635_v54 = vld [vmem:[#allocation2 + $0x70] sm:$0xff] }
 0x14f   : > { %7448 = vst [vmem:[#allocation47_spill] sm:$0xff] %v5406_v48  ;;  %v5435_v12 = vmul.f32 %v5331_v34, %v4349_v62  ;;  %v5439_v39 = vadd.f32 %v2356_v55, %v5244_v37  ;;  %v5450_v30 = vsel %vm1335_vm9, %v2463_v10, %v7457_v18  ;;  %v5457_v37 = vmul.f32 %v5331_v34, %v4319_v32 }
 0x150   : > { %7449 = vst [vmem:[#allocation70_spill] sm:$0xff] %v5410_v51  ;;  %v2450_v59 = vsel %vm1318_vm8, %v2448_v43, %v7451_v41  ;;  %v1812_v4 = vrot.slane %v1806_v0, 1  ;;  %v2559_v43 = vmul.f32 %v5331_v34, %v4337_v45  ;;  %v5473_v55 = vmul.f32 %v5386_v22, %v4308_v24 }
 0x151   : > { %7452 = vst [vmem:[#allocation61_spill] sm:$0xff] %v5427_v17  ;;  %v5445_v2 = vadd.f32 %v2450_v59, %v2440_v36  ;;  %v7459_v59 = vrot.slane %v5162_v5, 1  ;;  %v5478_v5 = vmul.f32 %v5331_v34, %v4308_v24  ;;  %v1807_v10 = vmul.f32 %v1635_v54, %v4298_v16 }
 0x152   : > { %7453 = vst [vmem:[#allocation71_spill] sm:$0xff] %v5431_v35  ;;  %v5453_v0 = vsel %vm1318_vm8, %v1811_v29, %v1812_v4  ;;  %v2584_v29 = vrot.slane %v5435_v12, 2  ;;  %v5488_v12 = vmul.f32 %v5350_v20, %v5386_v22  ;;  %v7461_v34 = vrot.slane %v5420_v14, 1 }
 0x153   : > { %7454 = vst [vmem:[#allocation72_spill] sm:$0xff] %v5439_v39  ;;  %v5466_v18 = vsel %vm1318_vm8, %v7460_v40, %v7459_v59  ;;  %v5484_v59 = vmul.f32 %v5386_v22, %v4380_v49  ;;  %v2564_v40 = vmul.f32 %v2475_v28, %v4346_v58  ;;  %v7462_v36 = vrot.slane %v5311_v6, 1 }
 0x154   : > { %7455 = vst [vmem:[#allocation73_spill] sm:$0xff] %v5445_v2  ;;  %v1719_v35 = vmul.f32 %v5386_v22, %v4337_v45  ;;  %v1723_v17 = vmul.f32 %v5386_v22, %v4346_v58  ;;  %v2575_v2 = vadd.f32 %v2570_v52, %v5315_v27  ;;  %v1827_v51 = vrot.slane %v5473_v55, 2 }
 0x155   : > { %7458 = vst [vmem:[#allocation62_spill] sm:$0xff] %v5450_v30  ;;  %v2561_v30 = vadd.f32 %v2559_v43, %v5253_v57  ;;  %v1822_v57 = vmul.f32 %v1635_v54, %v4308_v24  ;;  %v5493_v43 = vld [vmem:[#allocation2 + $0x120] sm:$0xff]  ;;  %v2653_v41 = vsel %vm1318_vm8, %v7462_v36, %v7461_v34  ;;  %v1814_v39 = vrot.slane %v1807_v10, 1 }
 0x156   : > { %v2585_v38 = vsel %vm1335_vm9, %v7463_v46, %v2584_v29  ;;  %v1802_v6 = vmul.f32 %v5386_v22, %v4319_v32  ;;  %v2579_v36 = vmul.f32 %v2475_v28, %v4349_v62  ;;  %v2596_v63 = vmul.f32 %v5493_v43, %v4370_v7 }
 0x157   : > { %v1829_v48 = vrot.slane %v1822_v57, 2  ;;  %v2590_v34 = vadd.f32 %v2585_v38, %v2575_v2  ;;  %v2571_v56 = vrot.slane %v2564_v40, 1  ;;  %v2647_v27 = vmul.f32 %v2475_v28, %v4298_v16  ;;  %v969_v2 = vpop.f32.mrf.mxu0 }
 0x158   : > { %v1815_v52 = vsel %vm1318_vm8, %v1812_v4, %v1814_v39  ;;  %v2667_v21 = vrot.slane %v5478_v5, 2  ;;  %v1724_v46 = vmul.f32 %v1635_v54, %v4346_v58  ;;  %v5526_v38 = vadd.f32 %v1637_v25, %v5255_v3 }
 0x159   : > { %v5517_v55 = vsel %vm1335_vm9, %v1827_v51, %v1829_v48  ;;  %v5521_v10 = vadd.f32 %v1815_v52, %v1802_v6  ;;  %v5523_v57 = vadd.f32 %v2596_v63, %v2590_v34  ;;  %v1729_v7 = vrot.slane %v1723_v17, 1 }
 0x15a   : > { %v5531_v4 = vmul.f32 %v5386_v22, %v4349_v62  ;;  %v2586_v39 = vrot.slane %v2579_v36, 2  ;;  %v2662_v5 = vmul.f32 %v2475_v28, %v4308_v24  ;;  %v5536_v6 = vmul.f32 %v1635_v54, %v4380_v49 }
 0x15b   : > { %7464 = vst [vmem:[#allocation74_spill] sm:$0xff] %v5523_v57  ;;  %v7465_v63 = vrot.slane %v5358_v23, 1  ;;  %v2654_v25 = vrot.slane %v2647_v27, 1  ;;  %v5542_v34 = vmul.f32 %v5350_v20, %v1635_v54  ;;  %v1739_v17 = vmul.f32 %v1635_v54, %v4349_v62 }
 0x15c   : > { %v1721_v22 = vadd.f32 %v1719_v35, %v5173_v8  ;;  %v5547_v52 = vmul.f32 %v2475_v28, %v4380_v49  ;;  %v1731_v36 = vrot.slane %v1724_v46, 1  ;;  %v2658_v48 = vadd.f32 %v2653_v41, %v5308_v31  ;;  %v1056_v35 = vpop.f32.mrf.mxu3 }
 0x15d   : > { %v2572_v3 = vsel %vm1318_vm8, %v7465_v63, %v2571_v56  ;;  %v7467_v40 = vrot.slane %v5365_v42, 1  ;;  %v5557_v27 = vmul.f32 %v5350_v20, %v2475_v28  ;;  %v7469_v54 = vrot.slane %v5320_v47, 2 }
 0x15e   : > { %7466 = vst [vmem:[#allocation75_spill] sm:$0xff] %v5547_v52  ;;  %v5562_v63 = vadd.f32 %v2572_v3, %v2561_v30  ;;  %v5565_v46 = vsel %vm1335_vm9, %v2584_v29, %v2586_v39  ;;  %v2669_v31 = vrot.slane %v2662_v5, 2  ;;  %v7470_v41 = vrot.slane %v5420_v14, 1  ;;  %v1035_v39 = vpop.f32.mrf.mxu2 }
 0x15f   : > { %v5553_v23 = vsel %vm1318_vm8, %v7467_v40, %v1729_v7  ;;  %7468 = vst [vmem:[#allocation76_spill] sm:$0xff] %v5557_v27  ;;  %v2668_v8 = vsel %vm1335_vm9, %v7469_v54, %v2667_v21  ;;  %v1746_v56 = vrot.slane %v1739_v17, 2  ;;  %v2678_v47 = vmul.f32 %v5493_v43, %v4337_v45  ;;  %v5574_v54 = vld [vmem:[#allocation2 + $0x160] sm:$0xff] }
 0x160   : > { %v2655_v40 = vsel %vm1318_vm8, %v7470_v41, %v2654_v25  ;;  %v1732_v30 = vsel %vm1318_vm8, %v1729_v7, %v1731_v36  ;;  %v2673_v3 = vadd.f32 %v2668_v8, %v2658_v48  ;;  %v5579_v29 = vmul.f32 %v5493_v43, %v4346_v58  ;;  %v972_v41 = vpop.f32.mrf.mxu0 }
 0x161   : > { %v1818_v14 = vadd.f32 %v5453_v0, %v5383_v13  ;;  %v5585_v5 = vmul.f32 %v5493_v43, %v4349_v62  ;;  %v5589_v25 = vmul.f32 %v5493_v43, %v4298_v16  ;;  %v5593_v7 = vmul.f32 %v5493_v43, %v4308_v24 }
 0x162   : > { %v7471_v48 = vrot.slane %v5395_v11, 2  ;;  %v5599_v36 = vadd.f32 %v2655_v40, %v5457_v37  ;;  %v5602_v13 = vsel %vm1335_vm9, %v2667_v21, %v2669_v31  ;;  %v5606_v0 = vmul.f32 %v5574_v54, %v4380_v49 }
 0x163   : > { %v5610_v28 = vadd.f32 %v1732_v30, %v1721_v22  ;;  %v7473_v42 = vrot.slane %v5531_v4, 2  ;;  %v5621_v37 = vmul.f32 %v5493_v43, %v4319_v32  ;;  %v5626_v31 = vmul.f32 %v5350_v20, %v5574_v54 }
 0x164   : > { %v1828_v17 = vsel %vm1335_vm9, %v7471_v48, %v1827_v51  ;;  %7472 = vst [vmem:[#allocation77_spill] sm:$0xff] %v5606_v0  ;;  %v5617_v51 = vadd.f32 %v2678_v47, %v2673_v3  ;;  %v7475_v22 = vmax.f32 %v5423_v60, 0.0  ;;  %v1033_v30 = vadd.f32 %v4999_v44, %v1032_v1 }
 0x165   : > { %v5608_v8 = vadd.f32 %v1828_v17, %v1818_v14  ;;  %v5615_v11 = vsel %vm1335_vm9, %v7473_v42, %v1746_v56  ;;  %7474 = vst [vmem:[#allocation78_spill] sm:$0xff] %v5626_v31  ;;  %v5636_v43 = vmul.f32 %v5574_v54, %v4346_v58  ;;  %v1057_v60 = vadd.f32 %v4999_v44, %v1056_v35  ;;  %v7477_v17 = vld [vmem:[#allocation42_spill] sm:$0xff] }
 0x166   : > { %v1554_v40 = vmin.f32 %v7475_v22, 6.0  ;;  %v1120_v14 = vmax.f32 %v1033_v30, 0.0  ;;  %v970_v48 = vadd.f32 %v4999_v44, %v969_v2  ;;  %v5644_v1 = vadd.f32 %v5517_v55, %v5521_v10  ;;  %v1059_v30 = vpop.f32.mrf.mxu3  ;;  %v1038_v57 = vpop.f32.mrf.mxu2 }
 0x167   : > { %7476 = vst [vmem:[#allocation79_spill] sm:$0xff] %v5636_v43  ;;  %v1534_v22 = vadd.f32 %v5466_v18, %v7477_v17  ;;  %v7478_v47 = vrot.slane %v5186_v50, 2  ;;  %v7479_v56 = vrot.slane %v5094_v33, 2  ;;  %v1128_v35 = vmax.f32 %v1057_v60, 0.0 }
 0x168   : > { %1556 = vst.msk [vmem:[#allocation3 + $0x10] sm:$0xff] %vm1245_vm7, %v1554_v40  ;;  %v1036_v40 = vadd.f32 %v4999_v44, %v1035_v39  ;;  %v1174_v42 = vmin.f32 %v1120_v14, 6.0  ;;  %v1099_v21 = vmax.f32 %v970_v48, 0.0  ;;  %v1060_v2 = vadd.f32 %v4999_v44, %v1059_v30  ;;  %v975_v39 = vpop.f32.mrf.mxu0  ;;  %v7483_v30 = vld [vmem:[#allocation7_spill] sm:$0xff] }
 0x169   : > { %v1545_v3 = vsel %vm1335_vm9, %v7479_v56, %v7478_v47  ;;  %v973_v27 = vadd.f32 %v4999_v44, %v972_v41  ;;  %v1039_v18 = vadd.f32 %v4999_v44, %v1038_v57  ;;  %v7480_v50 = vunpack.i.h.bf16 %v7428_v53 }
 0x16a   : > { %v1549_v55 = vadd.f32 %v1545_v3, %v1534_v22  ;;  %v1121_v10 = vmax.f32 %v1036_v40, 0.0  ;;  %v1182_v17 = vmin.f32 %v1128_v35, 6.0  ;;  %v1153_v56 = vmin.f32 %v1099_v21, 6.0 }
 0x16b   : > { %v1228_v33 = vmul.f32 %v7480_v50, %v1174_v42  ;;  %v1129_v47 = vmax.f32 %v1060_v2, 0.0  ;;  %v1100_v48 = vmax.f32 %v973_v27, 0.0  ;;  %v1122_v52 = vmax.f32 %v1039_v18, 0.0 }
 0x16c   : > { %v1551_v14 = vadd.f32 %v5110_v19, %v1549_v55  ;;  %v1175_v60 = vmin.f32 %v1121_v10, 6.0  ;;  %v7481_v3 = vunpack.i.l.bf16 %v5121_v9  ;;  %v7482_v41 = vunpack.i.h.bf16 %v7431_v15  ;;  %v1753_v9 = vld [vmem:[#allocation2 + $0x78] sm:$0xff]  ;;  %v7486_v15 = vld [vmem:[#allocation26_spill] sm:$0xff] }
 0x16d   : > { %1283 = vst.msk [vmem:[#allocation2 + $0x128] sm:$0xff] %vm1245_vm7, %v1228_v33  ;;  %v1183_v40 = vmin.f32 %v1129_v47, 6.0  ;;  %v976_v53 = vadd.f32 %v4999_v44, %v975_v39  ;;  %v7484_v35 = vunpack.i.h.bf16 %v7483_v30  ;;  %v1154_v55 = vmin.f32 %v1100_v48, 6.0 }
 0x16e   : > { %v1236_v22 = vmul.f32 %v7481_v3, %v1182_v17  ;;  %v1207_v57 = vmul.f32 %v7482_v41, %v1153_v56  ;;  %v1553_v21 = vmax.f32 %v1551_v14, 0.0  ;;  %v1176_v10 = vmin.f32 %v1122_v52, 6.0  ;;  %v7490_v14 = vld [vmem:[#allocation6_spill] sm:$0xff] }
 0x16f   : > { %v3240_v42 = vld [vmem:[#allocation3 + $0x10] sm:$0xff]  ;;  %v1229_v2 = vmul.f32 %v7484_v35, %v1175_v60  ;;  %v5671_v18 = vmul.f32 %v5574_v54, %v4349_v62  ;;  %v7487_v44 = vunpack.i.h.bf16 %v7486_v15  ;;  %v1101_v33 = vmax.f32 %v976_v53, 0.0  ;;  %v7500_v35 = vld [vmem:[#allocation19_spill] sm:$0xff]  ;;  %v7502_v15 = vld [vmem:[#allocation17_spill] sm:$0xff] }
 0x170   : > { %3746 = vmatmul.msk.f32.gmra.mxu1 %vm1245_vm7, %v3240_v42  ;;  %1291 = vst.msk [vmem:[#allocation2 + $0x168] sm:$0xff] %vm1245_vm7, %v1236_v22  ;;  %v1735_v17 = vadd.f32 %v5553_v23, %v5392_v61  ;;  %v1555_v52 = vmin.f32 %v1553_v21, 6.0  ;;  %v7488_v56 = vunpack.i.h.bf16 %v7435_v26  ;;  %v7489_v39 = vrot.slane %v5484_v59, 1  ;;  %v7494_v61 = vld [vmem:[#allocation13_spill] sm:$0xff] }
 0x171   : > { %7485 = vst [vmem:[#allocation42_spill] sm:$0xff] %v5671_v18  ;;  %v1237_v50 = vmul.f32 %v7487_v44, %v1183_v40  ;;  %v7491_v60 = vrot.slane %v7490_v14, 1  ;;  %v5689_v3 = vmul.f32 %v5574_v54, %v4298_v16  ;;  %v5693_v22 = vmul.f32 %v5574_v54, %v4308_v24  ;;  %v7496_v40 = vld [vmem:[#allocation15_spill] sm:$0xff] }
 0x172   : > { %1262 = vst.msk [vmem:[#allocation2 + $0x80] sm:$0xff] %vm1245_vm7, %v1207_v57  ;;  %v1208_v47 = vmul.f32 %v7488_v56, %v1154_v55  ;;  %v7495_v23 = vunpack.i.l.bf16 %v7494_v61  ;;  %v1155_v41 = vmin.f32 %v1101_v33, 6.0  ;;  %v1756_v53 = vmul.f32 %v1753_v9, %v7496_v40  ;;  %v7504_v56 = vld [vmem:[#allocation5_spill] sm:$0xff] }
 0x173   : > { %v1648_v48 = vsel %vm1318_vm8, %v7491_v60, %v7489_v39  ;;  %7492 = vst [vmem:[#allocation26_spill] sm:$0xff] %v5689_v3  ;;  %v5701_v42 = vmul.f32 %v1753_v9, %v4380_v49  ;;  %v5704_v21 = vmul.f32 %v5350_v20, %v1753_v9  ;;  %v7499_v54 = vrot.slane %v5531_v4, 2 }
 0x174   : > { %7493 = vst [vmem:[#allocation6_spill] sm:$0xff] %v5693_v22  ;;  %v1230_v26 = vmul.f32 %v7495_v23, %v1176_v10  ;;  %v5713_v10 = vmul.f32 %v1753_v9, %v4346_v58  ;;  %v7503_v44 = vunpack.i.l.bf16 %v7502_v15  ;;  %v1653_v39 = vadd.f32 %v1648_v48, %v7504_v56  ;;  %v2594_v61 = vld [vmem:[#allocation2 + $0x128] sm:$0xff] }
 0x175   : > { %1284 = vst.msk [vmem:[#allocation2 + $0x130] sm:$0xff] %vm1245_vm7, %v1229_v2  ;;  %v7501_v2 = vrot.slane %v7500_v35, 2  ;;  %v1838_v60 = vmul.f32 %v1753_v9, %v4337_v45  ;;  %v5724_v4 = vmul.f32 %v1753_v9, %v4298_v16  ;;  %v5731_v48 = vmul.f32 %v1753_v9, %v4308_v24 }
 0x176   : > { %7497 = vst [vmem:[#allocation13_spill] sm:$0xff] %v5701_v42  ;;  %v1209_v33 = vmul.f32 %v7503_v44, %v1155_v41  ;;  %v5746_v56 = vmul.f32 %v2594_v61, %v4346_v58  ;;  %v5756_v27 = vmul.f32 %v1753_v9, %v4319_v32  ;;  %v5762_v23 = vmul.f32 %v2594_v61, %v4380_v49  ;;  %v1041_v42 = vpop.f32.mrf.mxu2 }
 0x177   : > { %7498 = vst [vmem:[#allocation15_spill] sm:$0xff] %v5704_v21  ;;  %v1745_v55 = vsel %vm1335_vm9, %v7501_v2, %v7499_v54  ;;  %v7507_v2 = vld [vmem:[#allocation4_spill] sm:$0xff]  ;;  %v5765_v41 = vmul.f32 %v5350_v20, %v2594_v61  ;;  %v2953_v35 = vld [vmem:[#allocation2 + $0x168] sm:$0xff]  ;;  %v1751_v54 = vadd.f32 %v5615_v11, %v5610_v28  ;;  %v7518_v28 = vrot.slane %v5589_v25, 1 }
 0x178   : > { %1557 = vst.msk [vmem:[#allocation3 + $0x18] sm:$0xff] %vm1245_vm7, %v1555_v52  ;;  %v1750_v14 = vadd.f32 %v1745_v55, %v1735_v17  ;;  %v5721_v52 = vmul.f32 %v1753_v9, %v4349_v62  ;;  %v7508_v55 = vrot.slane %v7507_v2, 2  ;;  %v2674_v9 = vadd.f32 %v5602_v13, %v5599_v36 }
 0x179   : > { %1292 = vst.msk [vmem:[#allocation2 + $0x170] sm:$0xff] %vm1245_vm7, %v1237_v50  ;;  %v2689_v57 = vrot.slane %v5746_v56, 1  ;;  %v5787_v36 = vmul.f32 %v2594_v61, %v4308_v24  ;;  %v5790_v13 = vmul.f32 %v2953_v35, %v4380_v49  ;;  %v5793_v56 = vmul.f32 %v5350_v20, %v2953_v35  ;;  %v1754_v11 = vld [vmem:[#allocation2 + $0x80] sm:$0xff] }
 0x17a   : > { %1263 = vst.msk [vmem:[#allocation2 + $0x88] sm:$0xff] %vm1245_vm7, %v1208_v47  ;;  %v5734_v17 = vadd.f32 %v1756_v53, %v1750_v14  ;;  %v7506_v47 = vrot.slane %v5488_v12, 2  ;;  %v5752_v14 = vadd.f32 %v1838_v60, %v5608_v8  ;;  %v2591_v8 = vadd.f32 %v5565_v46, %v5562_v63 }
 0x17b   : > { %1285 = vst.msk [vmem:[#allocation2 + $0x138] sm:$0xff] %vm1245_vm7, %v1230_v26  ;;  %v5749_v26 = vmul.f32 %v2594_v61, %v4298_v16  ;;  %v2679_v60 = vmul.f32 %v2594_v61, %v4337_v45  ;;  %v5784_v46 = vmul.f32 %v2594_v61, %v4319_v32  ;;  %v5807_v2 = vmul.f32 %v2953_v35, %v4337_v45 }
 0x17c   : > { %7505 = vst [vmem:[#allocation19_spill] sm:$0xff] %v5734_v17  ;;  %v1663_v15 = vsel %vm1335_vm9, %v7508_v55, %v7506_v47  ;;  %v2597_v55 = vmul.f32 %v2594_v61, %v7496_v40  ;;  %v2595_v44 = vld [vmem:[#allocation2 + $0x130] sm:$0xff]  ;;  %v5825_v47 = vmul.f32 %v2953_v35, %v4298_v16  ;;  %v5842_v0 = vmul.f32 %v2953_v35, %v4308_v24 }
 0x17d   : > { %1264 = vst.msk [vmem:[#allocation2 + $0x90] sm:$0xff] %vm1245_vm7, %v1209_v33  ;;  %v1668_v53 = vadd.f32 %v1663_v15, %v1653_v39  ;;  %v5773_v15 = vmul.f32 %v2594_v61, %v4349_v62  ;;  %v7228_v50 = vrot.slane %v5749_v26, 1  ;;  %v5804_v33 = vmul.f32 %v2953_v35, %v7496_v40 }
 0x17e   : > { %7509 = vst [vmem:[#allocation17_spill] sm:$0xff] %v5762_v23  ;;  %v2684_v31 = vmul.f32 %v2595_v44, %v4346_v58  ;;  %v5849_v61 = vmul.f32 %v5350_v20, %v1754_v11  ;;  %v2767_v43 = vmul.f32 %v2595_v44, %v4298_v16  ;;  %v5865_v25 = vmul.f32 %v2595_v44, %v4380_v49 }
 0x17f   : > { %7510 = vst [vmem:[#allocation5_spill] sm:$0xff] %v5765_v41  ;;  %v3241_v39 = vld [vmem:[#allocation3 + $0x18] sm:$0xff]  ;;  %v5781_v63 = vadd.f32 %v5110_v19, %v1668_v53  ;;  %v5800_v19 = vmul.f32 %v2953_v35, %v4346_v58  ;;  %v2681_v53 = vadd.f32 %v2679_v60, %v2674_v9  ;;  %v5819_v9 = vsel %vm1318_vm8, %v7518_v28, %v7228_v50 }
 0x180   : > { %3747 = vmatmul.msk.f32.gmra.mxu1 %vm1245_vm7, %v3241_v39  ;;  %7511 = vst [vmem:[#allocation4_spill] sm:$0xff] %v5790_v13  ;;  %v5795_v39 = vadd.f32 %v2597_v55, %v2591_v8  ;;  %v7517_v55 = vrot.slane %v5579_v29, 1  ;;  %v5822_v60 = vmul.f32 %v2953_v35, %v4349_v62  ;;  %v5835_v28 = vmul.f32 %v2953_v35, %v4319_v32 }
 0x181   : > { %7512 = vst [vmem:[#allocation80_spill] sm:$0xff] %v5793_v56  ;;  %v5838_v50 = vmul.f32 %v1754_v11, %v4298_v16  ;;  %v1757_v29 = vmul.f32 %v1754_v11, %v7496_v40  ;;  %v1839_v13 = vmul.f32 %v1754_v11, %v4337_v45  ;;  %v5857_v35 = vmul.f32 %v1754_v11, %v4349_v62  ;;  %v1755_v21 = vld [vmem:[#allocation2 + $0x88] sm:$0xff] }
 0x182   : > { %7513 = vst [vmem:[#allocation81_spill] sm:$0xff] %v5795_v39  ;;  %v5812_v8 = vsel %vm1318_vm8, %v7517_v55, %v2689_v57  ;;  %v5846_v55 = vmul.f32 %v1754_v11, %v4380_v49  ;;  %v2691_v22 = vrot.slane %v2684_v31, 1  ;;  %v5868_v56 = vmul.f32 %v5350_v20, %v2595_v44 }
 0x183   : > { %7514 = vst [vmem:[#allocation82_spill] sm:$0xff] %v5800_v19  ;;  %v1932_v3 = vrot.slane %v5838_v50, 1  ;;  %v5876_v19 = vadd.f32 %v1839_v13, %v5644_v1  ;;  %v5879_v50 = vmul.f32 %v1754_v11, %v4319_v32  ;;  %v2782_v39 = vmul.f32 %v2595_v44, %v4308_v24 }
 0x184   : > { %7515 = vst [vmem:[#allocation83_spill] sm:$0xff] %v5804_v33  ;;  %v5831_v33 = vmul.f32 %v1754_v11, %v4346_v58  ;;  %v7528_v23 = vrot.slane %v5713_v10, 1  ;;  %v2774_v31 = vrot.slane %v2767_v43, 1  ;;  %v7529_v1 = vrot.slane %v5724_v4, 1  ;;  %v2954_v10 = vld [vmem:[#allocation2 + $0x170] sm:$0xff] }
 0x185   : > { %7516 = vst [vmem:[#allocation84_spill] sm:$0xff] %v5807_v2  ;;  %v2699_v2 = vmul.f32 %v2595_v44, %v4349_v62  ;;  %v5904_v43 = vmul.f32 %v5350_v20, %v2954_v10  ;;  %v7533_v4 = vrot.slane %v5773_v15, 2  ;;  %v1927_v44 = vmul.f32 %v1755_v21, %v4298_v16 }
 0x186   : > { %7519 = vst [vmem:[#allocation85_spill] sm:$0xff] %v5822_v60  ;;  %v1849_v18 = vrot.slane %v5831_v33, 1  ;;  %v5871_v33 = vadd.f32 %v1757_v29, %v1751_v54  ;;  %v2692_v29 = vsel %vm1318_vm8, %v2689_v57, %v2691_v22  ;;  %v5892_v13 = vsel %vm1318_vm8, %v7529_v1, %v1932_v3 }
 0x187   : > { %7520 = vst [vmem:[#allocation86_spill] sm:$0xff] %v5825_v47  ;;  %v2706_v41 = vrot.slane %v2699_v2, 2  ;;  %v5901_v60 = vmul.f32 %v2954_v10, %v4380_v49  ;;  %v1844_v22 = vmul.f32 %v1755_v21, %v4346_v58  ;;  %v5907_v57 = vadd.f32 %v2692_v29, %v2681_v53 }
 0x188   : > { %7521 = vst [vmem:[#allocation87_spill] sm:$0xff] %v5835_v28  ;;  %v5862_v28 = vmul.f32 %v1754_v11, %v4308_v24  ;;  %v5885_v47 = vsel %vm1318_vm8, %v7528_v23, %v1849_v18  ;;  %v5898_v23 = vmul.f32 %v2954_v10, %v7496_v40  ;;  %v2789_v11 = vrot.slane %v2782_v39, 2 }
 0x189   : > { %7522 = vst [vmem:[#allocation88_spill] sm:$0xff] %v5842_v0  ;;  %v5912_v1 = vsel %vm1335_vm9, %v7533_v4, %v2706_v41  ;;  %v7534_v2 = vrot.slane %v5749_v26, 1  ;;  %v5922_v0 = vmul.f32 %v2954_v10, %v4349_v62  ;;  %v1859_v53 = vmul.f32 %v1755_v21, %v4349_v62 }
 0x18a   : > { %7523 = vst [vmem:[#allocation89_spill] sm:$0xff] %v5846_v55  ;;  %v5926_v29 = vmul.f32 %v2954_v10, %v4298_v16  ;;  %v5929_v41 = vmul.f32 %v2954_v10, %v4308_v24  ;;  %v5932_v39 = vmul.f32 %v1755_v21, %v4380_v49  ;;  %v5935_v26 = vmul.f32 %v5350_v20, %v1755_v21 }
 0x18b   : > { %7524 = vst [vmem:[#allocation90_spill] sm:$0xff] %v5849_v61  ;;  %v2775_v54 = vsel %vm1318_vm8, %v7534_v2, %v2774_v31  ;;  %v5939_v2 = vmul.f32 %v2954_v10, %v4337_v45  ;;  %v1851_v4 = vrot.slane %v1844_v22, 1  ;;  %v7541_v61 = vrot.slane %v5787_v36, 2 }
 0x18c   : > { %7525 = vst [vmem:[#allocation91_spill] sm:$0xff] %v5865_v25  ;;  %v1934_v30 = vrot.slane %v1927_v44, 1  ;;  %v5954_v22 = vmul.f32 %v2954_v10, %v4319_v32 }
 0x18d   : > { %7526 = vst [vmem:[#allocation92_spill] sm:$0xff] %v5868_v56  ;;  %v5943_v56 = vadd.f32 %v2775_v54, %v5784_v46  ;;  %v5948_v25 = vsel %vm1335_vm9, %v7541_v61, %v2789_v11  ;;  %v1062_v46 = vpop.f32.mrf.mxu3  ;;  %v1852_v44 = vsel %vm1318_vm8, %v1849_v18, %v1851_v4  ;;  %v2778_v61 = vadd.f32 %v5819_v9, %v5621_v37  ;;  %v5975_v18 = vld [vmem:[%s7146_s2] ss:$0 sm:$0xff]  ;;  %v1873_v11 = vld [vmem:[#allocation2 + $0x90] sm:$0xff] }
 0x18e   : > { %7527 = vst [vmem:[#allocation93_spill] sm:$0xff] %v5871_v33  ;;  %v1942_v33 = vmul.f32 %v1755_v21, %v4308_v24  ;;  %v1866_v21 = vrot.slane %v1859_v53, 2  ;;  %v7544_v53 = vrot.slane %v5585_v5, 2  ;;  %v1935_v54 = vsel %vm1318_vm8, %v1932_v3, %v1934_v30 }
 0x18f   : > { %7530 = vst [vmem:[#allocation94_spill] sm:$0xff] %v5898_v23  ;;  %v5919_v23 = vmul.f32 %v2954_v10, %v4346_v58  ;;  %v7543_v10 = vrot.slane %v5773_v15, 2  ;;  %v7545_v15 = vrot.slane %v5857_v35, 2  ;;  %v7548_v37 = vrot.slane %v5787_v36, 2 }
 0x190   : > { %7531 = vst [vmem:[#allocation95_spill] sm:$0xff] %v5901_v60  ;;  %v1949_v17 = vrot.slane %v1942_v33, 2  ;;  %v2695_v60 = vadd.f32 %v5812_v8, %v5617_v51  ;;  %v1063_v51 = vadd.f32 %v5975_v18, %v1062_v46  ;;  %v978_v8 = vpop.f32.mrf.mxu0  ;;  %v7549_v9 = vrot.slane %v5593_v7, 2 }
 0x191   : > { %7532 = vst [vmem:[#allocation96_spill] sm:$0xff] %v5904_v43  ;;  %v2705_v31 = vsel %vm1335_vm9, %v7544_v53, %v7543_v10  ;;  %v5981_v5 = vsel %vm1335_vm9, %v7545_v15, %v1866_v21  ;;  %v5995_v4 = vadd.f32 %v1852_v44, %v5876_v19  ;;  %v6002_v53 = vadd.f32 %v1935_v54, %v5879_v50 }
 0x192   : > { %7535 = vst [vmem:[#allocation97_spill] sm:$0xff] %v5919_v23  ;;  %v2788_v33 = vsel %vm1335_vm9, %v7549_v9, %v7548_v37  ;;  %v1130_v10 = vmax.f32 %v1063_v51, 0.0  ;;  %v7550_v15 = vrot.slane %v5862_v28, 2  ;;  %v2710_v7 = vadd.f32 %v2705_v31, %v2695_v60 }
 0x193   : > { %7536 = vst [vmem:[#allocation98_spill] sm:$0xff] %v5922_v0  ;;  %v2793_v19 = vadd.f32 %v2788_v33, %v2778_v61  ;;  %v1855_v60 = vadd.f32 %v5885_v47, %v5752_v14  ;;  %v1044_v0 = vpop.f32.mrf.mxu2  ;;  %v1876_v14 = vmul.f32 %v1873_v11, %v7496_v40  ;;  %v1672_v47 = vmax.f32 %v5781_v63, 0.0 }
 0x194   : > { %7537 = vst [vmem:[#allocation99_spill] sm:$0xff] %v5926_v29  ;;  %v6007_v36 = vsel %vm1335_vm9, %v7550_v15, %v1949_v17  ;;  %v1184_v51 = vmin.f32 %v1130_v10, 6.0  ;;  %v7552_v15 = vld [vmem:[#allocation27_spill] sm:$0xff]  ;;  %v7555_v17 = vrot.slane %v5721_v52, 2  ;;  %v6048_v52 = vmul.f32 %v5350_v20, %v1873_v11 }
 0x195   : > { %7538 = vst [vmem:[#allocation100_spill] sm:$0xff] %v5929_v41  ;;  %v7553_v43 = vunpack.i.h.bf16 %v7552_v15  ;;  %v1674_v63 = vmin.f32 %v1672_v47, 6.0  ;;  %v7558_v15 = vrot.slane %v5862_v28, 2  ;;  %v7562_v28 = vrot.slane %v5484_v59, 1 }
 0x196   : > { %7539 = vst [vmem:[#allocation101_spill] sm:$0xff] %v5935_v26 }
 0x197   : > { %7540 = vst [vmem:[#allocation102_spill] sm:$0xff] %v5939_v2  ;;  %v2713_v2 = vld [vmem:[#allocation2 + $0x138] sm:$0xff]  ;;  %v1238_v10 = vmul.f32 %v7553_v43, %v1184_v51  ;;  %v6044_v43 = vmul.f32 %v1873_v11, %v4380_v49 }
 0x198   : > { %7542 = vst [vmem:[#allocation103_spill] sm:$0xff] %v5954_v22  ;;  %v2716_v55 = vmul.f32 %v2713_v2, %v7496_v40  ;;  %v5984_v30 = vmul.f32 %v2713_v2, %v4380_v49  ;;  %v5987_v3 = vmul.f32 %v5350_v20, %v2713_v2  ;;  %v2798_v46 = vmul.f32 %v2713_v2, %v4337_v45 }
 0x199   : > { %v5999_v21 = vmul.f32 %v2713_v2, %v4346_v58  ;;  %v6010_v37 = vmul.f32 %v2713_v2, %v4349_v62  ;;  %v6013_v44 = vmul.f32 %v2713_v2, %v4298_v16  ;;  %v6016_v9 = vmul.f32 %v2713_v2, %v4308_v24  ;;  %1293 = vst.msk [vmem:[#allocation2 + $0x178] sm:$0xff] %vm1245_vm7, %v1238_v10 }
 0x19a   : > { %7546 = vst [vmem:[#allocation104_spill] sm:$0xff] %v5984_v30  ;;  %v6018_v50 = vadd.f32 %v2716_v55, %v2710_v7  ;;  %v6024_v31 = vadd.f32 %v2798_v46, %v2793_v19  ;;  %v6028_v33 = vmul.f32 %v2713_v2, %v4319_v32  ;;  %v7554_v7 = vrot.slane %v5857_v35, 2  ;;  %v1065_v46 = vpop.f32.mrf.mxu3 }
 0x19b   : > { %7547 = vst [vmem:[#allocation105_spill] sm:$0xff] %v5987_v3  ;;  %v1042_v35 = vadd.f32 %v5975_v18, %v1041_v42  ;;  %v1958_v10 = vmul.f32 %v1873_v11, %v4337_v45  ;;  %v979_v2 = vadd.f32 %v5975_v18, %v978_v8  ;;  %v981_v42 = vpop.f32.mrf.mxu0 }
 0x19c   : > { %7551 = vst [vmem:[#allocation106_spill] sm:$0xff] %v6018_v50  ;;  %v1865_v54 = vsel %vm1335_vm9, %v7555_v17, %v7554_v7  ;;  %v1938_v17 = vadd.f32 %v5892_v13, %v5756_v27  ;;  %v7559_v7 = vrot.slane %v5731_v48, 2  ;;  %v7561_v27 = vrot.slane %v5536_v6, 1 }
 0x19d   : > { %7556 = vst [vmem:[#allocation27_spill] sm:$0xff] %v6044_v43  ;;  %v1870_v51 = vadd.f32 %v1865_v54, %v1855_v60  ;;  %v1123_v55 = vmax.f32 %v1042_v35, 0.0  ;;  %v6062_v60 = vmul.f32 %v1873_v11, %v4346_v58  ;;  %v1045_v13 = vadd.f32 %v5975_v18, %v1044_v0  ;;  %v7565_v0 = vld [vmem:[#allocation11_spill] sm:$0xff] }
 0x19e   : > { %7557 = vst [vmem:[#allocation107_spill] sm:$0xff] %v6048_v52  ;;  %v1948_v19 = vsel %vm1335_vm9, %v7559_v7, %v7558_v15  ;;  %v1650_v48 = vsel %vm1318_vm8, %v7562_v28, %v7561_v27  ;;  %v1102_v8 = vmax.f32 %v979_v2, 0.0  ;;  %v7563_v15 = vrot.slane %v5542_v34, 2 }
 0x19f   : > { %v6059_v54 = vadd.f32 %v1876_v14, %v1870_v51  ;;  %1676 = vst.msk [vmem:[#allocation3 + $0x20] sm:$0xff] %vm1245_vm7, %v1674_v63  ;;  %v1177_v35 = vmin.f32 %v1123_v55, 6.0  ;;  %v1654_v14 = vadd.f32 %v1650_v48, %v5526_v38  ;;  %v6074_v51 = vmul.f32 %v1873_v11, %v4349_v62 }
 0x1a0   : > { %v7564_v63 = vrot.slane %v5488_v12, 2  ;;  %v1124_v59 = vmax.f32 %v1045_v13, 0.0  ;;  %v982_v7 = vadd.f32 %v5975_v18, %v981_v42  ;;  %v1953_v27 = vadd.f32 %v1948_v19, %v1938_v17  ;;  %v2955_v61 = vld [vmem:[#allocation2 + $0x178] sm:$0xff]  ;;  %v1047_v42 = vpop.f32.mrf.mxu2 }
 0x1a1   : > { %7560 = vst [vmem:[#allocation108_spill] sm:$0xff] %v6059_v54  ;;  %v7566_v28 = vunpack.i.h.bf16 %v7565_v0  ;;  %v1156_v55 = vmin.f32 %v1102_v8, 6.0  ;;  %v6087_v34 = vmul.f32 %v1873_v11, %v4319_v32  ;;  %v6092_v13 = vmul.f32 %v1873_v11, %v4298_v16 }
 0x1a2   : > { %v1665_v6 = vsel %vm1335_vm9, %v7564_v63, %v7563_v15  ;;  %v1178_v12 = vmin.f32 %v1124_v59, 6.0  ;;  %v6089_v54 = vadd.f32 %v1958_v10, %v1953_v27  ;;  %v1066_v19 = vadd.f32 %v5975_v18, %v1065_v46  ;;  %v6105_v10 = vld [vmem:[%s7148_s4] ss:$0 sm:$0xff] }
 0x1a3   : > { %v1231_v47 = vmul.f32 %v7566_v28, %v1177_v35  ;;  %v1669_v2 = vadd.f32 %v1665_v6, %v1654_v14  ;;  %v1103_v17 = vmax.f32 %v982_v7, 0.0  ;;  %v6098_v8 = vmul.f32 %v1873_v11, %v4308_v24  ;;  %v7567_v14 = vld [vmem:[#allocation14_spill] sm:$0xff] }
 0x1a4   : > { %v7568_v15 = vunpack.i.h.bf16 %v7567_v14  ;;  %v3044_v46 = vmul.f32 %v2955_v61, %v4346_v58  ;;  %v6111_v7 = vadd.f32 %v5912_v1, %v5907_v57  ;;  %v6115_v11 = vadd.f32 %v5948_v25, %v5943_v56  ;;  %v7572_v25 = vld [vmem:[#allocation89_spill] sm:$0xff] }
 0x1a5   : > { %1286 = vst.msk [vmem:[#allocation2 + $0x140] sm:$0xff] %vm1245_vm7, %v1231_v47  ;;  %v1671_v6 = vadd.f32 %v6105_v10, %v1669_v2  ;;  %v1068_v47 = vpop.f32.mrf.mxu3  ;;  %v3127_v0 = vmul.f32 %v2955_v61, %v4298_v16  ;;  %v6125_v57 = vmul.f32 %v2955_v61, %v4380_v49  ;;  %v1131_v1 = vmax.f32 %v1066_v19, 0.0 }
 0x1a6   : > { %v1210_v63 = vmul.f32 %v7568_v15, %v1156_v55  ;;  %v3242_v59 = vld [vmem:[#allocation3 + $0x20] sm:$0xff]  ;;  %v1069_v27 = vadd.f32 %v5975_v18, %v1068_v47  ;;  %v7569_v55 = vld [vmem:[#allocation29_spill] sm:$0xff]  ;;  %v1048_v15 = vadd.f32 %v5975_v18, %v1047_v42  ;;  %v1157_v56 = vmin.f32 %v1103_v17, 6.0 }
 0x1a7   : > { %3748 = vmatmul.msk.f32.gmra.mxu1 %vm1245_vm7, %v3242_v59  ;;  %v1673_v28 = vmax.f32 %v1671_v6, 0.0  ;;  %v7570_v2 = vunpack.i.h.bf16 %v7569_v55  ;;  %7571 = vst [vmem:[#allocation11_spill] sm:$0xff] %v6125_v57  ;;  %v7573_v38 = vrot.slane %v7572_v25, 1  ;;  %v7574_v47 = vld [vmem:[#allocation13_spill] sm:$0xff]  ;;  %v6133_v59 = vmul.f32 %v5350_v20, %v2955_v61  ;;  %v7579_v55 = vld [vmem:[#allocation7_spill] sm:$0xff] }
 0x1a8   : > { %1265 = vst.msk [vmem:[#allocation2 + $0x98] sm:$0xff] %vm1245_vm7, %v1210_v63  ;;  %v7575_v35 = vrot.slane %v7574_v47, 1  ;;  %v6136_v63 = vmul.f32 %v2955_v61, %v4349_v62  ;;  %v3051_v19 = vrot.slane %v3044_v46, 1  ;;  %v3134_v47 = vrot.slane %v3127_v0, 1 }
 0x1a9   : > { %v1232_v14 = vmul.f32 %v7570_v2, %v1178_v12  ;;  %7576 = vst [vmem:[#allocation14_spill] sm:$0xff] %v6133_v59  ;;  %v6139_v12 = vmul.f32 %v2955_v61, %v4308_v24  ;;  %v1675_v42 = vmin.f32 %v1673_v28, 6.0  ;;  %v7580_v2 = vunpack.i.l.bf16 %v7579_v55  ;;  %v7593_v59 = vld [vmem:[#allocation15_spill] sm:$0xff] }
 0x1aa   : > { %v1768_v48 = vsel %vm1318_vm8, %v7575_v35, %v7573_v38  ;;  %7577 = vst [vmem:[#allocation29_spill] sm:$0xff] %v6136_v63  ;;  %v984_v35 = vpop.f32.mrf.mxu0  ;;  %v1871_v43 = vadd.f32 %v5981_v5, %v5995_v4  ;;  %v1132_v61 = vmax.f32 %v1069_v27, 0.0  ;;  %v1125_v28 = vmax.f32 %v1048_v15, 0.0  ;;  %v7591_v5 = vld [vmem:[#allocation90_spill] sm:$0xff] }
 0x1ab   : > { %7578 = vst [vmem:[#allocation89_spill] sm:$0xff] %v6139_v12  ;;  %v1211_v38 = vmul.f32 %v7580_v2, %v1157_v56  ;;  %v6150_v46 = vmin.f32 %v1131_v1, 6.0  ;;  %v1954_v6 = vadd.f32 %v6007_v36, %v6002_v53  ;;  %v7582_v56 = vld [vmem:[#allocation19_spill] sm:$0xff]  ;;  %v6160_v4 = vadd.f32 %v5975_v18, %v984_v35 }
 0x1ac   : > { %1287 = vst.msk [vmem:[#allocation2 + $0x148] sm:$0xff] %vm1245_vm7, %v1232_v14  ;;  %v2714_v52 = vld [vmem:[#allocation2 + $0x140] sm:$0xff]  ;;  %v1773_v55 = vadd.f32 %v1768_v48, %v7582_v56  ;;  %v7583_v27 = vrot.slane %v5919_v23, 1  ;;  %v7585_v48 = vld [vmem:[#allocation91_spill] sm:$0xff]  ;;  %v7589_v35 = vrot.slane %v5926_v29, 1  ;;  %v7592_v17 = vrot.slane %v7591_v5, 2 }
 0x1ad   : > { %1677 = vst.msk [vmem:[#allocation3 + $0x28] sm:$0xff] %vm1245_vm7, %v1675_v42  ;;  %v6168_v53 = vmul.f32 %v2714_v52, %v4346_v58  ;;  %v6171_v36 = vmul.f32 %v2714_v52, %v4298_v16  ;;  %v7586_v1 = vrot.slane %v7585_v48, 1  ;;  %v7587_v42 = vld [vmem:[#allocation17_spill] sm:$0xff]  ;;  %v1071_v2 = vpop.f32.mrf.mxu3  ;;  %v7594_v57 = vrot.slane %v7593_v59, 2 }
 0x1ae   : > { %7581 = vst [vmem:[#allocation13_spill] sm:$0xff] %v6150_v46  ;;  %v6165_v15 = vsel %vm1318_vm8, %v7583_v27, %v3051_v19  ;;  %v6181_v0 = vsel %vm1318_vm8, %v7589_v35, %v3134_v47  ;;  %v6183_v19 = vmin.f32 %v1132_v61, 6.0  ;;  %v1179_v27 = vmin.f32 %v1125_v28, 6.0  ;;  %v7597_v59 = vld [vmem:[#allocation81_spill] sm:$0xff] }
 0x1af   : > { %1266 = vst.msk [vmem:[#allocation2 + $0xa0] sm:$0xff] %vm1245_vm7, %v1211_v38  ;;  %v7588_v38 = vrot.slane %v7587_v42, 1  ;;  %v1874_v14 = vld [vmem:[#allocation2 + $0x98] sm:$0xff]  ;;  %v1783_v48 = vsel %vm1335_vm9, %v7594_v57, %v7592_v17  ;;  %v2717_v42 = vmul.f32 %v2714_v52, %v7496_v40  ;;  %v6200_v61 = vmul.f32 %v5350_v20, %v2714_v52 }
 0x1b0   : > { %7584 = vst [vmem:[#allocation7_spill] sm:$0xff] %v6165_v15  ;;  %v6197_v47 = vadd.f32 %v1783_v48, %v1773_v55  ;;  %v2799_v28 = vmul.f32 %v2714_v52, %v4337_v45  ;;  %v2809_v57 = vrot.slane %v6168_v53, 1  ;;  %v6209_v17 = vmul.f32 %v2714_v52, %v4349_v62  ;;  %v7598_v53 = vld [vmem:[#allocation92_spill] sm:$0xff]  ;;  %v7600_v35 = vld [vmem:[#allocation5_spill] sm:$0xff] }
 0x1b1   : > { %v2610_v56 = vsel %vm1318_vm8, %v7588_v38, %v7586_v1  ;;  %7590 = vst [vmem:[#allocation19_spill] sm:$0xff] %v6181_v0  ;;  %v6192_v1 = vmul.f32 %v2714_v52, %v4380_v49  ;;  %v6195_v38 = vadd.f32 %v5975_v18, %v1071_v2  ;;  %v1963_v55 = vmul.f32 %v1874_v14, %v4346_v58 }
 0x1b2   : > { %7596 = vst [vmem:[#allocation15_spill] sm:$0xff] %v6200_v61  ;;  %v6205_v15 = vadd.f32 %v2610_v56, %v7597_v59  ;;  %v6214_v50 = vmul.f32 %v2714_v52, %v4319_v32  ;;  %v6217_v30 = vmul.f32 %v2714_v52, %v4308_v24  ;;  %v1877_v56 = vmul.f32 %v1874_v14, %v7496_v40 }
 0x1b3   : > { %7595 = vst [vmem:[#allocation91_spill] sm:$0xff] %v6192_v1  ;;  %v2715_v3 = vld [vmem:[#allocation2 + $0x148] sm:$0xff]  ;;  %v7599_v59 = vrot.slane %v7598_v53, 2  ;;  %v7601_v29 = vrot.slane %v7600_v35, 2  ;;  %v6229_v23 = vadd.f32 %v2717_v42, %v6111_v7  ;;  %v6233_v41 = vmul.f32 %v1874_v14, %v4380_v49 }
 0x1b4   : > { %v3243_v48 = vld [vmem:[#allocation3 + $0x28] sm:$0xff]  ;;  %v6236_v52 = vmul.f32 %v5350_v20, %v1874_v14  ;;  %v2801_v53 = vadd.f32 %v2799_v28, %v6115_v11  ;;  %v1959_v35 = vmul.f32 %v1874_v14, %v4337_v45  ;;  %v7605_v7 = vrot.slane %v5999_v21, 1 }
 0x1b5   : > { %3749 = vmatmul.msk.f32.gmra.mxu1 %vm1245_vm7, %v3243_v48  ;;  %v6226_v2 = vsel %vm1335_vm9, %v7601_v29, %v7599_v59  ;;  %7602 = vst [vmem:[#allocation81_spill] sm:$0xff] %v6229_v23  ;;  %v2804_v29 = vmul.f32 %v2715_v3, %v4346_v58  ;;  %v2824_v63 = vrot.slane %v6209_v17, 2  ;;  %v7606_v23 = vrot.slane %v6171_v36, 1  ;;  %v6275_v17 = vld [vmem:[%s7147_s3 + $0x8] ss:$0 sm:$0xff] }
 0x1b6   : > { %7603 = vst [vmem:[#allocation92_spill] sm:$0xff] %v6233_v41  ;;  %v1875_v59 = vld [vmem:[#allocation2 + $0xa0] sm:$0xff]  ;;  %v2810_v42 = vsel %vm1318_vm8, %v7605_v7, %v2809_v57  ;;  %v7607_v20 = vrot.slane %v6013_v44, 1  ;;  %v1969_v48 = vrot.slane %v1963_v55, 1  ;;  %v6252_v28 = vadd.f32 %v1877_v56, %v1871_v43  ;;  %v7612_v41 = vld [vmem:[#allocation57_spill] sm:$0xff] }
 0x1b7   : > { %7604 = vst [vmem:[#allocation109_spill] sm:$0xff] %v6236_v52  ;;  %v6255_v61 = vmul.f32 %v1874_v14, %v4349_v62  ;;  %v2046_v21 = vmul.f32 %v1874_v14, %v4298_v16  ;;  %v2819_v12 = vmul.f32 %v2715_v3, %v4349_v62  ;;  %v1964_v44 = vmul.f32 %v1875_v59, %v4346_v58 }
 0x1b8   : > { %v2893_v1 = vsel %vm1318_vm8, %v7607_v20, %v7606_v23  ;;  %7608 = vst [vmem:[#allocation110_spill] sm:$0xff] %v6252_v28  ;;  %v1961_v0 = vadd.f32 %v1959_v35, %v1954_v6  ;;  %v2042_v23 = vmul.f32 %v1874_v14, %v4319_v32  ;;  %v6264_v55 = vmul.f32 %v1874_v14, %v4308_v24 }
 0x1b9   : > { %v2811_v43 = vrot.slane %v2804_v29, 1  ;;  %v7609_v56 = vrot.slane %v6062_v60, 1  ;;  %v6270_v11 = vmul.f32 %v2715_v3, %v4380_v49  ;;  %v6278_v6 = vmul.f32 %v6275_v17, %v2715_v3 }
 0x1ba   : > { %v2887_v35 = vmul.f32 %v2715_v3, %v4298_v16  ;;  %v1984_v14 = vrot.slane %v6255_v61, 2  ;;  %v2052_v29 = vrot.slane %v2046_v21, 1  ;;  %v1971_v7 = vrot.slane %v1964_v44, 1 }
 0x1bb   : > { %v1970_v20 = vsel %vm1318_vm8, %v7609_v56, %v1969_v48  ;;  %7610 = vst [vmem:[#allocation111_spill] sm:$0xff] %v6270_v11  ;;  %v2047_v60 = vmul.f32 %v1875_v59, %v4298_v16  ;;  %v2826_v56 = vrot.slane %v2819_v12, 2  ;;  %v2902_v28 = vmul.f32 %v2715_v3, %v4308_v24 }
 0x1bc   : > { %7611 = vst [vmem:[#allocation112_spill] sm:$0xff] %v6278_v6  ;;  %v2062_v52 = vmul.f32 %v1875_v59, %v4308_v24  ;;  %v7613_v22 = vunpack.i.l.bf16 %v7612_v41  ;;  %v2812_v5 = vsel %vm1318_vm8, %v2809_v57, %v2811_v43  ;;  %v6289_v26 = vmul.f32 %v1875_v59, %v4380_v49 }
 0x1bd   : > { %v1979_v32 = vmul.f32 %v1875_v59, %v4349_v62  ;;  %v2054_v61 = vrot.slane %v2047_v60, 1  ;;  %v2067_v21 = vrot.slane %v6264_v55, 2  ;;  %v2894_v3 = vrot.slane %v2887_v35, 1 }
 0x1be   : > { %v1233_v46 = vmul.f32 %v7613_v22, %v1179_v27  ;;  %v7614_v41 = vrot.slane %v6092_v13, 1  ;;  %v6300_v27 = vmul.f32 %v6275_v17, %v1875_v59  ;;  %v1972_v57 = vsel %vm1318_vm8, %v1969_v48, %v1971_v7  ;;  %v7617_v7 = vld [vmem:[#allocation21_spill] sm:$0xff] }
 0x1bf   : > { %v2055_v43 = vsel %vm1318_vm8, %v2052_v29, %v2054_v61  ;;  %v2816_v60 = vadd.f32 %v2812_v5, %v2801_v53  ;;  %v2827_v55 = vsel %vm1335_vm9, %v2824_v63, %v2826_v56  ;;  %v2069_v44 = vrot.slane %v2062_v52, 2 }
 0x1c0   : > { %1288 = vst.msk [vmem:[#allocation2 + $0x150] sm:$0xff] %vm1245_vm7, %v1233_v46  ;;  %v2053_v22 = vsel %vm1318_vm8, %v7614_v41, %v2052_v29  ;;  %v7615_v12 = vmax.f32 %v6160_v4, 0.0  ;;  %v2909_v6 = vrot.slane %v2902_v28, 2  ;;  %v1986_v13 = vrot.slane %v1979_v32, 2  ;;  %v1050_v41 = vpop.f32.mrf.mxu2 }
 0x1c1   : > { %v2059_v11 = vadd.f32 %v2055_v43, %v2042_v23  ;;  %v7616_v59 = vrot.slane %v6171_v36, 1  ;;  %v1976_v48 = vadd.f32 %v1972_v57, %v1961_v0  ;;  %v7618_v29 = vunpack.i.h.bf16 %v7617_v7  ;;  %v654_v7 = vpop.permute.xlu2 %653 }
 0x1c2   : > { %v1158_v35 = vmin.f32 %v7615_v12, 6.0  ;;  %v1790_v52 = vadd.f32 %v6105_v10, %v6197_v47  ;;  %v2815_v4 = vadd.f32 %v2810_v42, %v6024_v31  ;;  %v7619_v53 = vrot.slane %v6010_v37, 2 }
 0x1c3   : > { %v2895_v24 = vsel %vm1318_vm8, %v7616_v59, %v2894_v3  ;;  %v2898_v32 = vadd.f32 %v2893_v1, %v6028_v33  ;;  %v7620_v23 = vrot.slane %v6217_v30, 2  ;;  %v7621_v36 = vrot.slane %v6016_v9, 2 }
 0x1c4   : > { %v1212_v5 = vmul.f32 %v7618_v29, %v1158_v35  ;;  %v2825_v28 = vsel %vm1335_vm9, %v7619_v53, %v2824_v63  ;;  %v2070_v56 = vsel %vm1335_vm9, %v2067_v21, %v2069_v44  ;;  %v1133_v61 = vmax.f32 %v6195_v38, 0.0  ;;  %v7629_v53 = vld [vmem:[#allocation93_spill] sm:$0xff] }
 0x1c5   : > { %v2908_v0 = vsel %vm1335_vm9, %v7621_v36, %v7620_v23  ;;  %v1975_v31 = vadd.f32 %v1970_v20, %v6089_v54  ;;  %v1051_v37 = vadd.f32 %v5975_v18, %v1050_v41  ;;  %v1987_v33 = vsel %vm1335_vm9, %v1984_v14, %v1986_v13  ;;  %v7630_v36 = vld [vmem:[#allocation10_spill] sm:$0xff] }
 0x1c6   : > { %1267 = vst.msk [vmem:[#allocation2 + $0xa8] sm:$0xff] %vm1245_vm7, %v1212_v5  ;;  %v2074_v1 = vadd.f32 %v2070_v56, %v2059_v11  ;;  %v2058_v47 = vadd.f32 %v2053_v22, %v6087_v34  ;;  %v2899_v9 = vadd.f32 %v2895_v24, %v6214_v50  ;;  %v7622_v42 = vmov %v7620_v23 }
 0x1c7   : > { %v2910_v44 = vsel %vm1335_vm9, %v7622_v42, %v2909_v6  ;;  %v6337_v38 = vadd.f32 %v1987_v33, %v1976_v48  ;;  %v1792_v12 = vmax.f32 %v1790_v52, 0.0  ;;  %v2830_v3 = vadd.f32 %v2825_v28, %v2815_v4  ;;  %v2833_v54 = vld [vmem:[#allocation2 + $0x150] sm:$0xff]  ;;  %v7625_v6 = vld [vmem:[#allocation23_spill] sm:$0xff] }
 0x1c8   : > { %v2913_v20 = vadd.f32 %v2908_v0, %v2898_v32  ;;  %v7623_v57 = vrot.slane %v6074_v51, 2  ;;  %v7624_v11 = vrot.slane %v6098_v8, 2  ;;  %v6345_v22 = vmin.f32 %v1133_v61, 6.0  ;;  %v648_v32 = vpop.permute.xlu1 %647 }
 0x1c9   : > { %v1126_v30 = vmax.f32 %v1051_v37, 0.0  ;;  %v2629_v50 = vadd.f32 %v6226_v2, %v6205_v15  ;;  %v6352_v35 = vadd.f32 %v7625_v6, %v2074_v1  ;;  %v6354_v41 = vadd.f32 %v2827_v55, %v2816_v60  ;;  %v1074_v2 = vpop.f32.mrf.mxu3 }
 0x1ca   : > { %v1985_v43 = vsel %vm1335_vm9, %v7623_v57, %v1984_v14  ;;  %v2068_v34 = vsel %vm1335_vm9, %v7624_v11, %v2067_v21  ;;  %v7627_v51 = vrot.slane %v5932_v39, 1  ;;  %v7628_v8 = vrot.slane %v7572_v25, 1 }
 0x1cb   : > { %v6347_v24 = vadd.f32 %v1985_v43, %v1975_v31  ;;  %7626 = vst [vmem:[#allocation57_spill] sm:$0xff] %v6352_v35  ;;  %v2073_v13 = vadd.f32 %v2068_v34, %v2058_v47  ;;  %v2836_v21 = vmul.f32 %v2833_v54, %v7496_v40  ;;  %v6363_v59 = vmul.f32 %v2833_v54, %v4380_v49  ;;  %v7633_v31 = vld [vmem:[#allocation90_spill] sm:$0xff]  ;;  %v7635_v43 = vld [vmem:[#allocation9_spill] sm:$0xff] }
 0x1cc   : > { %v1770_v14 = vsel %vm1318_vm8, %v7628_v8, %v7627_v51  ;;  %v6366_v48 = vmul.f32 %v6275_v17, %v2833_v54  ;;  %v1794_v15 = vmin.f32 %v1792_v12, 6.0  ;;  %v2918_v60 = vmul.f32 %v2833_v54, %v4337_v45 }
 0x1cd   : > { %v1993_v55 = vld [vmem:[#allocation2 + $0xa8] sm:$0xff]  ;;  %v6369_v29 = vadd.f32 %v2910_v44, %v2899_v9  ;;  %v1075_v39 = vadd.f32 %v5975_v18, %v1074_v2  ;;  %v1240_v25 = vmul.f32 %v6183_v19, %v654_v7  ;;  %v6374_v5 = vmul.f32 %v2833_v54, %v4346_v58  ;;  %v7631_v19 = vld [vmem:[#allocation101_spill] sm:$0xff]  ;;  %v7661_v9 = vld [vmem:[#allocation82_spill] sm:$0xff] }
 0x1ce   : > { %1796 = vst.msk [vmem:[#allocation3 + $0x30] sm:$0xff] %vm1245_vm7, %v1794_v15  ;;  %v1180_v52 = vmin.f32 %v1126_v30, 6.0  ;;  %v2631_v4 = vadd.f32 %v6105_v10, %v2629_v50  ;;  %v1774_v28 = vadd.f32 %v1770_v14, %v7629_v53  ;;  %v6380_v23 = vmul.f32 %v2833_v54, %v4349_v62  ;;  %v7636_v30 = vld [vmem:[#allocation16_spill] sm:$0xff] }
 0x1cf   : > { %v6383_v0 = vmul.f32 %v2833_v54, %v7630_v36  ;;  %v2165_v56 = vmul.f32 %v1993_v55, %v4298_v16  ;;  %v7632_v61 = vrot.slane %v7631_v19, 2  ;;  %v7634_v37 = vrot.slane %v7633_v31, 2  ;;  %1295 = vst.msk [vmem:[#allocation2 + $0x188] sm:$0xff] %vm1245_vm7, %v1240_v25  ;;  %v7640_v19 = vld [vmem:[#allocation13_spill] sm:$0xff]  ;;  %v7677_v31 = vld [vmem:[#allocation91_spill] sm:$0xff] }
 0x1d0   : > { %v6392_v1 = vadd.f32 %v2836_v21, %v2830_v3  ;;  %v6397_v42 = vmul.f32 %v2833_v54, %v4298_v16  ;;  %v6399_v44 = vadd.f32 %v2918_v60, %v2913_v20  ;;  %v2082_v12 = vmul.f32 %v1993_v55, %v4346_v58  ;;  %v7638_v21 = vld [vmem:[#allocation28_spill] sm:$0xff] }
 0x1d1   : > { %v1785_v33 = vsel %vm1335_vm9, %v7634_v37, %v7632_v61  ;;  %v2171_v57 = vrot.slane %v2165_v56, 1  ;;  %v2180_v11 = vmul.f32 %v1993_v55, %v7635_v43  ;;  %v7637_v50 = vunpack.i.h.bf16 %v7636_v30  ;;  %v7642_v30 = vld [vmem:[#allocation19_spill] sm:$0xff] }
 0x1d2   : > { %v2633_v6 = vmax.f32 %v2631_v4, 0.0  ;;  %v1789_v51 = vadd.f32 %v1785_v33, %v1774_v28  ;;  %v2078_v14 = vmul.f32 %v1993_v55, %v4337_v45  ;;  %v7639_v15 = vrot.slane %v7638_v21, 1 }
 0x1d3   : > { %v1234_v3 = vmul.f32 %v7637_v50, %v1180_v52  ;;  %v1134_v2 = vmax.f32 %v1075_v39, 0.0  ;;  %v2097_v7 = vmul.f32 %v1993_v55, %v4349_v62  ;;  %v2161_v60 = vmul.f32 %v1993_v55, %v7630_v36 }
 0x1d4   : > { %v2173_v20 = vsel %vm1318_vm8, %v2171_v57, %v7639_v15  ;;  %v2635_v25 = vmin.f32 %v2633_v6, 6.0  ;;  %v1791_v52 = vadd.f32 %v6105_v10, %v1789_v51  ;;  %v6416_v4 = vmul.f32 %v2833_v54, %v7635_v43  ;;  %v7643_v51 = vld [vmem:[#allocation89_spill] sm:$0xff]  ;;  %v7645_v15 = vld [vmem:[#allocation100_spill] sm:$0xff] }
 0x1d5   : > { %1289 = vst.msk [vmem:[#allocation2 + $0x158] sm:$0xff] %vm1245_vm7, %v1234_v3  ;;  %v2088_v53 = vrot.slane %v2082_v12, 1  ;;  %v2186_v28 = vrot.slane %v2180_v11, 2  ;;  %v3244_v56 = vld [vmem:[#allocation3 + $0x30] sm:$0xff]  ;;  %v1239_v61 = vmul.f32 %v7640_v19, %v648_v32  ;;  %v1996_v39 = vmul.f32 %v1993_v55, %v7496_v40  ;;  %v7641_v11 = vld [vmem:[#allocation103_spill] sm:$0xff] }
 0x1d6   : > { %v2178_v37 = vadd.f32 %v2173_v20, %v2161_v60  ;;  %3750 = vmatmul.msk.f32.gmra.mxu1 %vm1245_vm7, %v3244_v56  ;;  %2637 = vst.msk [vmem:[#allocation3 + $0xa8] sm:$0xff] %vm1245_vm7, %v2635_v25  ;;  %v1793_v33 = vmax.f32 %v1791_v52, 0.0  ;;  %v6424_v57 = vmul.f32 %v1993_v55, %v4380_v49  ;;  %v6427_v54 = vmul.f32 %v6275_v17, %v1993_v55  ;;  %v667_v25 = vpop.permute.xlu1 %666  ;;  %v7647_v55 = vld [vmem:[#allocation24_spill] sm:$0xff]  ;;  %v7649_v19 = vld [vmem:[#allocation30_spill] sm:$0xff] }
 0x1d7   : > { %v1188_v12 = vmin.f32 %v1134_v2, 6.0  ;;  %v3139_v32 = vadd.f32 %v7642_v30, %v7641_v11  ;;  %1294 = vst.msk [vmem:[#allocation2 + $0x180] sm:$0xff] %vm1245_vm7, %v1239_v61  ;;  %v2080_v50 = vadd.f32 %v2078_v14, %v2073_v13  ;;  %v2103_v3 = vrot.slane %v2097_v7, 2  ;;  %v7651_v13 = vld [vmem:[#allocation29_spill] sm:$0xff]  ;;  %v7653_v7 = vld [vmem:[#allocation98_spill] sm:$0xff]  ;;  %v7675_v52 = vld [vmem:[#allocation88_spill] sm:$0xff] }
 0x1d8   : > { %v1795_v6 = vmin.f32 %v1793_v33, 6.0  ;;  %v7644_v21 = vrot.slane %v7643_v51, 2  ;;  %v7646_v20 = vrot.slane %v7645_v15, 2  ;;  %v7648_v56 = vrot.slane %v7647_v55, 1  ;;  %v3074_v51 = vld [vmem:[#allocation2 + $0x188] sm:$0xff] }
 0x1d9   : > { %v7650_v11 = vrot.slane %v7649_v19, 2  ;;  %v7652_v14 = vrot.slane %v7651_v13, 2  ;;  %v7654_v33 = vrot.slane %v7653_v7, 2  ;;  %v6459_v55 = vmul.f32 %v6275_v17, %v3074_v51 }
 0x1da   : > { %v3150_v60 = vsel %vm1335_vm9, %v7646_v20, %v7644_v21  ;;  %v2090_v2 = vsel %vm1318_vm8, %v2088_v53, %v7648_v56  ;;  %v6452_v21 = vadd.f32 %v1996_v39, %v6347_v24  ;;  %1797 = vst.msk [vmem:[#allocation3 + $0x38] sm:$0xff] %vm1245_vm7, %v1795_v6  ;;  %v6456_v53 = vmul.f32 %v3074_v51, %v4380_v49  ;;  %v7657_v39 = vld [vmem:[#allocation25_spill] sm:$0xff] }
 0x1db   : > { %v2188_v61 = vsel %vm1335_vm9, %v2186_v28, %v7650_v11  ;;  %v6449_v30 = vsel %vm1335_vm9, %v7654_v33, %v7652_v14  ;;  %7656 = vst [vmem:[#allocation23_spill] sm:$0xff] %v6459_v55  ;;  %v3154_v19 = vadd.f32 %v3150_v60, %v3139_v32  ;;  %v3159_v11 = vmul.f32 %v3074_v51, %v4337_v45  ;;  %v7671_v14 = vld [vmem:[#allocation86_spill] sm:$0xff] }
 0x1dc   : > { %v2193_v20 = vadd.f32 %v2188_v61, %v2178_v37  ;;  %7655 = vst [vmem:[#allocation21_spill] sm:$0xff] %v6456_v53  ;;  %v2834_v56 = vld [vmem:[#allocation2 + $0x158] sm:$0xff]  ;;  %v1242_v13 = vmul.f32 %v1188_v12, %v667_v25  ;;  %v6464_v24 = vadd.f32 %v2090_v2, %v2080_v50  ;;  %v7658_v37 = vrot.slane %v7657_v39, 2 }
 0x1dd   : > { %v7659_v61 = vld [vmem:[#allocation97_spill] sm:$0xff]  ;;  %v7662_v47 = vrot.slane %v7661_v9, 1  ;;  %v3006_v32 = vmul.f32 %v2834_v56, %v4298_v16  ;;  %v6480_v12 = vmul.f32 %v3074_v51, %v7496_v40  ;;  %v6483_v50 = vmul.f32 %v3074_v51, %v4346_v58 }
 0x1de   : > { %v6469_v6 = vsel %vm1335_vm9, %v2103_v3, %v7658_v37  ;;  %v7660_v33 = vrot.slane %v7659_v61, 1  ;;  %v3259_v60 = vld [vmem:[#allocation3 + $0xa8] sm:$0xff]  ;;  %v7663_v25 = vrot.slane %v7653_v7, 2  ;;  %1297 = vst.msk [vmem:[#allocation2 + $0x198] sm:$0xff] %vm1245_vm7, %v1242_v13  ;;  %v6500_v61 = vmul.f32 %v3074_v51, %v4349_v62  ;;  %v1077_v7 = vpop.f32.mrf.mxu3 }
 0x1df   : > { %v7664_v3 = vld [vmem:[#allocation85_spill] sm:$0xff]  ;;  %3765 = vmatmul.msk.f32.vlgmr.msrb.gmra.mxu3 %vm1245_vm7, %v3259_v60  ;;  %v2837_v60 = vmul.f32 %v2834_v56, %v7496_v40  ;;  %v6512_v16 = vmul.f32 %v2834_v56, %v4380_v49  ;;  %v6515_v51 = vmul.f32 %v6275_v17, %v2834_v56  ;;  %v2919_v37 = vmul.f32 %v2834_v56, %v4337_v45 }
 0x1e0   : > { %v6476_v28 = vsel %vm1318_vm8, %v7662_v47, %v7660_v33  ;;  %v7665_v2 = vrot.slane %v7664_v3, 2  ;;  %v7666_v47 = vld [vmem:[#allocation36_spill] sm:$0xff]  ;;  %v2923_v33 = vmul.f32 %v2834_v56, %v4346_v58  ;;  %v3012_v3 = vrot.slane %v3006_v32, 1 }
 0x1e1   : > { %v6494_v9 = vadd.f32 %v7666_v47, %v2193_v20  ;;  %v7672_v20 = vrot.slane %v7671_v14, 1  ;;  %v2938_v32 = vmul.f32 %v2834_v56, %v4349_v62  ;;  %v1078_v14 = vadd.f32 %v5975_v18, %v1077_v7 }
 0x1e2   : > { %v6490_v39 = vsel %vm1335_vm9, %v7665_v2, %v7663_v25  ;;  %v6503_v25 = vadd.f32 %v3159_v11, %v3154_v19  ;;  %v7669_v2 = vld [vmem:[#allocation99_spill] sm:$0xff]  ;;  %v3021_v19 = vmul.f32 %v2834_v56, %v7635_v43  ;;  %v7674_v46 = vrot.slane %v7645_v15, 2  ;;  %v7679_v43 = vld [vmem:[#allocation104_spill] sm:$0xff] }
 0x1e3   : > { %7667 = vst [vmem:[#allocation93_spill] sm:$0xff] %v6494_v9  ;;  %v7670_v13 = vrot.slane %v7669_v2, 1  ;;  %v3245_v11 = vld [vmem:[#allocation3 + $0x38] sm:$0xff]  ;;  %v7676_v8 = vrot.slane %v7675_v52, 2  ;;  %v7680_v55 = vrot.slane %v7679_v43, 1  ;;  %v2929_v9 = vrot.slane %v2923_v33, 1 }
 0x1e4   : > { %7668 = vst [vmem:[#allocation10_spill] sm:$0xff] %v6503_v25  ;;  %3751 = vmatmul.msk.f32.gmra.mxu1 %vm1245_vm7, %v3245_v11  ;;  %v7678_v25 = vrot.slane %v7677_v31, 1  ;;  %v3002_v7 = vmul.f32 %v2834_v56, %v7630_v36  ;;  %v7681_v11 = vrot.slane %v6397_v42, 1  ;;  %v6543_v52 = vadd.f32 %v2837_v60, %v6354_v41  ;;  %v3073_v33 = vld [vmem:[#allocation2 + $0x180] sm:$0xff] }
 0x1e5   : > { %v3133_v47 = vsel %vm1318_vm8, %v7672_v20, %v7670_v13  ;;  %v7673_v20 = vld [vmem:[#allocation87_spill] sm:$0xff]  ;;  %v3148_v34 = vsel %vm1335_vm9, %v7676_v8, %v7674_v46  ;;  %v2944_v36 = vrot.slane %v2938_v32, 2  ;;  %v3027_v56 = vrot.slane %v3021_v19, 2  ;;  %v660_v46 = vpop.permute.xlu0 %659 }
 0x1e6   : > { %v3138_v63 = vadd.f32 %v3133_v47, %v7673_v20  ;;  %v2728_v2 = vsel %vm1318_vm8, %v7680_v55, %v7678_v25  ;;  %v3013_v13 = vsel %vm1318_vm8, %v7681_v11, %v3012_v3  ;;  %v7682_v47 = vld [vmem:[#allocation26_spill] sm:$0xff]  ;;  %v6548_v55 = vadd.f32 %v2919_v37, %v6369_v29  ;;  %v673_v11 = vpop.permute.xlu2 %672  ;;  %v7685_v32 = vld [vmem:[#allocation79_spill] sm:$0xff] }
 0x1e7   : > { %v7683_v20 = vrot.slane %v7682_v47, 1  ;;  %v6551_v42 = vmul.f32 %v3073_v33, %v7496_v40  ;;  %v1135_v25 = vmax.f32 %v1078_v14, 0.0  ;;  %v3018_v43 = vadd.f32 %v3013_v13, %v6383_v0 }
 0x1e8   : > { %v6555_v41 = vmul.f32 %v3073_v33, %v4380_v49  ;;  %v6558_v60 = vmul.f32 %v6275_v17, %v3073_v33  ;;  %v7684_v29 = vrot.slane %v6374_v5, 1  ;;  %v7686_v19 = vrot.slane %v7685_v32, 1 }
 0x1e9   : > { %v3015_v15 = vsel %vm1318_vm8, %v3012_v3, %v7683_v20  ;;  %v3153_v20 = vadd.f32 %v3148_v34, %v3138_v63  ;;  %v1189_v14 = vmin.f32 %v1135_v25, 6.0  ;;  %v3158_v0 = vmul.f32 %v3073_v33, %v4337_v45  ;;  %v7691_v34 = vld [vmem:[#allocation6_spill] sm:$0xff] }
 0x1ea   : > { %v3019_v3 = vadd.f32 %v3015_v15, %v3002_v7  ;;  %v2930_v37 = vsel %vm1318_vm8, %v7684_v29, %v2929_v9  ;;  %v2932_v47 = vsel %vm1318_vm8, %v2929_v9, %v7686_v19  ;;  %v3162_v13 = vmul.f32 %v3073_v33, %v4346_v58  ;;  %v7687_v15 = vld [vmem:[#allocation106_spill] sm:$0xff] }
 0x1eb   : > { %v6569_v7 = vmul.f32 %v3073_v33, %v4349_v62  ;;  %v2733_v8 = vadd.f32 %v2728_v2, %v7687_v15  ;;  %v7688_v5 = vrot.slane %v6380_v23, 2  ;;  %v7690_v32 = vrot.slane %v6416_v4, 2  ;;  %v7693_v19 = vld [vmem:[#allocation42_spill] sm:$0xff]  ;;  %v7695_v23 = vld [vmem:[#allocation15_spill] sm:$0xff] }
 0x1ec   : > { %v7692_v9 = vrot.slane %v7691_v34, 2  ;;  %v1243_v25 = vmul.f32 %v1189_v14, %v673_v11  ;;  %v7694_v33 = vrot.slane %v7693_v19, 2  ;;  %v7696_v35 = vrot.slane %v7695_v23, 2  ;;  %v7699_v14 = vld [vmem:[#allocation92_spill] sm:$0xff]  ;;  %v7701_v34 = vld [vmem:[#allocation27_spill] sm:$0xff] }
 0x1ed   : > { %v6575_v29 = vsel %vm1335_vm9, %v7688_v5, %v2944_v36  ;;  %v3028_v63 = vsel %vm1335_vm9, %v7690_v32, %v3027_v56  ;;  %v7697_v5 = vld [vmem:[#allocation105_spill] sm:$0xff]  ;;  %v6594_v32 = vadd.f32 %v2930_v37, %v6399_v44  ;;  %v1241_v11 = vmul.f32 %v6345_v22, %v660_v46 }
 0x1ee   : > { %7689 = vst [vmem:[#allocation101_spill] sm:$0xff] %v6575_v29  ;;  %v3030_v45 = vsel %vm1335_vm9, %v3027_v56, %v7692_v9  ;;  %v6586_v62 = vsel %vm1335_vm9, %v2944_v36, %v7694_v33  ;;  %v3033_v2 = vadd.f32 %v3028_v63, %v3018_v43  ;;  %v7698_v53 = vrot.slane %v7697_v5, 2  ;;  %v1080_v29 = vpop.f32.mrf.mxu3  ;;  %v7704_v37 = vld [vmem:[#allocation109_spill] sm:$0xff]  ;;  %v7708_v33 = vld [vmem:[#allocation111_spill] sm:$0xff] }
 0x1ef   : > { %v3034_v15 = vadd.f32 %v3030_v45, %v3019_v3  ;;  %1298 = vst.msk [vmem:[#allocation2 + $0x1a0] sm:$0xff] %vm1245_vm7, %v1243_v25  ;;  %v7700_v36 = vrot.slane %v7699_v14, 1  ;;  %v7702_v43 = vrot.slane %v7701_v34, 1  ;;  %v3160_v63 = vadd.f32 %v3158_v0, %v3153_v20  ;;  %v7706_v25 = vld [vmem:[#allocation107_spill] sm:$0xff] }
 0x1f0   : > { %v2743_v4 = vsel %vm1335_vm9, %v7698_v53, %v7696_v35  ;;  %v3168_v9 = vrot.slane %v3162_v13, 1  ;;  %v3183_v45 = vrot.slane %v6569_v7, 2  ;;  %v7703_v35 = vld [vmem:[#allocation108_spill] sm:$0xff]  ;;  %1296 = vst.msk [vmem:[#allocation2 + $0x190] sm:$0xff] %vm1245_vm7, %v1241_v11  ;;  %v7707_v22 = vrot.slane %v7706_v25, 2  ;;  %v7711_v13 = vld [vmem:[#allocation102_spill] sm:$0xff] }
 0x1f1   : > { %v2748_v56 = vadd.f32 %v2743_v4, %v2733_v8  ;;  %v1888_v3 = vsel %vm1318_vm8, %v7702_v43, %v7700_v36  ;;  %v7705_v8 = vrot.slane %v7704_v37, 2  ;;  %v1081_v19 = vadd.f32 %v5975_v18, %v1080_v29  ;;  %v7712_v4 = vld [vmem:[#allocation84_spill] sm:$0xff]  ;;  %v7713_v11 = vld [vmem:[#allocation81_spill] sm:$0xff] }
 0x1f2   : > { %v1893_v53 = vadd.f32 %v1888_v3, %v7703_v35  ;;  %v7709_v5 = vrot.slane %v7708_v33, 1  ;;  %v7710_v20 = vrot.slane %v7677_v31, 1  ;;  %v3041_v7 = vadd.f32 %v7711_v13, %v3034_v15  ;;  %v7714_v35 = vld [vmem:[#allocation112_spill] sm:$0xff]  ;;  %v679_v33 = vpop.permute.xlu1 %678 }
 0x1f3   : > { %v2750_v44 = vadd.f32 %v6105_v10, %v2748_v56  ;;  %v1903_v46 = vsel %vm1335_vm9, %v7707_v22, %v7705_v8  ;;  %v3040_v56 = vadd.f32 %v7712_v4, %v3033_v2  ;;  %v1136_v3 = vmax.f32 %v1081_v19, 0.0 }
 0x1f4   : > { %v2730_v0 = vsel %vm1318_vm8, %v7710_v20, %v7709_v5  ;;  %v1908_v36 = vadd.f32 %v1903_v46, %v1893_v53  ;;  %v7715_v25 = vrot.slane %v7714_v35, 2  ;;  %v7716_v8 = vrot.slane %v7695_v23, 2  ;;  %v7720_v46 = vld [vmem:[#allocation110_spill] sm:$0xff] }
 0x1f5   : > { %v2734_v34 = vadd.f32 %v2730_v0, %v7713_v11  ;;  %v2752_v43 = vmax.f32 %v2750_v44, 0.0  ;;  %v7717_v29 = vrot.slane %v6289_v26, 1  ;;  %v7718_v31 = vrot.slane %v7699_v14, 1  ;;  %v7723_v0 = vld [vmem:[#allocation18_spill] sm:$0xff]  ;;  %v3193_v11 = vld [vmem:[#allocation2 + $0x198] sm:$0xff] }
 0x1f6   : > { %v2745_v18 = vsel %vm1335_vm9, %v7716_v8, %v7715_v25  ;;  %v7719_v15 = vrot.slane %v6483_v50, 1  ;;  %v1910_v53 = vadd.f32 %v6105_v10, %v1908_v36  ;;  %v1190_v23 = vmin.f32 %v1136_v3, 6.0  ;;  %v7726_v3 = vld [vmem:[#allocation7_spill] sm:$0xff]  ;;  %v7727_v8 = vld [vmem:[#allocation20_spill] sm:$0xff] }
 0x1f7   : > { %v1890_v22 = vsel %vm1318_vm8, %v7718_v31, %v7717_v29  ;;  %v2749_v44 = vadd.f32 %v2745_v18, %v2734_v34  ;;  %v2754_v5 = vmin.f32 %v2752_v43, 6.0  ;;  %v7721_v20 = vrot.slane %v6300_v27, 2 }
 0x1f8   : > { %v3170_v2 = vsel %vm1318_vm8, %v3168_v9, %v7719_v15  ;;  %v1894_v19 = vadd.f32 %v1890_v22, %v7720_v46  ;;  %v7722_v26 = vrot.slane %v7704_v37, 2  ;;  %v7724_v13 = vrot.slane %v7723_v0, 1  ;;  %v6669_v46 = vld [vmem:[#allocation2 + $0x190] sm:$0xff] }
 0x1f9   : > { %v7725_v4 = vrot.slane %v6424_v57, 1  ;;  %v1912_v36 = vmax.f32 %v1910_v53, 0.0  ;;  %v2751_v34 = vadd.f32 %v6105_v10, %v2749_v44  ;;  %v3056_v25 = vadd.f32 %v7726_v3, %v3041_v7  ;;  %2756 = vst.msk [vmem:[#allocation3 + $0xb0] sm:$0xff] %vm1245_vm7, %v2754_v5 }
 0x1fa   : > { %v1905_v14 = vsel %vm1335_vm9, %v7722_v26, %v7721_v20  ;;  %v3055_v27 = vadd.f32 %v6476_v28, %v3040_v56  ;;  %v1244_v37 = vmul.f32 %v1190_v23, %v679_v33  ;;  %v7728_v18 = vrot.slane %v7727_v8, 2 }
 0x1fb   : > { %v2008_v9 = vsel %vm1318_vm8, %v7725_v4, %v7724_v13  ;;  %v1909_v35 = vadd.f32 %v1905_v14, %v1894_v19  ;;  %v7729_v57 = vrot.slane %v6427_v54, 2  ;;  %v1914_v31 = vmin.f32 %v1912_v36, 6.0 }
 0x1fc   : > { %v2013_v43 = vadd.f32 %v2008_v9, %v6452_v21  ;;  %v2753_v22 = vmax.f32 %v2751_v34, 0.0  ;;  %v6658_v21 = vadd.f32 %v2932_v47, %v6548_v55  ;;  %v3086_v7 = vrot.slane %v6555_v41, 1  ;;  %1299 = vst.msk [vmem:[#allocation2 + $0x1a8] sm:$0xff] %vm1245_vm7, %v1244_v37  ;;  %v3391_v47 = vpop.f32.mrf.mxu1  ;;  %v7735_v34 = vld [vmem:[#allocation22_spill] sm:$0xff] }
 0x1fd   : > { %v2023_v29 = vsel %vm1335_vm9, %v7729_v57, %v7728_v18  ;;  %v1911_v15 = vadd.f32 %v6105_v10, %v1909_v35  ;;  %v3101_v28 = vrot.slane %v6558_v60, 2  ;;  %v6663_v56 = vmul.f32 %v3193_v11, %v7496_v40  ;;  %1916 = vst.msk [vmem:[#allocation3 + $0x40] sm:$0xff] %vm1245_vm7, %v1914_v31  ;;  %v7736_v37 = vld [vmem:[#allocation58_spill] sm:$0xff] }
 0x1fe   : > { %v2028_v53 = vadd.f32 %v2023_v29, %v2013_v43  ;;  %v3175_v54 = vadd.f32 %v3170_v2, %v3160_v63  ;;  %v6667_v44 = vmul.f32 %v3193_v11, %v4380_v49  ;;  %v2755_v19 = vmin.f32 %v2753_v22, 6.0 }
 0x1ff   : > { %v1913_v55 = vmax.f32 %v1911_v15, 0.0  ;;  %v3071_v33 = vadd.f32 %v6449_v30, %v3056_v25  ;;  %v7730_v5 = vrot.slane %v6500_v61, 2  ;;  %v7731_v63 = vrot.slane %v6512_v16, 1  ;;  %v3776_v15 = vld [vmem:[%s4105_s10 + $0x19] sm:$0xff] }
 0x200   : > { %v2030_v20 = vadd.f32 %v6105_v10, %v2028_v53  ;;  %v7732_v2 = vrot.slane %v6363_v59, 1  ;;  %v3070_v14 = vadd.f32 %v6490_v39, %v3055_v27  ;;  %v6684_v13 = vmul.f32 %v6275_v17, %v3193_v11  ;;  %2757 = vst.msk [vmem:[#allocation3 + $0xb8] sm:$0xff] %vm1245_vm7, %v2755_v19  ;;  %v3260_v25 = vld [vmem:[#allocation3 + $0xb0] sm:$0xff] }
 0x201   : > { %v3185_v23 = vsel %vm1335_vm9, %v3183_v45, %v7730_v5  ;;  %v1915_v30 = vmin.f32 %v1913_v55, 6.0  ;;  %v6691_v45 = vld [vmem:[%s7150_s6] ss:$0 sm:$0xff]  ;;  %v3082_v59 = vmul.f32 %v6669_v46, %v4380_v49  ;;  %v7733_v39 = vrot.slane %v6515_v51, 2  ;;  %3766 = vmatmul.msk.f32.gmra.mxu3 %vm1245_vm7, %v3260_v25 }
 0x202   : > { %v2848_v26 = vsel %vm1318_vm8, %v7732_v2, %v7731_v63  ;;  %v2032_v9 = vmax.f32 %v2030_v20, 0.0  ;;  %v7734_v11 = vrot.slane %v6366_v48, 2  ;;  %v1999_v35 = vadd.f32 %v7735_v34, %v6337_v38 }
 0x203   : > { %v2853_v4 = vadd.f32 %v2848_v26, %v6392_v1  ;;  %v6702_v1 = vld [vmem:[#allocation2 + $0x1a0] sm:$0xff]  ;;  %v6704_v43 = vadd.f32 %v3185_v23, %v3175_v54  ;;  %v3206_v3 = vrot.slane %v6667_v44, 1  ;;  %1917 = vst.msk [vmem:[#allocation3 + $0x48] sm:$0xff] %vm1245_vm7, %v1915_v30  ;;  %v7737_v18 = vrot.slane %v7736_v37, 1  ;;  %v7739_v54 = vld [vmem:[#allocation59_spill] sm:$0xff]  ;;  %v7845_v44 = vld [vmem:[#allocation69_spill] sm:$0xff] }
 0x204   : > { %v2863_v36 = vsel %vm1335_vm9, %v7734_v11, %v7733_v39  ;;  %v7738_v48 = vrot.slane %v7723_v0, 1  ;;  %v6715_v29 = vadd.f32 %v6480_v12, %v3071_v33  ;;  %v6720_v38 = vmul.f32 %v6275_v17, %v6669_v46  ;;  %v7742_v33 = vld [vmem:[#allocation77_spill] sm:$0xff]  ;;  %v3246_v30 = vld [vmem:[#allocation3 + $0x40] sm:$0xff]  ;;  %v7745_v11 = vld [vmem:[#allocation78_spill] sm:$0xff] }
 0x205   : > { %v2868_v27 = vadd.f32 %v2863_v36, %v2853_v4  ;;  %v2034_v31 = vmin.f32 %v2032_v9, 6.0  ;;  %v7740_v19 = vrot.slane %v7739_v54, 2  ;;  %v7741_v0 = vrot.slane %v7727_v8, 2  ;;  %3752 = vmatmul.msk.f32.gmra.mxu1 %vm1245_vm7, %v3246_v30  ;;  %v3394_v4 = vpop.f32.mrf.mxu1 }
 0x206   : > { %v2010_v57 = vsel %vm1318_vm8, %v7738_v48, %v7737_v18  ;;  %v3392_v12 = vadd.f32 %v6691_v45, %v3391_v47  ;;  %v7743_v5 = vrot.slane %v7742_v33, 1  ;;  %v7744_v23 = vmov %v7731_v63  ;;  %v3777_v18 = vld [vmem:[%s4105_s10 + $0x21] sm:$0xff] }
 0x207   : > { %v2014_v22 = vadd.f32 %v2010_v57, %v1999_v35  ;;  %v2870_v53 = vadd.f32 %v6105_v10, %v2868_v27  ;;  %v2025_v55 = vsel %vm1335_vm9, %v7741_v0, %v7740_v19  ;;  %v6736_v63 = vadd.f32 %v6551_v42, %v3070_v14  ;;  %2036 = vst.msk [vmem:[#allocation3 + $0x50] sm:$0xff] %vm1245_vm7, %v2034_v31  ;;  %v7748_v27 = vld [vmem:[#allocation31_spill] sm:$0xff]  ;;  %v7751_v31 = vld [vmem:[#allocation32_spill] sm:$0xff]  ;;  %v7754_v19 = vld [vmem:[#allocation21_spill] sm:$0xff] }
 0x208   : > { %v2850_v20 = vsel %vm1318_vm8, %v7744_v23, %v7743_v5  ;;  %v6740_v2 = vmul.f32 %v6702_v1, %v4380_v49  ;;  %v3089_v26 = vrot.slane %v3082_v59, 1  ;;  %v3522_v42 = vadd.f32 %v3776_v15, %v3392_v12  ;;  %v7749_v48 = vld [vmem:[#allocation39_spill] sm:$0xff]  ;;  %v7756_v5 = vld [vmem:[#allocation40_spill] sm:$0xff] }
 0x209   : > { %v2029_v8 = vadd.f32 %v2025_v55, %v2014_v22  ;;  %v2872_v16 = vmax.f32 %v2870_v53, 0.0  ;;  %v2854_v47 = vadd.f32 %v2850_v20, %v6543_v52  ;;  %v2110_v14 = vadd.f32 %v6469_v6, %v6464_v24  ;;  %v3261_v24 = vld [vmem:[#allocation3 + $0xb8] sm:$0xff]  ;;  %v7753_v53 = vld [vmem:[#allocation101_spill] sm:$0xff] }
 0x20a   : > { %v6754_v59 = vmul.f32 %v6275_v17, %v6702_v1  ;;  %v6758_v9 = vmul.f32 %v6669_v46, %v4346_v58  ;;  %v7746_v36 = vrot.slane %v7745_v11, 2  ;;  %v7747_v34 = vrot.slane %v6515_v51, 2  ;;  %3554 = vst.msk [vmem:[%s6746_s23] sm:$0xff] %vm741_vm2, %v3522_v42  ;;  %v7758_v20 = vld [vmem:[#allocation35_spill] sm:$0xff]  ;;  %3767 = vmatmul.msk.f32.gmra.mxu3 %vm1245_vm7, %v3261_v24  ;;  %v7769_v24 = vld [vmem:[#allocation80_spill] sm:$0xff] }
 0x20b   : > { %v2031_v39 = vadd.f32 %v6105_v10, %v2029_v8  ;;  %v3104_v35 = vrot.slane %v6720_v38, 2  ;;  %v2874_v6 = vmin.f32 %v2872_v16, 6.0  ;;  %v2118_v37 = vadd.f32 %v7748_v27, %v2110_v14  ;;  %v3247_v16 = vld [vmem:[#allocation3 + $0x48] sm:$0xff] }
 0x20c   : > { %v2865_v52 = vsel %vm1335_vm9, %v7747_v34, %v7746_v36  ;;  %v7750_v57 = vrot.slane %v7749_v48, 1  ;;  %v7752_v22 = vrot.slane %v7751_v31, 1  ;;  %v3395_v51 = vadd.f32 %v6691_v45, %v3394_v4  ;;  %v7761_v14 = vld [vmem:[#allocation57_spill] sm:$0xff]  ;;  %v7762_v4 = vld [vmem:[#allocation60_spill] sm:$0xff]  ;;  %v7763_v34 = vld [vmem:[#allocation95_spill] sm:$0xff] }
 0x20d   : > { %v2869_v25 = vadd.f32 %v2865_v52, %v2854_v47  ;;  %v2033_v58 = vmax.f32 %v2031_v39, 0.0  ;;  %v2950_v54 = vadd.f32 %v7753_v53, %v6594_v32  ;;  %v7755_v0 = vrot.slane %v7754_v19, 1  ;;  %2876 = vst.msk [vmem:[#allocation3 + $0xc0] sm:$0xff] %vm1245_vm7, %v2874_v6  ;;  %v7760_v47 = vld [vmem:[#allocation83_spill] sm:$0xff]  ;;  %v7765_v6 = vld [vmem:[#allocation4_spill] sm:$0xff]  ;;  %3753 = vmatmul.msk.f32.gmra.mxu1 %vm1245_vm7, %v3247_v16 }
 0x20e   : > { %v2128_v15 = vsel %vm1318_vm8, %v7752_v22, %v7750_v57  ;;  %v7757_v23 = vrot.slane %v7756_v5, 2  ;;  %v7759_v30 = vrot.slane %v7758_v20, 2  ;;  %v3523_v42 = vadd.f32 %v3777_v18, %v3395_v51  ;;  %v7771_v22 = vld [vmem:[#allocation63_spill] sm:$0xff]  ;;  %v7772_v51 = vld [vmem:[#allocation48_spill] sm:$0xff] }
 0x20f   : > { %v6782_v55 = vsel %vm1318_vm8, %v7755_v0, %v3089_v26  ;;  %v2871_v12 = vadd.f32 %v6105_v10, %v2869_v25  ;;  %v2133_v33 = vadd.f32 %v2128_v15, %v2118_v37  ;;  %v2035_v32 = vmin.f32 %v2033_v58, 6.0  ;;  %v7767_v37 = vld [vmem:[#allocation96_spill] sm:$0xff] }
 0x210   : > { %v2143_v8 = vsel %vm1335_vm9, %v7759_v30, %v7757_v23  ;;  %v2958_v26 = vadd.f32 %v7760_v47, %v2950_v54  ;;  %v2096_v39 = vadd.f32 %v7762_v4, %v7761_v14  ;;  %v7764_v52 = vrot.slane %v7763_v34, 1  ;;  %3555 = vst.msk [vmem:[%s6746_s23 + $0x8] sm:$0xff] %vm741_vm2, %v3523_v42  ;;  %v7780_v4 = vld [vmem:[#allocation41_spill] sm:$0xff]  ;;  %v7785_v42 = vld [vmem:[#allocation44_spill] sm:$0xff] }
 0x211   : > { %v2873_v11 = vmax.f32 %v2871_v12, 0.0  ;;  %v2148_v36 = vadd.f32 %v2143_v8, %v2133_v33  ;;  %v7766_v25 = vrot.slane %v7765_v6, 1  ;;  %v7768_v57 = vrot.slane %v7767_v37, 2  ;;  %2037 = vst.msk [vmem:[#allocation3 + $0x58] sm:$0xff] %vm1245_vm7, %v2035_v32  ;;  %v7775_v12 = vld [vmem:[#allocation46_spill] sm:$0xff]  ;;  %v7776_v33 = vld [vmem:[#allocation53_spill] sm:$0xff] }
 0x212   : > { %v7770_v31 = vrot.slane %v7769_v24, 2  ;;  %v2111_v15 = vadd.f32 %v7771_v22, %v2096_v39  ;;  %v7773_v53 = vrot.slane %v7772_v51, 1  ;;  %v7774_v54 = vrot.slane %v7749_v48, 1  ;;  %v7777_v8 = vld [vmem:[#allocation49_spill] sm:$0xff]  ;;  %v7787_v24 = vld [vmem:[#allocation14_spill] sm:$0xff] }
 0x213   : > { %v2968_v27 = vsel %vm1318_vm8, %v7766_v25, %v7764_v52  ;;  %v2216_v23 = vadd.f32 %v7776_v33, %v7775_v12  ;;  %v2875_v20 = vmin.f32 %v2873_v11, 6.0  ;;  %v2150_v30 = vadd.f32 %v6105_v10, %v2148_v36  ;;  %v7781_v52 = vld [vmem:[#allocation11_spill] sm:$0xff]  ;;  %v7784_v36 = vld [vmem:[#allocation93_spill] sm:$0xff]  ;;  %v7792_v22 = vld [vmem:[#allocation50_spill] sm:$0xff] }
 0x214   : > { %v2983_v58 = vsel %vm1335_vm9, %v7770_v31, %v7768_v57  ;;  %v2973_v18 = vadd.f32 %v2968_v27, %v2958_v26  ;;  %v2130_v0 = vsel %vm1318_vm8, %v7774_v54, %v7773_v53  ;;  %v7778_v32 = vrot.slane %v7777_v8, 2  ;;  %v7786_v27 = vld [vmem:[#allocation94_spill] sm:$0xff]  ;;  %v3262_v51 = vld [vmem:[#allocation3 + $0xc0] sm:$0xff]  ;;  %v7794_v12 = vld [vmem:[#allocation45_spill] sm:$0xff] }
 0x215   : > { %v7779_v47 = vrot.slane %v7756_v5, 2  ;;  %v2951_v48 = vadd.f32 %v6586_v62, %v6658_v21  ;;  %v2119_v39 = vadd.f32 %v7780_v4, %v2111_v15  ;;  %v7782_v6 = vrot.slane %v7781_v52, 1  ;;  %2877 = vst.msk [vmem:[#allocation3 + $0xc8] sm:$0xff] %vm1245_vm7, %v2875_v20  ;;  %v7795_v20 = vld [vmem:[#allocation54_spill] sm:$0xff]  ;;  %3768 = vmatmul.msk.f32.gmra.mxu3 %vm1245_vm7, %v3262_v51 }
 0x216   : > { %v2988_v14 = vadd.f32 %v2983_v58, %v2973_v18  ;;  %v7783_v16 = vrot.slane %v7763_v34, 1  ;;  %v2215_v25 = vadd.f32 %v7785_v42, %v7784_v36  ;;  %v2152_v5 = vmax.f32 %v2150_v30, 0.0  ;;  %v7790_v58 = vld [vmem:[#allocation55_spill] sm:$0xff]  ;;  %v7799_v52 = vld [vmem:[#allocation34_spill] sm:$0xff] }
 0x217   : > { %v2145_v26 = vsel %vm1335_vm9, %v7779_v47, %v7778_v32  ;;  %v2959_v57 = vadd.f32 %v7786_v27, %v2951_v48  ;;  %v7788_v31 = vrot.slane %v7787_v24, 2  ;;  %v7789_v62 = vrot.slane %v7767_v37, 2  ;;  %v7797_v47 = vld [vmem:[#allocation43_spill] sm:$0xff] }
 0x218   : > { %v2970_v11 = vsel %vm1318_vm8, %v7783_v16, %v7782_v6  ;;  %v7791_v18 = vrot.slane %v7790_v58, 1  ;;  %v7793_v34 = vrot.slane %v7792_v22, 1  ;;  %v2990_v53 = vadd.f32 %v6105_v10, %v2988_v14  ;;  %v7801_v16 = vld [vmem:[#allocation33_spill] sm:$0xff]  ;;  %v3248_v14 = vld [vmem:[#allocation3 + $0x50] sm:$0xff] }
 0x219   : > { %v2985_v21 = vsel %vm1335_vm9, %v7789_v62, %v7788_v31  ;;  %v2134_v54 = vadd.f32 %v2130_v0, %v2119_v39  ;;  %v2230_v33 = vadd.f32 %v7794_v12, %v2215_v25  ;;  %v2231_v30 = vadd.f32 %v7795_v20, %v2216_v23  ;;  %v7803_v39 = vld [vmem:[#allocation65_spill] sm:$0xff]  ;;  %v7804_v25 = vld [vmem:[#allocation52_spill] sm:$0xff]  ;;  %3754 = vmatmul.msk.f32.gmra.mxu1 %vm1245_vm7, %v3248_v14 }
 0x21a   : > { %v2250_v15 = vsel %vm1318_vm8, %v7793_v34, %v7791_v18  ;;  %v2154_v8 = vmin.f32 %v2152_v5, 6.0  ;;  %v2974_v32 = vadd.f32 %v2970_v11, %v2959_v57  ;;  %v7796_v37 = vmov %v7793_v34  ;;  %v7805_v57 = vld [vmem:[#allocation51_spill] sm:$0xff]  ;;  %v7807_v31 = vld [vmem:[#allocation64_spill] sm:$0xff]  ;;  %v7809_v18 = vld [vmem:[#allocation38_spill] sm:$0xff] }
 0x21b   : > { %v7798_v48 = vrot.slane %v7797_v47, 1  ;;  %v7800_v6 = vrot.slane %v7799_v52, 1  ;;  %v7802_v36 = vrot.slane %v7801_v16, 1  ;;  %v2992_v0 = vmax.f32 %v2990_v53, 0.0  ;;  %v7810_v34 = vld [vmem:[#allocation8_spill] sm:$0xff]  ;;  %v7812_v53 = vld [vmem:[#allocation37_spill] sm:$0xff] }
 0x21c   : > { %v2149_v23 = vadd.f32 %v2145_v26, %v2134_v54  ;;  %v2238_v11 = vadd.f32 %v7803_v39, %v2230_v33  ;;  %v2239_v5 = vadd.f32 %v7804_v25, %v2231_v30  ;;  %2156 = vst.msk [vmem:[#allocation3 + $0x60] sm:$0xff] %vm1245_vm7, %v2154_v8  ;;  %v2989_v27 = vadd.f32 %v2985_v21, %v2974_v32  ;;  %v3397_v8 = vpop.f32.mrf.mxu1  ;;  %v3778_v32 = vld [vmem:[%s4105_s10 + $0x31] sm:$0xff]  ;;  %v7821_v25 = vld [vmem:[#allocation47_spill] sm:$0xff] }
 0x21d   : > { %v2248_v4 = vsel %vm1318_vm8, %v7798_v48, %v7796_v37  ;;  %v2370_v42 = vsel %vm1318_vm8, %v7802_v36, %v7800_v6  ;;  %v7806_v24 = vrot.slane %v7805_v57, 2  ;;  %v7808_v62 = vrot.slane %v7807_v31, 2  ;;  %v7815_v48 = vld [vmem:[#allocation56_spill] sm:$0xff] }
 0x21e   : > { %v2374_v22 = vadd.f32 %v2370_v42, %v7809_v18  ;;  %v7811_v51 = vrot.slane %v7810_v34, 2  ;;  %v7813_v12 = vrot.slane %v7812_v53, 2  ;;  %v2994_v54 = vmin.f32 %v2992_v0, 6.0 }
 0x21f   : > { %v2263_v58 = vsel %vm1335_vm9, %v7808_v62, %v7806_v24  ;;  %v2151_v33 = vadd.f32 %v6105_v10, %v2149_v23  ;;  %v2253_v20 = vadd.f32 %v2248_v4, %v2238_v11  ;;  %v2254_v30 = vadd.f32 %v2250_v15, %v2239_v5  ;;  %v7818_v23 = vld [vmem:[#allocation23_spill] sm:$0xff] }
 0x220   : > { %v2385_v26 = vsel %vm1335_vm9, %v7813_v12, %v7811_v51  ;;  %v2991_v21 = vadd.f32 %v6105_v10, %v2989_v27  ;;  %v7814_v37 = vrot.slane %v7754_v19, 1  ;;  %v7816_v52 = vrot.slane %v7815_v48, 2  ;;  %2996 = vst.msk [vmem:[#allocation3 + $0xd0] sm:$0xff] %vm1245_vm7, %v2994_v54 }
 0x221   : > { %v7817_v6 = vmov %v7806_v24  ;;  %v2389_v4 = vadd.f32 %v2385_v26, %v2374_v22  ;;  %v2153_v15 = vmax.f32 %v2151_v33, 0.0  ;;  %v2268_v42 = vadd.f32 %v2263_v58, %v2253_v20  ;;  %v7823_v22 = vld [vmem:[#allocation72_spill] sm:$0xff]  ;;  %v7826_v33 = vld [vmem:[#allocation73_spill] sm:$0xff]  ;;  %v7827_v20 = vld [vmem:[#allocation62_spill] sm:$0xff] }
 0x222   : > { %v3088_v47 = vsel %vm1318_vm8, %v3086_v7, %v7814_v37  ;;  %v2265_v36 = vsel %vm1335_vm9, %v7817_v6, %v7816_v52  ;;  %v3398_v14 = vadd.f32 %v6691_v45, %v3397_v8  ;;  %v2993_v19 = vmax.f32 %v2991_v21, 0.0  ;;  %v7828_v21 = vld [vmem:[#allocation12_spill] sm:$0xff]  ;;  %v3249_v52 = vld [vmem:[#allocation3 + $0x58] sm:$0xff] }
 0x223   : > { %v3093_v0 = vadd.f32 %v3088_v47, %v6736_v63  ;;  %v7819_v41 = vrot.slane %v7818_v23, 2  ;;  %v2269_v39 = vadd.f32 %v2265_v36, %v2254_v30  ;;  %v7820_v11 = vrot.slane %v7801_v16, 1  ;;  %v3263_v63 = vld [vmem:[#allocation3 + $0xc8] sm:$0xff]  ;;  %v7829_v36 = vld [vmem:[#allocation66_spill] sm:$0xff]  ;;  %3755 = vmatmul.msk.f32.gmra.mxu1 %vm1245_vm7, %v3249_v52 }
 0x224   : > { %v7822_v5 = vrot.slane %v7821_v25, 1  ;;  %v2155_v57 = vmin.f32 %v2153_v15, 6.0  ;;  %v2270_v24 = vadd.f32 %v6105_v10, %v2268_v42  ;;  %v3524_v31 = vadd.f32 %v3778_v32, %v3398_v14  ;;  %3769 = vmatmul.msk.f32.gmra.mxu3 %vm1245_vm7, %v3263_v63  ;;  %v3400_v42 = vpop.f32.mrf.mxu1  ;;  %v3779_v14 = vld [vmem:[%s4105_s10 + $0x39] sm:$0xff] }
 0x225   : > { %v3103_v7 = vsel %vm1335_vm9, %v3101_v28, %v7819_v41  ;;  %v2995_v58 = vmin.f32 %v2993_v19, 6.0  ;;  %v2271_v18 = vadd.f32 %v6105_v10, %v2269_v39  ;;  %v6906_v28 = vld [vmem:[%s7148_s4] ss:$0 sm:$0xff]  ;;  %v2470_v30 = vadd.f32 %v7827_v20, %v7826_v33  ;;  %v7841_v20 = vld [vmem:[#allocation76_spill] sm:$0xff] }
 0x226   : > { %v2368_v27 = vsel %vm1318_vm8, %v7822_v5, %v7820_v11  ;;  %v3108_v62 = vadd.f32 %v3103_v7, %v3093_v0  ;;  %v2391_v16 = vadd.f32 %v6906_v28, %v2389_v4  ;;  %2157 = vst.msk [vmem:[#allocation3 + $0x68] sm:$0xff] %vm1245_vm7, %v2155_v57  ;;  %v2272_v34 = vmax.f32 %v2270_v24, 0.0  ;;  %v7824_v10 = vld [vmem:[#allocation70_spill] sm:$0xff]  ;;  %v7831_v11 = vld [vmem:[#allocation61_spill] sm:$0xff]  ;;  %v7833_v5 = vld [vmem:[#allocation67_spill] sm:$0xff] }
 0x227   : > { %v2373_v60 = vadd.f32 %v2368_v27, %v7823_v22  ;;  %v7825_v26 = vrot.slane %v7824_v10, 2  ;;  %v3179_v8 = vmul.f32 %v6669_v46, %v7828_v21  ;;  %2997 = vst.msk [vmem:[#allocation3 + $0xd8] sm:$0xff] %vm1245_vm7, %v2995_v58  ;;  %v2273_v32 = vmax.f32 %v2271_v18, 0.0  ;;  %v7837_v58 = vld [vmem:[#allocation68_spill] sm:$0xff]  ;;  %v7842_v21 = vld [vmem:[#allocation10_spill] sm:$0xff] }
 0x228   : > { %v3110_v51 = vadd.f32 %v6906_v28, %v3108_v62  ;;  %v2393_v47 = vmax.f32 %v2391_v16, 0.0  ;;  %v3171_v48 = vrot.slane %v6758_v9, 1  ;;  %v2274_v53 = vmin.f32 %v2272_v34, 6.0  ;;  %3556 = vst.msk [vmem:[%s6746_s23 + $0x10] sm:$0xff] %vm741_vm2, %v3524_v31  ;;  %v7835_v62 = vld [vmem:[#allocation71_spill] sm:$0xff]  ;;  %v3264_v34 = vld [vmem:[#allocation3 + $0xd0] sm:$0xff] }
 0x229   : > { %v2383_v54 = vsel %vm1335_vm9, %v7825_v26, %v7813_v12  ;;  %v2478_v4 = vadd.f32 %v7829_v36, %v2470_v30  ;;  %v2275_v15 = vmin.f32 %v2273_v32, 6.0  ;;  %v3094_v46 = vadd.f32 %v6782_v55, %v6715_v29  ;;  %v3195_v16 = vld [vmem:[#allocation2 + $0x1a8] sm:$0xff] }
 0x22a   : > { %v2388_v37 = vadd.f32 %v2383_v54, %v2373_v60  ;;  %v3112_v6 = vmax.f32 %v3110_v51, 0.0  ;;  %v7830_v0 = vmov %v7819_v41  ;;  %2276 = vst.msk [vmem:[#allocation3 + $0x70] sm:$0xff] %vm1245_vm7, %v2274_v53  ;;  %v3401_v7 = vadd.f32 %v6691_v45, %v3400_v42  ;;  %v7840_v12 = vld [vmem:[#allocation75_spill] sm:$0xff] }
 0x22b   : > { %v3105_v9 = vsel %vm1335_vm9, %v7830_v0, %v3104_v35  ;;  %v2395_v39 = vmin.f32 %v2393_v47, 6.0  ;;  %v7832_v25 = vrot.slane %v7831_v11, 1  ;;  %v7834_v27 = vrot.slane %v7833_v5, 1  ;;  %2277 = vst.msk [vmem:[#allocation3 + $0x78] sm:$0xff] %vm1245_vm7, %v2275_v15  ;;  %v3250_v47 = vld [vmem:[#allocation3 + $0x60] sm:$0xff] }
 0x22c   : > { %v2390_v19 = vadd.f32 %v6906_v28, %v2388_v37  ;;  %v3114_v41 = vmin.f32 %v3112_v6, 6.0  ;;  %v3221_v38 = vrot.slane %v6684_v13, 2  ;;  %v3109_v55 = vadd.f32 %v3105_v9, %v3094_v46  ;;  %3770 = vmatmul.msk.f32.gmra.mxu3 %vm1245_vm7, %v3264_v34  ;;  %3756 = vmatmul.msk.f32.gmra.mxu1 %vm1245_vm7, %v3250_v47 }
 0x22d   : > { %v2488_v29 = vsel %vm1318_vm8, %v7834_v27, %v7832_v25  ;;  %v3207_v57 = vrot.slane %v6740_v2, 1  ;;  %v3222_v24 = vrot.slane %v6754_v59, 2  ;;  %v3525_v31 = vadd.f32 %v3779_v14, %v3401_v7  ;;  %2397 = vst.msk [vmem:[#allocation3 + $0x88] sm:$0xff] %vm1245_vm7, %v2395_v39  ;;  %v3251_v5 = vld [vmem:[#allocation3 + $0x68] sm:$0xff] }
 0x22e   : > { %v2392_v35 = vmax.f32 %v2390_v19, 0.0  ;;  %v2493_v23 = vadd.f32 %v2488_v29, %v2478_v4  ;;  %3116 = vst.msk [vmem:[#allocation3 + $0xe0] sm:$0xff] %vm1245_vm7, %v3114_v41  ;;  %v7836_v63 = vrot.slane %v7835_v62, 2  ;;  %v7838_v18 = vrot.slane %v7837_v58, 2  ;;  %v3265_v19 = vld [vmem:[#allocation3 + $0xd8] sm:$0xff]  ;;  %v3403_v29 = vpop.f32.mrf.mxu1 }
 0x22f   : > { %v7839_v13 = vrot.slane %v6483_v50, 1  ;;  %v3111_v2 = vadd.f32 %v6906_v28, %v3109_v55  ;;  %v2489_v10 = vrot.slane %v7840_v12, 1  ;;  %v3198_v26 = vadd.f32 %v6663_v56, %v6704_v43  ;;  %3557 = vst.msk [vmem:[%s6746_s23 + $0x18] sm:$0xff] %vm741_vm2, %v3525_v31  ;;  %v3993_v55 = vld [vmem:[#allocation2 + $0x120] sm:$0xff] }
 0x230   : > { %v2503_v22 = vsel %vm1335_vm9, %v7838_v18, %v7836_v63  ;;  %v2394_v51 = vmin.f32 %v2392_v35, 6.0  ;;  %v3186_v54 = vrot.slane %v3179_v8, 2  ;;  %v2504_v30 = vrot.slane %v7841_v20, 2 }
 0x231   : > { %v3172_v60 = vsel %vm1318_vm8, %v7839_v13, %v3171_v48  ;;  %v2508_v59 = vadd.f32 %v2503_v22, %v2493_v23  ;;  %v3113_v50 = vmax.f32 %v3111_v2, 0.0  ;;  %v3202_v37 = vmul.f32 %v3195_v16, %v4380_v49  ;;  %v3252_v34 = vld [vmem:[#allocation3 + $0x70] sm:$0xff] }
 0x232   : > { %2396 = vst.msk [vmem:[#allocation3 + $0x80] sm:$0xff] %vm1245_vm7, %v2394_v51  ;;  %v3176_v32 = vadd.f32 %v3172_v60, %v7842_v21  ;;  %v3208_v43 = vsel %vm1318_vm8, %v3206_v3, %v3207_v57  ;;  %v3223_v8 = vsel %vm1335_vm9, %v3221_v38, %v3222_v24  ;;  %v7843_v52 = vrot.slane %v6500_v61, 2  ;;  %v7847_v51 = vld [vmem:[#allocation17_spill] sm:$0xff] }
 0x233   : > { %v2510_v33 = vadd.f32 %v6906_v28, %v2508_v59  ;;  %v3115_v56 = vmin.f32 %v3113_v50, 6.0  ;;  %v3217_v6 = vmul.f32 %v6275_v17, %v3195_v16  ;;  %v3213_v36 = vadd.f32 %v3208_v43, %v3198_v26  ;;  %v7849_v26 = vld [vmem:[#allocation74_spill] sm:$0xff]  ;;  %v7850_v50 = vld [vmem:[#allocation5_spill] sm:$0xff]  ;;  %v3253_v43 = vld [vmem:[#allocation3 + $0x78] sm:$0xff] }
 0x234   : > { %v3187_v53 = vsel %vm1335_vm9, %v7843_v52, %v3186_v54  ;;  %v7844_v4 = vmov %v7832_v25  ;;  %v3209_v3 = vrot.slane %v3202_v37, 1  ;;  %v7846_v0 = vmov %v7836_v63  ;;  %3771 = vmatmul.msk.f32.gmra.mxu3 %vm1245_vm7, %v3265_v19  ;;  %3757 = vmatmul.msk.f32.gmra.mxu1 %vm1245_vm7, %v3251_v5  ;;  %v3797_v19 = vld [vmem:[%s4105_s10 + $0x111] sm:$0xff] }
 0x235   : > { %v2512_v48 = vmax.f32 %v2510_v33, 0.0  ;;  %v2490_v15 = vsel %vm1318_vm8, %v7844_v4, %v2489_v10  ;;  %3117 = vst.msk [vmem:[#allocation3 + $0xe8] sm:$0xff] %vm1245_vm7, %v3115_v56  ;;  %v3228_v46 = vadd.f32 %v3223_v8, %v3213_v36  ;;  %v2505_v61 = vsel %vm1335_vm9, %v7846_v0, %v2504_v30  ;;  %v3266_v13 = vld [vmem:[#allocation3 + $0xe0] sm:$0xff] }
 0x236   : > { %v2494_v14 = vadd.f32 %v2490_v15, %v7845_v44  ;;  %v3197_v17 = vmul.f32 %v6702_v1, %v7496_v40  ;;  %v3191_v9 = vadd.f32 %v3187_v53, %v3176_v32  ;;  %v3224_v7 = vrot.slane %v3217_v6, 2  ;;  %v3780_v40 = vld [vmem:[%s4105_s10 + $0x49] sm:$0xff]  ;;  %v3406_v21 = vpop.f32.mrf.mxu1  ;;  %v3781_v32 = vld [vmem:[%s4105_s10 + $0x51] sm:$0xff] }
 0x237   : > { %v2514_v42 = vmin.f32 %v2512_v48, 6.0  ;;  %v3230_v39 = vadd.f32 %v6906_v28, %v3228_v46  ;;  %v3210_v25 = vsel %vm1318_vm8, %v3207_v57, %v3209_v3  ;;  %v2600_v35 = vmul.f32 %v3993_v55, %v4380_v49  ;;  %v3994_v57 = vld [vmem:[%s7147_s3 + $0x8] ss:$0 sm:$0xff] }
 0x238   : > { %v2509_v41 = vadd.f32 %v2505_v61, %v2494_v14  ;;  %v3199_v1 = vadd.f32 %v3197_v17, %v3191_v9  ;;  %v3404_v31 = vadd.f32 %v6691_v45, %v3403_v29  ;;  %v3225_v62 = vsel %vm1335_vm9, %v3222_v24, %v3224_v7  ;;  %v3783_v61 = vld [vmem:[%s4105_s10 + $0x69] sm:$0xff] }
 0x239   : > { %2516 = vst.msk [vmem:[#allocation3 + $0x90] sm:$0xff] %vm1245_vm7, %v2514_v42  ;;  %v3232_v27 = vmax.f32 %v3230_v39, 0.0  ;;  %v2615_v18 = vmul.f32 %v3994_v57, %v3993_v55  ;;  %v2606_v49 = vrot.slane %v2600_v35, 1  ;;  %v7848_v59 = vrot.slane %v7847_v51, 1  ;;  %v3254_v6 = vld [vmem:[#allocation3 + $0x80] sm:$0xff]  ;;  %v3782_v42 = vld [vmem:[%s4105_s10 + $0x61] sm:$0xff] }
 0x23a   : > { %v2511_v11 = vadd.f32 %v6906_v28, %v2509_v41  ;;  %v3214_v63 = vadd.f32 %v3210_v25, %v3199_v1  ;;  %v3526_v22 = vadd.f32 %v3780_v40, %v3404_v31  ;;  %v7851_v33 = vrot.slane %v7850_v50, 2  ;;  %v3784_v25 = vld [vmem:[%s4105_s10 + $0x79] sm:$0xff]  ;;  %v3798_v40 = vld [vmem:[%s4105_s10 + $0x121] sm:$0xff] }
 0x23b   : > { %v3234_v23 = vmin.f32 %v3232_v27, 6.0  ;;  %v2621_v16 = vrot.slane %v2615_v18, 2  ;;  %v2608_v12 = vsel %vm1318_vm8, %v2606_v49, %v7848_v59  ;;  %v3407_v47 = vadd.f32 %v6691_v45, %v3406_v21  ;;  %v3785_v35 = vld [vmem:[%s4105_s10 + $0x81] sm:$0xff]  ;;  %v3787_v51 = vld [vmem:[%s4105_s10 + $0x99] sm:$0xff] }
 0x23c   : > { %v2513_v38 = vmax.f32 %v2511_v11, 0.0  ;;  %v3229_v60 = vadd.f32 %v3225_v62, %v3214_v63  ;;  %3772 = vmatmul.msk.f32.gmra.mxu3 %vm1245_vm7, %v3266_v13  ;;  %3558 = vst.msk [vmem:[%s6746_s23 + $0x20] sm:$0xff] %vm741_vm2, %v3526_v22  ;;  %3758 = vmatmul.msk.f32.gmra.mxu1 %vm1245_vm7, %v3252_v34  ;;  %v2613_v54 = vadd.f32 %v2608_v12, %v7849_v26  ;;  %v3267_v30 = vld [vmem:[#allocation3 + $0xe8] sm:$0xff]  ;;  %v3799_v63 = vld [vmem:[%s4105_s10 + $0x129] sm:$0xff]  ;;  %v3801_v26 = vld [vmem:[%s4105_s10 + $0x141] sm:$0xff] }
 0x23d   : > { %3236 = vst.msk [vmem:[#allocation3 + $0xf0] sm:$0xff] %vm1245_vm7, %v3234_v23  ;;  %v2623_v20 = vsel %vm1335_vm9, %v2621_v16, %v7851_v33  ;;  %v3527_v8 = vadd.f32 %v3781_v32, %v3407_v47  ;;  %v3786_v22 = vld [vmem:[%s4105_s10 + $0x91] sm:$0xff] }
 0x23e   : > { %v2515_v58 = vmin.f32 %v2513_v38, 6.0  ;;  %v3231_v24 = vadd.f32 %v6906_v28, %v3229_v60  ;;  %v2628_v37 = vadd.f32 %v2623_v20, %v2613_v54  ;;  %v3788_v20 = vld [vmem:[%s4105_s10 + $0xa9] sm:$0xff] }
 0x23f   : > { %3559 = vst.msk [vmem:[%s6746_s23 + $0x28] sm:$0xff] %vm741_vm2, %v3527_v8  ;;  %v3789_v8 = vld [vmem:[%s4105_s10 + $0xb1] sm:$0xff] }
 0x240   : > { %2517 = vst.msk [vmem:[#allocation3 + $0x98] sm:$0xff] %vm1245_vm7, %v2515_v58  ;;  %v3233_v2 = vmax.f32 %v3231_v24, 0.0  ;;  %v2630_v56 = vadd.f32 %v6906_v28, %v2628_v37  ;;  %v3255_v28 = vld [vmem:[#allocation3 + $0x88] sm:$0xff]  ;;  %v3256_v4 = vld [vmem:[#allocation3 + $0x90] sm:$0xff] }
 0x241   : > { %v3800_v24 = vld [vmem:[%s4105_s10 + $0x139] sm:$0xff]  ;;  %v3802_v37 = vld [vmem:[%s4105_s10 + $0x151] sm:$0xff] }
 0x242   : > { %v3235_v10 = vmin.f32 %v3233_v2, 6.0  ;;  %v2632_v48 = vmax.f32 %v2630_v56, 0.0 }
 0x244   : > { %3237 = vst.msk [vmem:[#allocation3 + $0xf8] sm:$0xff] %vm1245_vm7, %v3235_v10  ;;  %3773 = vmatmul.msk.f32.gmra.mxu3 %vm1245_vm7, %v3267_v30  ;;  %3759 = vmatmul.msk.f32.gmra.mxu1 %vm1245_vm7, %v3253_v43  ;;  %v2634_v52 = vmin.f32 %v2632_v48, 6.0  ;;  %v3268_v53 = vld [vmem:[#allocation3 + $0xf0] sm:$0xff] }
 0x246   : > { %2636 = vst.msk [vmem:[#allocation3 + $0xa0] sm:$0xff] %vm1245_vm7, %v2634_v52 }
 0x247   : > { %v3257_v14 = vld [vmem:[#allocation3 + $0x98] sm:$0xff] }
 0x24b   : > { %v3269_v36 = vld [vmem:[#allocation3 + $0xf8] sm:$0xff] }
 0x24c   : > { %3774 = vmatmul.msk.f32.gmra.mxu3 %vm1245_vm7, %v3268_v53  ;;  %3760 = vmatmul.msk.f32.gmra.mxu1 %vm1245_vm7, %v3254_v6  ;;  %v3803_v6 = vld [vmem:[%s4105_s10 + $0x159] sm:$0xff] }
 0x24d   : > { %v3258_v46 = vld [vmem:[#allocation3 + $0xa0] sm:$0xff] }
 0x253   : > { %v3409_v15 = vpop.f32.mrf.mxu1 }
 0x254   : > { %3775 = vmatmul.msk.f32.gmra.mxu3 %vm1245_vm7, %v3269_v36  ;;  %3761 = vmatmul.msk.f32.gmra.mxu1 %vm1245_vm7, %v3255_v28  ;;  %v3410_v44 = vadd.f32 %v6691_v45, %v3409_v15  ;;  %v3790_v15 = vld [vmem:[%s4105_s10 + $0xc1] sm:$0xff] }
 0x256   : > { %v3528_v3 = vadd.f32 %v3782_v42, %v3410_v44 }
 0x258   : > { %3560 = vst.msk [vmem:[%s6746_s23 + $0x30] sm:$0xff] %vm741_vm2, %v3528_v3  ;;  %v3804_v3 = vld [vmem:[%s4105_s10 + $0x169] sm:$0xff] }
 0x25c   : > { %3762 = vmatmul.msk.f32.gmra.mxu1 %vm1245_vm7, %v3256_v4 }
 0x261   : > { %v3412_v0 = vpop.f32.mrf.mxu1 }
 0x262   : > { %v3413_v17 = vadd.f32 %v6691_v45, %v3412_v0  ;;  %v3454_v9 = vpop.f32.mrf.mxu3 }
 0x263   : > { %v3455_v7 = vadd.f32 %v6691_v45, %v3454_v9 }
 0x264   : > { %3763 = vmatmul.msk.f32.gmra.mxu1 %vm1245_vm7, %v3257_v14  ;;  %v3529_v41 = vadd.f32 %v3783_v61, %v3413_v17  ;;  %v3791_v17 = vld [vmem:[%s4105_s10 + $0xc9] sm:$0xff] }
 0x265   : > { %v3543_v39 = vadd.f32 %v3797_v19, %v3455_v7  ;;  %v3805_v7 = vld [vmem:[%s4105_s10 + $0x171] sm:$0xff] }
 0x266   : > { %3561 = vst.msk [vmem:[%s6746_s23 + $0x38] sm:$0xff] %vm741_vm2, %v3529_v41 }
 0x267   : > { %3575 = vst.msk [vmem:[%s6746_s23 + $0xa8] sm:$0xff] %vm741_vm2, %v3543_v39 }
 0x26c   : > { %3764 = vmatmul.msk.f32.gmra.mxu1 %vm1245_vm7, %v3258_v46 }
 0x282   : > { %v3415_v11 = vpop.f32.mrf.mxu1 }
 0x283   : > { %v3416_v5 = vadd.f32 %v6691_v45, %v3415_v11 }
 0x284   : > { %v3457_v29 = vpop.f32.mrf.mxu3 }
 0x285   : > { %v3530_v27 = vadd.f32 %v3784_v25, %v3416_v5  ;;  %v3458_v1 = vadd.f32 %v6691_v45, %v3457_v29  ;;  %v3792_v5 = vld [vmem:[%s4105_s10 + $0xd9] sm:$0xff] }
 0x287   : > { %3562 = vst.msk [vmem:[%s6746_s23 + $0x40] sm:$0xff] %vm741_vm2, %v3530_v27  ;;  %v3544_v38 = vadd.f32 %v3798_v40, %v3458_v1  ;;  %v3806_v1 = vld [vmem:[%s4105_s10 + $0x181] sm:$0xff] }
 0x289   : > { %3576 = vst.msk [vmem:[%s6746_s23 + $0xb0] sm:$0xff] %vm741_vm2, %v3544_v38 }
 0x28a   : > { %v3418_v55 = vpop.f32.mrf.mxu1 }
 0x28b   : > { %v3419_v23 = vadd.f32 %v6691_v45, %v3418_v55 }
 0x28d   : > { %v3531_v31 = vadd.f32 %v3785_v35, %v3419_v23  ;;  %v3460_v62 = vpop.f32.mrf.mxu3  ;;  %v3793_v23 = vld [vmem:[%s4105_s10 + $0xe1] sm:$0xff] }
 0x28e   : > { %v3461_v58 = vadd.f32 %v6691_v45, %v3460_v62 }
 0x28f   : > { %3563 = vst.msk [vmem:[%s6746_s23 + $0x48] sm:$0xff] %vm741_vm2, %v3531_v31 }
 0x290   : > { %v3545_v57 = vadd.f32 %v3799_v63, %v3461_v58  ;;  %v3807_v58 = vld [vmem:[%s4105_s10 + $0x189] sm:$0xff] }
 0x292   : > { %3577 = vst.msk [vmem:[%s6746_s23 + $0xb8] sm:$0xff] %vm741_vm2, %v3545_v57 }
 0x296   : > { %v3421_v18 = vpop.f32.mrf.mxu1 }
 0x297   : > { %v3422_v13 = vadd.f32 %v6691_v45, %v3421_v18 }
 0x298   : > { %v3463_v49 = vpop.f32.mrf.mxu3 }
 0x299   : > { %v3532_v60 = vadd.f32 %v3786_v22, %v3422_v13  ;;  %v3464_v16 = vadd.f32 %v6691_v45, %v3463_v49  ;;  %v3794_v13 = vld [vmem:[%s4105_s10 + $0xf1] sm:$0xff] }
 0x29b   : > { %3564 = vst.msk [vmem:[%s6746_s23 + $0x50] sm:$0xff] %vm741_vm2, %v3532_v60  ;;  %v3546_v34 = vadd.f32 %v3800_v24, %v3464_v16  ;;  %v3795_v16 = vld [vmem:[%s4105_s10 + $0xf9] sm:$0xff] }
 0x29d   : > { %3578 = vst.msk [vmem:[%s6746_s23 + $0xc0] sm:$0xff] %vm741_vm2, %v3546_v34 }
 0x2a0   : > { %v3424_v2 = vpop.f32.mrf.mxu1 }
 0x2a1   : > { %v3425_v59 = vadd.f32 %v6691_v45, %v3424_v2 }
 0x2a3   : > { %v3533_v12 = vadd.f32 %v3787_v51, %v3425_v59  ;;  %v3796_v59 = vld [vmem:[%s4105_s10 + $0x109] sm:$0xff] }
 0x2a5   : > { %3565 = vst.msk [vmem:[%s6746_s23 + $0x58] sm:$0xff] %vm741_vm2, %v3533_v12 }
 0x2a7   : > { %v3466_v10 = vpop.f32.mrf.mxu3 }
 0x2a8   : > { %v3467_v54 = vadd.f32 %v6691_v45, %v3466_v10 }
 0x2a9   : > { %v3427_v33 = vpop.f32.mrf.mxu1 }
 0x2aa   : > { %v3547_v50 = vadd.f32 %v3801_v26, %v3467_v54  ;;  %v3428_v30 = vadd.f32 %v6691_v45, %v3427_v33 }
 0x2ac   : > { %3579 = vst.msk [vmem:[%s6746_s23 + $0xc8] sm:$0xff] %vm741_vm2, %v3547_v50  ;;  %v3534_v21 = vadd.f32 %v3788_v20, %v3428_v30 }
 0x2ae   : > { %3566 = vst.msk [vmem:[%s6746_s23 + $0x60] sm:$0xff] %vm741_vm2, %v3534_v21 }
 0x2af   : > { %v3469_v32 = vpop.f32.mrf.mxu3 }
 0x2b0   : > { %v3470_v47 = vadd.f32 %v6691_v45, %v3469_v32 }
 0x2b1   : > { %v3430_v43 = vpop.f32.mrf.mxu1 }
 0x2b2   : > { %v3548_v56 = vadd.f32 %v3802_v37, %v3470_v47  ;;  %v3431_v48 = vadd.f32 %v6691_v45, %v3430_v43 }
 0x2b4   : > { %3580 = vst.msk [vmem:[%s6746_s23 + $0xd0] sm:$0xff] %vm741_vm2, %v3548_v56  ;;  %v3535_v52 = vadd.f32 %v3789_v8, %v3431_v48 }
 0x2b6   : > { %3567 = vst.msk [vmem:[%s6746_s23 + $0x68] sm:$0xff] %vm741_vm2, %v3535_v52 }
 0x2b7   : > { %v3472_v53 = vpop.f32.mrf.mxu3 }
 0x2b8   : > { %v3473_v36 = vadd.f32 %v6691_v45, %v3472_v53 }
 0x2b9   : > { %v3433_v4 = vpop.f32.mrf.mxu1 }
 0x2ba   : > { %v3549_v28 = vadd.f32 %v3803_v6, %v3473_v36  ;;  %v3434_v42 = vadd.f32 %v6691_v45, %v3433_v4 }
 0x2bc   : > { %3581 = vst.msk [vmem:[%s6746_s23 + $0xd8] sm:$0xff] %vm741_vm2, %v3549_v28  ;;  %v3536_v44 = vadd.f32 %v3790_v15, %v3434_v42 }
 0x2be   : > { %3568 = vst.msk [vmem:[%s6746_s23 + $0x70] sm:$0xff] %vm741_vm2, %v3536_v44 }
 0x2bf   : > { %v3475_v14 = vpop.f32.mrf.mxu3 }
 0x2c0   : > { %v3476_v46 = vadd.f32 %v6691_v45, %v3475_v14 }
 0x2c1   : > { %v3436_v61 = vpop.f32.mrf.mxu1 }
 0x2c2   : > { %v3550_v0 = vadd.f32 %v3804_v3, %v3476_v46  ;;  %v3437_v9 = vadd.f32 %v6691_v45, %v3436_v61 }
 0x2c4   : > { %3582 = vst.msk [vmem:[%s6746_s23 + $0xe0] sm:$0xff] %vm741_vm2, %v3550_v0  ;;  %v3537_v19 = vadd.f32 %v3791_v17, %v3437_v9 }
 0x2c6   : > { %3569 = vst.msk [vmem:[%s6746_s23 + $0x78] sm:$0xff] %vm741_vm2, %v3537_v19 }
 0x2c7   : > { %v3478_v41 = vpop.f32.mrf.mxu3 }
 0x2c8   : > { %v3479_v39 = vadd.f32 %v6691_v45, %v3478_v41 }
 0x2c9   : > { %v3439_v25 = vpop.f32.mrf.mxu1 }
 0x2ca   : > { %v3551_v11 = vadd.f32 %v3805_v7, %v3479_v39  ;;  %v3440_v27 = vadd.f32 %v6691_v45, %v3439_v25 }
 0x2cc   : > { %3583 = vst.msk [vmem:[%s6746_s23 + $0xe8] sm:$0xff] %vm741_vm2, %v3551_v11  ;;  %v3538_v29 = vadd.f32 %v3792_v5, %v3440_v27 }
 0x2ce   : > { %3570 = vst.msk [vmem:[%s6746_s23 + $0x80] sm:$0xff] %vm741_vm2, %v3538_v29 }
 0x2cf   : > { %v3481_v40 = vpop.f32.mrf.mxu3 }
 0x2d0   : > { %v3482_v38 = vadd.f32 %v6691_v45, %v3481_v40 }
 0x2d1   : > { %v3442_v35 = vpop.f32.mrf.mxu1 }
 0x2d2   : > { %v3552_v55 = vadd.f32 %v3806_v1, %v3482_v38  ;;  %v3443_v31 = vadd.f32 %v6691_v45, %v3442_v35 }
 0x2d4   : > { %3584 = vst.msk [vmem:[%s6746_s23 + $0xf0] sm:$0xff] %vm741_vm2, %v3552_v55  ;;  %v3539_v62 = vadd.f32 %v3793_v23, %v3443_v31 }
 0x2d6   : > { %3571 = vst.msk [vmem:[%s6746_s23 + $0x88] sm:$0xff] %vm741_vm2, %v3539_v62 }
 0x2d7   : > { %v3484_v63 = vpop.f32.mrf.mxu3 }
 0x2d8   : > { %v3485_v57 = vadd.f32 %v6691_v45, %v3484_v63 }
 0x2d9   : > { %v3445_v22 = vpop.f32.mrf.mxu1 }
 0x2da   : > { %v3553_v18 = vadd.f32 %v3807_v58, %v3485_v57  ;;  %v3446_v60 = vadd.f32 %v6691_v45, %v3445_v22 }
 0x2dc   : > { %3585 = vst.msk [vmem:[%s6746_s23 + $0xf8] sm:$0xff] %vm741_vm2, %v3553_v18  ;;  %v3540_v49 = vadd.f32 %v3794_v13, %v3446_v60 }
 0x2de   : > { %3572 = vst.msk [vmem:[%s6746_s23 + $0x90] sm:$0xff] %vm741_vm2, %v3540_v49 }
 0x2e1   : > { %v3448_v24 = vpop.f32.mrf.mxu1 }
 0x2e2   : > { %v3449_v34 = vadd.f32 %v6691_v45, %v3448_v24 }
 0x2e4   : > { %v3541_v2 = vadd.f32 %v3795_v16, %v3449_v34 }
 0x2e6   : > { %3573 = vst.msk [vmem:[%s6746_s23 + $0x98] sm:$0xff] %vm741_vm2, %v3541_v2 }
 0x2e9   : > { %v3451_v51 = vpop.f32.mrf.mxu1 }
 0x2ea   : > { %v3452_v12 = vadd.f32 %v6691_v45, %v3451_v51 }
 0x2ec   : > { %v3542_v10 = vadd.f32 %v3796_v59, %v3452_v12 }
 0x2ee   : > { %3574 = vst.msk [vmem:[%s6746_s23 + $0xa0] sm:$0xff] %vm741_vm2, %v3542_v10 }
 0x2ef PF: > { %s17_s26 = sadd.s32 1, %s4017_s26   ;;  %s7852_s24 = smov %s4013_s25 }
 0x2f0   : > { %p14_p5 = scmp.ge.s32.totalorder %s17_s26, 4   ;;  %s7853_s25 = smov %s7855_s27 }
 0x2f2   :  { %16 = sbr.rel (!%p14_p5) target bundleno = 2 (0x2), region = 97 }

</bundles_post_ra>
